<compile_context>
chip_gen: v6e
topology: v6e:2x2x1
jax: 0.10.0
libtpu: 0.0.40
codegen_flags: <defaults>
</compile_context>

<pallas_src>
import functools
import math

import numpy as np
import jax
import jax.numpy as jnp
from jax import lax
from jax.experimental import pallas as pl
from jax.experimental.pallas import tpu as pltpu


# upscale_factor -> (stride, padding, kernel_size), as in FeedbackBlock.__init__
_UPSCALE_CFG = {2: (2, 2, 6), 3: (3, 2, 7), 4: (4, 2, 8), 8: (8, 2, 12)}

_BF16 = jnp.bfloat16
_VMEM_LIMIT = 48 * 1024 * 1024   # < 64 MiB physical on v7x, well under v5e/v6e 128 MiB


def _choose_tm(m, ktot, c):
    """Largest M tile whose double-buffered working set stays within a conservative budget."""
    budget = 20 << 20
    fixed = 4 * ktot * c                    # resident (double-buffered) bf16 weights
    per_row = max(4 * ktot + 16 * c,        # GEMM pass: bf16 A (x2) + f32 acc/temps + bf16 y
                  8 * c)                    # apply pass: bf16 y + bf16 out (x2 each)
    cap = max(8, min(1024, max(budget - fixed, 1 << 20) // per_row))
    if m <= cap:
        return m                            # single (full-dim) block is always legal
    if cap >= 128:
        return (cap // 128) * 128
    return (cap // 8) * 8


# ---------------------------------------------------------------------------
# Pallas kernels
# ---------------------------------------------------------------------------
def _matmul_stats_kernel(*refs, n_seg, tm, m_total):
    """y = sum_t A_t @ W_t (bf16 in, f32 MXU acc); per-tile per-channel sum / sum(y^2)."""
    a_refs = refs[:n_seg]
    w_refs = refs[n_seg:2 * n_seg]
    y_ref, s1_ref, s2_ref = refs[2 * n_seg:]

    acc = jnp.dot(a_refs[0][...], w_refs[0][...], preferred_element_type=jnp.float32)
    for t in range(1, n_seg):
        acc = acc + jnp.dot(a_refs[t][...], w_refs[t][...],
                            preferred_element_type=jnp.float32)
    y_ref[...] = acc.astype(y_ref.dtype)

    # Mask ragged-tail rows (beyond the true M) so batch statistics stay exact.
    row = pl.program_id(0) * tm + lax.broadcasted_iota(jnp.int32, (acc.shape[0], 1), 0)
    accm = jnp.where(row < m_total, acc, 0.0)
    s1_ref[0] = jnp.sum(accm, axis=0, keepdims=True)
    s2_ref[0] = jnp.sum(accm * accm, axis=0, keepdims=True)


def _matmul_bias_act_kernel(*refs, n_seg, neg_slope):
    """o = act(sum_t A_t @ W_t + b) for the norm_type=None path (fused epilogue)."""
    a_refs = refs[:n_seg]
    w_refs = refs[n_seg:2 * n_seg]
    b_ref, o_ref = refs[2 * n_seg:]

    acc = jnp.dot(a_refs[0][...], w_refs[0][...], preferred_element_type=jnp.float32)
    for t in range(1, n_seg):
        acc = acc + jnp.dot(a_refs[t][...], w_refs[t][...],
                            preferred_element_type=jnp.float32)
    z = acc + b_ref[...]
    o_ref[...] = jnp.where(z > 0, z, neg_slope * z).astype(o_ref.dtype)


def _scale_shift_act_kernel(y_ref, sc_ref, sh_ref, o_ref, *, neg_slope):
    """Fused BatchNorm apply + activation: o = act(y * scale + shift)."""
    z = y_ref[...].astype(jnp.float32) * sc_ref[...] + sh_ref[...]
    o_ref[...] = jnp.where(z > 0, z, neg_slope * z).astype(o_ref.dtype)


# ---------------------------------------------------------------------------
# Dense (GEMM) helpers built on the Pallas kernels.  A is a list of (M, K_i) segments.
# ---------------------------------------------------------------------------
def _dense_bn_act(a_list, w_list, gamma, beta, *, eps, neg_slope, stat_tile=1):
    """act(BN(sum_t A_t @ W_t)) with training-mode (batch) statistics -> (M, C) bf16.

    stat_tile > 1: channels are (stat_tile, C//stat_tile) phase copies that share BN stats
    (used by the sub-pixel deconv decomposition).
    """
    m = int(a_list[0].shape[0])
    c = int(w_list[0].shape[1])
    ktot = sum(int(wi.shape[0]) for wi in w_list)
    n_seg = len(a_list)
    tm = _choose_tm(m, ktot, c)
    n_tiles = -(-m // tm)

    a_bf = [a.astype(_BF16) for a in a_list]
    w_bf = [wi.astype(_BF16) for wi in w_list]

    in_specs = ([pl.BlockSpec((tm, int(a.shape[1])), lambda i: (i, 0)) for a in a_bf] +
                [pl.BlockSpec((int(wi.shape[0]), c), lambda i: (0, 0)) for wi in w_bf])

    y, s1, s2 = pl.pallas_call(
        functools.partial(_matmul_stats_kernel, n_seg=n_seg, tm=tm, m_total=m),
        out_shape=(jax.ShapeDtypeStruct((m, c), _BF16),
                   jax.ShapeDtypeStruct((n_tiles, 1, c), jnp.float32),
                   jax.ShapeDtypeStruct((n_tiles, 1, c), jnp.float32)),
        grid=(n_tiles,),
        in_specs=in_specs,
        out_specs=(pl.BlockSpec((tm, c), lambda i: (i, 0)),
                   pl.BlockSpec((1, 1, c), lambda i: (i, 0, 0)),
                   pl.BlockSpec((1, 1, c), lambda i: (i, 0, 0))),
        compiler_params=pltpu.CompilerParams(
            dimension_semantics=("parallel",), vmem_limit_bytes=_VMEM_LIMIT),
    )(*a_bf, *w_bf)

    # Host-side (tiny) stat reduction: per-tile rows -> per-channel sums.
    s1 = jnp.sum(s1[:, 0, :], axis=0)
    s2 = jnp.sum(s2[:, 0, :], axis=0)
    if stat_tile > 1:
        s1 = s1.reshape(stat_tile, -1).sum(axis=0)
        s2 = s2.reshape(stat_tile, -1).sum(axis=0)
    count = m * stat_tile
    mean = s1 / count
    var = jnp.maximum(s2 / count - mean * mean, 0.0)   # biased variance (torch BN training)
    scale = gamma / jnp.sqrt(var + eps)
    shift = beta - mean * scale
    if stat_tile > 1:
        scale = jnp.tile(scale, stat_tile)
        shift = jnp.tile(shift, stat_tile)

    out = pl.pallas_call(
        functools.partial(_scale_shift_act_kernel, neg_slope=neg_slope),
        out_shape=jax.ShapeDtypeStruct((m, c), _BF16),
        grid=(n_tiles,),
        in_specs=[pl.BlockSpec((tm, c), lambda i: (i, 0)),
                  pl.BlockSpec((1, c), lambda i: (0, 0)),
                  pl.BlockSpec((1, c), lambda i: (0, 0))],
        out_specs=pl.BlockSpec((tm, c), lambda i: (i, 0)),
        compiler_params=pltpu.CompilerParams(
            dimension_semantics=("parallel",), vmem_limit_bytes=_VMEM_LIMIT),
    )(y, scale.reshape(1, c).astype(jnp.float32), shift.reshape(1, c).astype(jnp.float32))
    return out


def _dense_bias_act(a_list, w_list, bias, *, neg_slope):
    """act(sum_t A_t @ W_t + b) for the norm_type=None path -> (M, C) bf16."""
    m = int(a_list[0].shape[0])
    c = int(w_list[0].shape[1])
    ktot = sum(int(wi.shape[0]) for wi in w_list)
    n_seg = len(a_list)
    tm = _choose_tm(m, ktot, c)
    n_tiles = -(-m // tm)

    a_bf = [a.astype(_BF16) for a in a_list]
    w_bf = [wi.astype(_BF16) for wi in w_list]

    in_specs = ([pl.BlockSpec((tm, int(a.shape[1])), lambda i: (i, 0)) for a in a_bf] +
                [pl.BlockSpec((int(wi.shape[0]), c), lambda i: (0, 0)) for wi in w_bf] +
                [pl.BlockSpec((1, c), lambda i: (0, 0))])

    out = pl.pallas_call(
        functools.partial(_matmul_bias_act_kernel, n_seg=n_seg, neg_slope=neg_slope),
        out_shape=jax.ShapeDtypeStruct((m, c), _BF16),
        grid=(n_tiles,),
        in_specs=in_specs,
        out_specs=pl.BlockSpec((tm, c), lambda i: (i, 0)),
        compiler_params=pltpu.CompilerParams(
            dimension_semantics=("parallel",), vmem_limit_bytes=_VMEM_LIMIT),
    )(*a_bf, *w_bf, bias.reshape(1, c).astype(jnp.float32))
    return out


# ---------------------------------------------------------------------------
# Conv / ConvTranspose lowering
# ---------------------------------------------------------------------------
def _im2col(x, k, stride, padding):
    """x: (N,H,W,Cin) -> (N*hout*wout, k*k*Cin); column order (dy, dx, cin)."""
    n, h, w, cin = x.shape
    hout = (h + 2 * padding - k) // stride + 1
    wout = (w + 2 * padding - k) // stride + 1
    xp = jnp.pad(x, ((0, 0), (padding, padding), (padding, padding), (0, 0))) if padding else x
    cols = [xp[:, dy:dy + stride * (hout - 1) + 1:stride,
               dx:dx + stride * (wout - 1) + 1:stride, :]
            for dy in range(k) for dx in range(k)]
    patches = jnp.stack(cols, axis=3)                     # (n, hout, wout, k*k, cin)
    return patches.reshape(n * hout * wout, k * k * cin), (n, hout, wout)


def _deconv_subpixel_weight(w_iokk, k, s, p):
    """ConvTranspose2d weight (Cin,Cout,k,k) -> equivalent 3x3/stride-1/pad-1 conv weight
    of shape (9*Cin, s*s*Cout); output channel order is (phase_y, phase_x, Cout)."""
    cin, cout = int(w_iokk.shape[0]), int(w_iokk.shape[1])
    j = np.arange(3) - 1                                   # relative input offset
    r = np.arange(s)                                       # output phase
    ky = r[:, None] + p - s * j[None, :]                   # (s, 3) kernel index per (phase, tap)
    valid = (ky >= 0) & (ky < k)
    kyc = np.clip(ky, 0, k - 1)

    wt = jnp.transpose(w_iokk, (2, 3, 0, 1))               # (k, k, cin, cout)
    w6 = wt[kyc[:, :, None, None], kyc[None, None, :, :]]  # (r, a, rx, b, cin, cout)
    mask = jnp.asarray((valid[:, :, None, None] & valid[None, None, :, :]).astype(np.float32))
    w6 = w6 * mask[..., None, None]
    w6 = jnp.transpose(w6, (1, 3, 4, 0, 2, 5))             # (a, b, cin, r, rx, cout)
    return w6.reshape(9 * cin, s * s * cout)


def _conv1x1_multi(features, p, *, use_bn, neg_slope, eps):
    """1x1 ConvBlock over an (implicitly) concatenated feature list — no concat materialized."""
    n, h, w = features[0].shape[:3]
    sizes = [int(f.shape[3]) for f in features]
    m = n * h * w
    cout = int(p["w"].shape[0])
    a_list = [f.reshape(m, f.shape[3]) for f in features]
    w_full = jnp.transpose(p["w"].reshape(cout, sum(sizes)))      # (cin_tot, cout)
    offs = np.cumsum([0] + sizes)
    w_list = [w_full[int(offs[i]):int(offs[i + 1])] for i in range(len(sizes))]
    if use_bn:   # conv bias exactly cancelled by training-mode BN -> dropped
        y = _dense_bn_act(a_list, w_list, p["gamma"], p["beta"], eps=eps, neg_slope=neg_slope)
    else:
        y = _dense_bias_act(a_list, w_list, p["b"], neg_slope=neg_slope)
    return y.reshape(n, h, w, cout)


def _conv_block_k(x, p, *, k, stride, padding, use_bn, neg_slope, eps):
    """k x k strided ConvBlock (CNA): conv -> [BN] -> act."""
    a, (n, hout, wout) = _im2col(x, k, stride, padding)
    cout, cin = int(p["w"].shape[0]), int(p["w"].shape[1])
    w2 = jnp.transpose(p["w"], (2, 3, 1, 0)).reshape(k * k * cin, cout)
    if use_bn:
        y = _dense_bn_act([a], [w2], p["gamma"], p["beta"], eps=eps, neg_slope=neg_slope)
    else:
        y = _dense_bias_act([a], [w2], p["b"], neg_slope=neg_slope)
    return y.reshape(n, hout, wout, cout)


def _deconv_block_k(x, p, *, k, stride, padding, use_bn, neg_slope, eps):
    """DeconvBlock (CNA) via sub-pixel decomposition: 3x3 stride-1 conv + pixel shuffle."""
    n, h, w, cin = x.shape
    s = stride
    cout = int(p["w"].shape[1])
    # For all supported configs the transposed conv upsamples exactly by s.
    assert (h - 1) * s - 2 * padding + k == s * h
    assert (w - 1) * s - 2 * padding + k == s * w

    a, _ = _im2col(x, 3, 1, 1)                              # (n*h*w, 9*cin)
    w2 = _deconv_subpixel_weight(p["w"], k, s, padding)     # (9*cin, s*s*cout)
    if use_bn:
        y = _dense_bn_act([a], [w2], p["gamma"], p["beta"], eps=eps,
                          neg_slope=neg_slope, stat_tile=s * s)
    else:
        y = _dense_bias_act([a], [w2], jnp.tile(p["b"], s * s), neg_slope=neg_slope)
    y = y.reshape(n, h, w, s, s, cout).transpose(0, 1, 3, 2, 4, 5)
    return y.reshape(n, s * h, s * w, cout)


# ---------------------------------------------------------------------------
# FeedbackBlock forward (Pallas path).  Internally NHWC/bf16; NCHW f32 at the boundaries.
# ---------------------------------------------------------------------------
def feedback_block_forward(x_nchw, params, *, num_groups, upscale_factor,
                           use_bn=True, neg_slope=0.0, eps=1e-5, last_hidden=None):
    stride, padding, k = _UPSCALE_CFG[upscale_factor]
    x = jnp.transpose(x_nchw, (0, 2, 3, 1)).astype(_BF16)
    lh = x if last_hidden is None else jnp.transpose(last_hidden, (0, 2, 3, 1)).astype(_BF16)

    cb1 = functools.partial(_conv1x1_multi, use_bn=use_bn, neg_slope=neg_slope, eps=eps)
    cbk = functools.partial(_conv_block_k, k=k, stride=stride, padding=padding,
                            use_bn=use_bn, neg_slope=neg_slope, eps=eps)
    dbk = functools.partial(_deconv_block_k, k=k, stride=stride, padding=padding,
                            use_bn=use_bn, neg_slope=neg_slope, eps=eps)

    h = cb1([x, lh], params["compress_in"])
    lr_features = [h]
    hr_features = []
    for idx in range(num_groups):
        ld_l = cb1(lr_features, params["uptran"][idx - 1]) if idx > 0 else lr_features[0]
        ld_h = dbk(ld_l, params["up"][idx])
        hr_features.append(ld_h)
        ld_h = cb1(hr_features, params["downtran"][idx - 1]) if idx > 0 else hr_features[0]
        ld_l = cbk(ld_h, params["down"][idx])
        lr_features.append(ld_l)

    out = cb1(lr_features[1:], params["compress_out"])
    return jnp.transpose(out.astype(jnp.float32), (0, 3, 1, 2))


# ---------------------------------------------------------------------------
# Pure-JAX reference (lax convolutions, NCHW, f32), mirrors torch semantics.
# ---------------------------------------------------------------------------
def _ref_conv_block(x_nchw, p, *, k, stride, padding, transposed, use_bn, neg_slope, eps):
    if transposed:
        w_conv = jnp.transpose(jnp.flip(p["w"], axis=(2, 3)), (1, 0, 2, 3))
        y = lax.conv_general_dilated(
            x_nchw, w_conv, window_strides=(1, 1),
            padding=[(k - 1 - padding,) * 2] * 2, lhs_dilation=(stride, stride),
            dimension_numbers=("NCHW", "OIHW", "NCHW"), precision=lax.Precision.HIGHEST)
    else:
        y = lax.conv_general_dilated(
            x_nchw, p["w"], window_strides=(stride, stride),
            padding=[(padding, padding)] * 2,
            dimension_numbers=("NCHW", "OIHW", "NCHW"), precision=lax.Precision.HIGHEST)
    y = y + p["b"][None, :, None, None]
    if use_bn:
        mean = jnp.mean(y, axis=(0, 2, 3), keepdims=True)
        var = jnp.mean((y - mean) ** 2, axis=(0, 2, 3), keepdims=True)
        y = (y - mean) / jnp.sqrt(var + eps)
        y = y * p["gamma"][None, :, None, None] + p["beta"][None, :, None, None]
    return jnp.where(y > 0, y, neg_slope * y)


def feedback_block_reference(x_nchw, params, *, num_groups, upscale_factor,
                             use_bn=True, neg_slope=0.0, eps=1e-5, last_hidden=None):
    stride, padding, k = _UPSCALE_CFG[upscale_factor]
    x = x_nchw.astype(jnp.float32)
    lh = x if last_hidden is None else last_hidden.astype(jnp.float32)

    cb1 = functools.partial(_ref_conv_block, k=1, stride=1, padding=0, transposed=False,
                            use_bn=use_bn, neg_slope=neg_slope, eps=eps)
    cbk = functools.partial(_ref_conv_block, k=k, stride=stride, padding=padding,
                            use_bn=use_bn, neg_slope=neg_slope, eps=eps)

    h = cb1(jnp.concatenate([x, lh], axis=1), params["compress_in"])
    lr_features, hr_features = [h], []
    for idx in range(num_groups):
        ld_l = jnp.concatenate(lr_features, axis=1)
        if idx > 0:
            ld_l = cb1(ld_l, params["uptran"][idx - 1])
        ld_h = cbk(ld_l, params["up"][idx], transposed=True)
        hr_features.append(ld_h)
        ld_h = jnp.concatenate(hr_features, axis=1)
        if idx > 0:
            ld_h = cb1(ld_h, params["downtran"][idx - 1])
        ld_l = cbk(ld_h, params["down"][idx], transposed=False)
        lr_features.append(ld_l)
    return cb1(jnp.concatenate(lr_features[1:], axis=1), params["compress_out"])


# ---------------------------------------------------------------------------
# Deterministic parameter init
# ---------------------------------------------------------------------------
def _init_conv(key, cin, cout, k):
    k1, k2, k3, k4 = jax.random.split(key, 4)
    fan_in = cin * k * k
    return dict(
        w=jax.random.normal(k1, (cout, cin, k, k), jnp.float32) / math.sqrt(fan_in),
        b=0.1 * jax.random.normal(k2, (cout,), jnp.float32),
        gamma=1.0 + 0.2 * jax.random.normal(k3, (cout,), jnp.float32),
        beta=0.1 * jax.random.normal(k4, (cout,), jnp.float32))


def _init_deconv(key, cin, cout, k):
    k1, k2, k3, k4 = jax.random.split(key, 4)
    fan_in = cin * k * k
    return dict(
        w=jax.random.normal(k1, (cin, cout, k, k), jnp.float32) / math.sqrt(fan_in),  # (in,out,kh,kw)
        b=0.1 * jax.random.normal(k2, (cout,), jnp.float32),
        gamma=1.0 + 0.2 * jax.random.normal(k3, (cout,), jnp.float32),
        beta=0.1 * jax.random.normal(k4, (cout,), jnp.float32))


def init_feedback_block_params(key, num_features, num_groups, upscale_factor):
    _, _, k = _UPSCALE_CFG[upscale_factor]
    keys = iter(jax.random.split(key, 4 + 4 * num_groups))
    params = {
        "compress_in": _init_conv(next(keys), 2 * num_features, num_features, 1),
        "compress_out": _init_conv(next(keys), num_groups * num_features, num_features, 1),
        "up": [], "down": [], "uptran": [], "downtran": [],
    }
    for idx in range(num_groups):
        params["up"].append(_init_deconv(next(keys), num_features, num_features, k))
        params["down"].append(_init_conv(next(keys), num_features, num_features, k))
        if idx > 0:
            params["uptran"].append(_init_conv(next(keys), num_features * (idx + 1), num_features, 1))
            params["downtran"].append(_init_conv(next(keys), num_features * (idx + 1), num_features, 1))
    return params


if __name__ == "__main__":
    key = jax.random.PRNGKey(0)
    kx, kp1, kp2 = jax.random.split(key, 3)

    N, F, G = 2, 16, 2
    H = W = 8
    x = jax.random.normal(kx, (N, F, H, W), jnp.float32)

    # Config A: upscale_factor=2, act_type='relu', norm_type='bn'
    params_a = init_feedback_block_params(kp1, F, G, 2)
    fwd_a = jax.jit(functools.partial(feedback_block_forward, num_groups=G,
                                      upscale_factor=2, use_bn=True, neg_slope=0.0))
    out_a = jax.block_until_ready(fwd_a(x, params_a))
    ref_a = feedback_block_reference(x, params_a, num_groups=G, upscale_factor=2,
                                     use_bn=True, neg_slope=0.0)
    assert out_a.shape == (N, F, H, W)
    np.testing.assert_allclose(np.asarray(out_a), np.asarray(ref_a), atol=7.5e-2, rtol=5e-2)

    # Config B: upscale_factor=3 (kernel not a multiple of stride),
    #           act_type='prelu' (init slope 0.2), norm_type=None
    params_b = init_feedback_block_params(kp2, F, G, 3)
    fwd_b = jax.jit(functools.partial(feedback_block_forward, num_groups=G,
                                      upscale_factor=3, use_bn=False, neg_slope=0.2))
    out_b = jax.block_until_ready(fwd_b(x, params_b))
    ref_b = feedback_block_reference(x, params_b, num_groups=G, upscale_factor=3,
                                     use_bn=False, neg_slope=0.2)
    np.testing.assert_allclose(np.asarray(out_b), np.asarray(ref_b), atol=7.5e-2, rtol=5e-2)

    print("KERNEL_OK")
</pallas_src>

<mosaic_0001>
module attributes {stable_mosaic.version = 11 : i64} {
  func.func @_matmul_stats_kernel(%arg0: i32, %arg1: memref<128x16xbf16, #tpu.memory_space<vmem>>, %arg2: memref<128x16xbf16, #tpu.memory_space<vmem>>, %arg3: memref<16x16xbf16, #tpu.memory_space<vmem>>, %arg4: memref<16x16xbf16, #tpu.memory_space<vmem>>, %arg5: memref<128x16xbf16, #tpu.memory_space<vmem>>, %arg6: memref<1x1x16xf32, #tpu.memory_space<vmem>>, %arg7: memref<1x1x16xf32, #tpu.memory_space<vmem>>) attributes {dimension_semantics = [#tpu.dimension_semantics<parallel>], iteration_bounds = array<i64: 1>, scalar_prefetch = 0 : i64, scratch_operands = 0 : i64, tpu.core_type = #tpu.core_type<tc>, window_params = [{transform_indices = @transform_0, window_bounds = array<i64: 128, 16>}, {transform_indices = @transform_1, window_bounds = array<i64: 128, 16>}, {pipeline_mode = #tpu.pipeline_mode<synchronous>, transform_indices = @transform_2, window_bounds = array<i64: 16, 16>}, {pipeline_mode = #tpu.pipeline_mode<synchronous>, transform_indices = @transform_3, window_bounds = array<i64: 16, 16>}, {transform_indices = @transform_4, window_bounds = array<i64: 128, 16>}, {transform_indices = @transform_5, window_bounds = array<i64: 1, 1, 16>}, {transform_indices = @transform_6, window_bounds = array<i64: 1, 1, 16>}]} {
    %c0 = arith.constant 0 : index
    %c0_0 = arith.constant 0 : index
    %0 = vector.load %arg1[%c0, %c0_0] : memref<128x16xbf16, #tpu.memory_space<vmem>>, vector<128x16xbf16>
    %c0_1 = arith.constant 0 : index
    %c0_2 = arith.constant 0 : index
    %1 = vector.load %arg3[%c0_1, %c0_2] : memref<16x16xbf16, #tpu.memory_space<vmem>>, vector<16x16xbf16>
    %cst = arith.constant dense<0.000000e+00> : vector<128x16xf32>
    %2 = tpu.matmul %0, %1, %cst {dimension_numbers = #tpu.dot_dimension_numbers<[1], [0], [0], [1], [0, 0, 1, 1], [], []>} : vector<128x16xbf16>, vector<16x16xbf16>, vector<128x16xf32> -> vector<128x16xf32>
    %c0_3 = arith.constant 0 : index
    %c0_4 = arith.constant 0 : index
    %3 = vector.load %arg2[%c0_3, %c0_4] : memref<128x16xbf16, #tpu.memory_space<vmem>>, vector<128x16xbf16>
    %c0_5 = arith.constant 0 : index
    %c0_6 = arith.constant 0 : index
    %4 = vector.load %arg4[%c0_5, %c0_6] : memref<16x16xbf16, #tpu.memory_space<vmem>>, vector<16x16xbf16>
    %cst_7 = arith.constant dense<0.000000e+00> : vector<128x16xf32>
    %5 = tpu.matmul %3, %4, %cst_7 {dimension_numbers = #tpu.dot_dimension_numbers<[1], [0], [0], [1], [0, 0, 1, 1], [], []>} : vector<128x16xbf16>, vector<16x16xbf16>, vector<128x16xf32> -> vector<128x16xf32>
    %6 = arith.addf %2, %5 : vector<128x16xf32>
    %7 = arith.truncf %6 : vector<128x16xf32> to vector<128x16xbf16>
    %c0_8 = arith.constant 0 : index
    %c0_9 = arith.constant 0 : index
    %8 = vector.load %arg5[%c0_8, %c0_9] : memref<128x16xbf16, #tpu.memory_space<vmem>>, vector<128x16xbf16>
    tpu.vector_store %arg5[%c0_8, %c0_9], %7 {strides = array<i32>} : memref<128x16xbf16, #tpu.memory_space<vmem>>, vector<128x16xbf16>,
    %c128_i32 = arith.constant 128 : i32
    %9 = arith.muli %arg0, %c128_i32 : i32
    %10 = tpu.iota {dimensions = array<i32: 0>} : vector<128x1xi32>
    %11 = vector.broadcast %9 : i32 to vector<128x1xi32>
    %12 = arith.addi %11, %10 : vector<128x1xi32>
    %c128_i32_10 = arith.constant 128 : i32
    %13 = vector.broadcast %c128_i32_10 : i32 to vector<128x1xi32>
    %14 = arith.cmpi slt, %12, %13 : vector<128x1xi32>
    %cst_11 = arith.constant 0.000000e+00 : f32
    %15 = vector.shape_cast %14 : vector<128x1xi1> to vector<128x1xi1>
    %16 = vector.broadcast %15 : vector<128x1xi1> to vector<128x16xi1>
    %17 = vector.broadcast %cst_11 : f32 to vector<128x16xf32>
    %18 = arith.select %16, %6, %17 : vector<128x16xi1>, vector<128x16xf32>
    %cst_12 = arith.constant dense<0.000000e+00> : vector<16xf32>
    %19 = vector.multi_reduction <add>, %18, %cst_12 [0] : vector<128x16xf32> to vector<16xf32>
    %20 = vector.shape_cast %19 : vector<16xf32> to vector<1x16xf32>
    %c0_13 = arith.constant 0 : index
    %c0_14 = arith.constant 0 : index
    %c0_15 = arith.constant 0 : index
    %21 = vector.load %arg6[%c0_13, %c0_14, %c0_15] : memref<1x1x16xf32, #tpu.memory_space<vmem>>, vector<1x1x16xf32>
    %22 = vector.shape_cast %21 : vector<1x1x16xf32> to vector<1x16xf32>
    %23 = vector.shape_cast %20 : vector<1x16xf32> to vector<1x1x16xf32>
    tpu.vector_store %arg6[%c0_13, %c0_14, %c0_15], %23 {strides = array<i32>} : memref<1x1x16xf32, #tpu.memory_space<vmem>>, vector<1x1x16xf32>,
    %24 = arith.mulf %18, %18 : vector<128x16xf32>
    %cst_16 = arith.constant dense<0.000000e+00> : vector<16xf32>
    %25 = vector.multi_reduction <add>, %24, %cst_16 [0] : vector<128x16xf32> to vector<16xf32>
    %26 = vector.shape_cast %25 : vector<16xf32> to vector<1x16xf32>
    %c0_17 = arith.constant 0 : index
    %c0_18 = arith.constant 0 : index
    %c0_19 = arith.constant 0 : index
    %27 = vector.load %arg7[%c0_17, %c0_18, %c0_19] : memref<1x1x16xf32, #tpu.memory_space<vmem>>, vector<1x1x16xf32>
    %28 = vector.shape_cast %27 : vector<1x1x16xf32> to vector<1x16xf32>
    %29 = vector.shape_cast %26 : vector<1x16xf32> to vector<1x1x16xf32>
    tpu.vector_store %arg7[%c0_17, %c0_18, %c0_19], %29 {strides = array<i32>} : memref<1x1x16xf32, #tpu.memory_space<vmem>>, vector<1x1x16xf32>,
    return
  }
  func.func @transform_0(%arg0: i32) -> (i32, i32) {
    %c0_i32 = arith.constant 0 : i32
    %c0_i32_0 = arith.constant 0 : i32
    return %arg0, %c0_i32 : i32, i32
  }
  func.func @transform_1(%arg0: i32) -> (i32, i32) {
    %c0_i32 = arith.constant 0 : i32
    %c0_i32_0 = arith.constant 0 : i32
    return %arg0, %c0_i32 : i32, i32
  }
  func.func @transform_2(%arg0: i32) -> (i32, i32) {
    %c0_i32 = arith.constant 0 : i32
    %c0_i32_0 = arith.constant 0 : i32
    %c0_i32_1 = arith.constant 0 : i32
    return %c0_i32, %c0_i32_0 : i32, i32
  }
  func.func @transform_3(%arg0: i32) -> (i32, i32) {
    %c0_i32 = arith.constant 0 : i32
    %c0_i32_0 = arith.constant 0 : i32
    %c0_i32_1 = arith.constant 0 : i32
    return %c0_i32, %c0_i32_0 : i32, i32
  }
  func.func @transform_4(%arg0: i32) -> (i32, i32) {
    %c0_i32 = arith.constant 0 : i32
    %c0_i32_0 = arith.constant 0 : i32
    return %arg0, %c0_i32 : i32, i32
  }
  func.func @transform_5(%arg0: i32) -> (i32, i32, i32) {
    %c0_i32 = arith.constant 0 : i32
    %c0_i32_0 = arith.constant 0 : i32
    %c0_i32_1 = arith.constant 0 : i32
    return %arg0, %c0_i32, %c0_i32_0 : i32, i32, i32
  }
  func.func @transform_6(%arg0: i32) -> (i32, i32, i32) {
    %c0_i32 = arith.constant 0 : i32
    %c0_i32_0 = arith.constant 0 : i32
    %c0_i32_1 = arith.constant 0 : i32
    return %arg0, %c0_i32, %c0_i32_0 : i32, i32, i32
  }
}

module attributes {stable_mosaic.version = 11 : i64} {
  func.func @_scale_shift_act_kernel(%arg0: i32, %arg1: memref<128x16xbf16, #tpu.memory_space<vmem>>, %arg2: memref<1x16xf32, #tpu.memory_space<vmem>>, %arg3: memref<1x16xf32, #tpu.memory_space<vmem>>, %arg4: memref<128x16xbf16, #tpu.memory_space<vmem>>) attributes {dimension_semantics = [#tpu.dimension_semantics<parallel>], iteration_bounds = array<i64: 1>, scalar_prefetch = 0 : i64, scratch_operands = 0 : i64, tpu.core_type = #tpu.core_type<tc>, window_params = [{transform_indices = @transform_0, window_bounds = array<i64: 128, 16>}, {pipeline_mode = #tpu.pipeline_mode<synchronous>, transform_indices = @transform_1, window_bounds = array<i64: 1, 16>}, {pipeline_mode = #tpu.pipeline_mode<synchronous>, transform_indices = @transform_2, window_bounds = array<i64: 1, 16>}, {transform_indices = @transform_3, window_bounds = array<i64: 128, 16>}]} {
    %c0 = arith.constant 0 : index
    %c0_0 = arith.constant 0 : index
    %0 = vector.load %arg1[%c0, %c0_0] : memref<128x16xbf16, #tpu.memory_space<vmem>>, vector<128x16xbf16>
    %1 = arith.extf %0 : vector<128x16xbf16> to vector<128x16xf32>
    %c0_1 = arith.constant 0 : index
    %c0_2 = arith.constant 0 : index
    %2 = vector.load %arg2[%c0_1, %c0_2] : memref<1x16xf32, #tpu.memory_space<vmem>>, vector<1x16xf32>
    %3 = vector.broadcast %2 : vector<1x16xf32> to vector<128x16xf32>
    %4 = arith.mulf %1, %3 : vector<128x16xf32>
    %c0_3 = arith.constant 0 : index
    %c0_4 = arith.constant 0 : index
    %5 = vector.load %arg3[%c0_3, %c0_4] : memref<1x16xf32, #tpu.memory_space<vmem>>, vector<1x16xf32>
    %6 = vector.broadcast %5 : vector<1x16xf32> to vector<128x16xf32>
    %7 = arith.addf %4, %6 : vector<128x16xf32>
    %cst = arith.constant 0.000000e+00 : f32
    %8 = vector.broadcast %cst : f32 to vector<128x16xf32>
    %9 = arith.cmpf ogt, %7, %8 : vector<128x16xf32>
    %cst_5 = arith.constant 0.000000e+00 : f32
    %10 = vector.broadcast %cst_5 : f32 to vector<128x16xf32>
    %11 = arith.mulf %10, %7 : vector<128x16xf32>
    %12 = arith.select %9, %7, %11 : vector<128x16xi1>, vector<128x16xf32>
    %13 = arith.truncf %12 : vector<128x16xf32> to vector<128x16xbf16>
    %c0_6 = arith.constant 0 : index
    %c0_7 = arith.constant 0 : index
    %14 = vector.load %arg4[%c0_6, %c0_7] : memref<128x16xbf16, #tpu.memory_space<vmem>>, vector<128x16xbf16>
    tpu.vector_store %arg4[%c0_6, %c0_7], %13 {strides = array<i32>} : memref<128x16xbf16, #tpu.memory_space<vmem>>, vector<128x16xbf16>,
    return
  }
  func.func @transform_0(%arg0: i32) -> (i32, i32) {
    %c0_i32 = arith.constant 0 : i32
    %c0_i32_0 = arith.constant 0 : i32
    return %arg0, %c0_i32 : i32, i32
  }
  func.func @transform_1(%arg0: i32) -> (i32, i32) {
    %c0_i32 = arith.constant 0 : i32
    %c0_i32_0 = arith.constant 0 : i32
    %c0_i32_1 = arith.constant 0 : i32
    return %c0_i32, %c0_i32_0 : i32, i32
  }
  func.func @transform_2(%arg0: i32) -> (i32, i32) {
    %c0_i32 = arith.constant 0 : i32
    %c0_i32_0 = arith.constant 0 : i32
    %c0_i32_1 = arith.constant 0 : i32
    return %c0_i32, %c0_i32_0 : i32, i32
  }
  func.func @transform_3(%arg0: i32) -> (i32, i32) {
    %c0_i32 = arith.constant 0 : i32
    %c0_i32_0 = arith.constant 0 : i32
    return %arg0, %c0_i32 : i32, i32
  }
}

module attributes {stable_mosaic.version = 11 : i64} {
  func.func @_matmul_stats_kernel(%arg0: i32, %arg1: memref<128x144xbf16, #tpu.memory_space<vmem>>, %arg2: memref<144x64xbf16, #tpu.memory_space<vmem>>, %arg3: memref<128x64xbf16, #tpu.memory_space<vmem>>, %arg4: memref<1x1x64xf32, #tpu.memory_space<vmem>>, %arg5: memref<1x1x64xf32, #tpu.memory_space<vmem>>) attributes {dimension_semantics = [#tpu.dimension_semantics<parallel>], iteration_bounds = array<i64: 1>, scalar_prefetch = 0 : i64, scratch_operands = 0 : i64, tpu.core_type = #tpu.core_type<tc>, window_params = [{transform_indices = @transform_0, window_bounds = array<i64: 128, 144>}, {pipeline_mode = #tpu.pipeline_mode<synchronous>, transform_indices = @transform_1, window_bounds = array<i64: 144, 64>}, {transform_indices = @transform_2, window_bounds = array<i64: 128, 64>}, {transform_indices = @transform_3, window_bounds = array<i64: 1, 1, 64>}, {transform_indices = @transform_4, window_bounds = array<i64: 1, 1, 64>}]} {
    %c0 = arith.constant 0 : index
    %c0_0 = arith.constant 0 : index
    %0 = vector.load %arg1[%c0, %c0_0] : memref<128x144xbf16, #tpu.memory_space<vmem>>, vector<128x144xbf16>
    %c0_1 = arith.constant 0 : index
    %c0_2 = arith.constant 0 : index
    %1 = vector.load %arg2[%c0_1, %c0_2] : memref<144x64xbf16, #tpu.memory_space<vmem>>, vector<144x64xbf16>
    %cst = arith.constant dense<0.000000e+00> : vector<128x64xf32>
    %2 = tpu.matmul %0, %1, %cst {dimension_numbers = #tpu.dot_dimension_numbers<[1], [0], [0], [1], [0, 0, 1, 1], [], []>} : vector<128x144xbf16>, vector<144x64xbf16>, vector<128x64xf32> -> vector<128x64xf32>
    %3 = arith.truncf %2 : vector<128x64xf32> to vector<128x64xbf16>
    %c0_3 = arith.constant 0 : index
    %c0_4 = arith.constant 0 : index
    %4 = vector.load %arg3[%c0_3, %c0_4] : memref<128x64xbf16, #tpu.memory_space<vmem>>, vector<128x64xbf16>
    tpu.vector_store %arg3[%c0_3, %c0_4], %3 {strides = array<i32>} : memref<128x64xbf16, #tpu.memory_space<vmem>>, vector<128x64xbf16>,
    %c128_i32 = arith.constant 128 : i32
    %5 = arith.muli %arg0, %c128_i32 : i32
    %6 = tpu.iota {dimensions = array<i32: 0>} : vector<128x1xi32>
    %7 = vector.broadcast %5 : i32 to vector<128x1xi32>
    %8 = arith.addi %7, %6 : vector<128x1xi32>
    %c128_i32_5 = arith.constant 128 : i32
    %9 = vector.broadcast %c128_i32_5 : i32 to vector<128x1xi32>
    %10 = arith.cmpi slt, %8, %9 : vector<128x1xi32>
    %cst_6 = arith.constant 0.000000e+00 : f32
    %11 = vector.shape_cast %10 : vector<128x1xi1> to vector<128x1xi1>
    %12 = vector.broadcast %11 : vector<128x1xi1> to vector<128x64xi1>
    %13 = vector.broadcast %cst_6 : f32 to vector<128x64xf32>
    %14 = arith.select %12, %2, %13 : vector<128x64xi1>, vector<128x64xf32>
    %cst_7 = arith.constant dense<0.000000e+00> : vector<64xf32>
    %15 = vector.multi_reduction <add>, %14, %cst_7 [0] : vector<128x64xf32> to vector<64xf32>
    %16 = vector.shape_cast %15 : vector<64xf32> to vector<1x64xf32>
    %c0_8 = arith.constant 0 : index
    %c0_9 = arith.constant 0 : index
    %c0_10 = arith.constant 0 : index
    %17 = vector.load %arg4[%c0_8, %c0_9, %c0_10] : memref<1x1x64xf32, #tpu.memory_space<vmem>>, vector<1x1x64xf32>
    %18 = vector.shape_cast %17 : vector<1x1x64xf32> to vector<1x64xf32>
    %19 = vector.shape_cast %16 : vector<1x64xf32> to vector<1x1x64xf32>
    tpu.vector_store %arg4[%c0_8, %c0_9, %c0_10], %19 {strides = array<i32>} : memref<1x1x64xf32, #tpu.memory_space<vmem>>, vector<1x1x64xf32>,
    %20 = arith.mulf %14, %14 : vector<128x64xf32>
    %cst_11 = arith.constant dense<0.000000e+00> : vector<64xf32>
    %21 = vector.multi_reduction <add>, %20, %cst_11 [0] : vector<128x64xf32> to vector<64xf32>
    %22 = vector.shape_cast %21 : vector<64xf32> to vector<1x64xf32>
    %c0_12 = arith.constant 0 : index
    %c0_13 = arith.constant 0 : index
    %c0_14 = arith.constant 0 : index
    %23 = vector.load %arg5[%c0_12, %c0_13, %c0_14] : memref<1x1x64xf32, #tpu.memory_space<vmem>>, vector<1x1x64xf32>
    %24 = vector.shape_cast %23 : vector<1x1x64xf32> to vector<1x64xf32>
    %25 = vector.shape_cast %22 : vector<1x64xf32> to vector<1x1x64xf32>
    tpu.vector_store %arg5[%c0_12, %c0_13, %c0_14], %25 {strides = array<i32>} : memref<1x1x64xf32, #tpu.memory_space<vmem>>, vector<1x1x64xf32>,
    return
  }
  func.func @transform_0(%arg0: i32) -> (i32, i32) {
    %c0_i32 = arith.constant 0 : i32
    %c0_i32_0 = arith.constant 0 : i32
    return %arg0, %c0_i32 : i32, i32
  }
  func.func @transform_1(%arg0: i32) -> (i32, i32) {
    %c0_i32 = arith.constant 0 : i32
    %c0_i32_0 = arith.constant 0 : i32
    %c0_i32_1 = arith.constant 0 : i32
    return %c0_i32, %c0_i32_0 : i32, i32
  }
  func.func @transform_2(%arg0: i32) -> (i32, i32) {
    %c0_i32 = arith.constant 0 : i32
    %c0_i32_0 = arith.constant 0 : i32
    return %arg0, %c0_i32 : i32, i32
  }
  func.func @transform_3(%arg0: i32) -> (i32, i32, i32) {
    %c0_i32 = arith.constant 0 : i32
    %c0_i32_0 = arith.constant 0 : i32
    %c0_i32_1 = arith.constant 0 : i32
    return %arg0, %c0_i32, %c0_i32_0 : i32, i32, i32
  }
  func.func @transform_4(%arg0: i32) -> (i32, i32, i32) {
    %c0_i32 = arith.constant 0 : i32
    %c0_i32_0 = arith.constant 0 : i32
    %c0_i32_1 = arith.constant 0 : i32
    return %arg0, %c0_i32, %c0_i32_0 : i32, i32, i32
  }
}

module attributes {stable_mosaic.version = 11 : i64} {
  func.func @_scale_shift_act_kernel(%arg0: i32, %arg1: memref<128x64xbf16, #tpu.memory_space<vmem>>, %arg2: memref<1x64xf32, #tpu.memory_space<vmem>>, %arg3: memref<1x64xf32, #tpu.memory_space<vmem>>, %arg4: memref<128x64xbf16, #tpu.memory_space<vmem>>) attributes {dimension_semantics = [#tpu.dimension_semantics<parallel>], iteration_bounds = array<i64: 1>, scalar_prefetch = 0 : i64, scratch_operands = 0 : i64, tpu.core_type = #tpu.core_type<tc>, window_params = [{transform_indices = @transform_0, window_bounds = array<i64: 128, 64>}, {pipeline_mode = #tpu.pipeline_mode<synchronous>, transform_indices = @transform_1, window_bounds = array<i64: 1, 64>}, {pipeline_mode = #tpu.pipeline_mode<synchronous>, transform_indices = @transform_2, window_bounds = array<i64: 1, 64>}, {transform_indices = @transform_3, window_bounds = array<i64: 128, 64>}]} {
    %c0 = arith.constant 0 : index
    %c0_0 = arith.constant 0 : index
    %0 = vector.load %arg1[%c0, %c0_0] : memref<128x64xbf16, #tpu.memory_space<vmem>>, vector<128x64xbf16>
    %1 = arith.extf %0 : vector<128x64xbf16> to vector<128x64xf32>
    %c0_1 = arith.constant 0 : index
    %c0_2 = arith.constant 0 : index
    %2 = vector.load %arg2[%c0_1, %c0_2] : memref<1x64xf32, #tpu.memory_space<vmem>>, vector<1x64xf32>
    %3 = vector.broadcast %2 : vector<1x64xf32> to vector<128x64xf32>
    %4 = arith.mulf %1, %3 : vector<128x64xf32>
    %c0_3 = arith.constant 0 : index
    %c0_4 = arith.constant 0 : index
    %5 = vector.load %arg3[%c0_3, %c0_4] : memref<1x64xf32, #tpu.memory_space<vmem>>, vector<1x64xf32>
    %6 = vector.broadcast %5 : vector<1x64xf32> to vector<128x64xf32>
    %7 = arith.addf %4, %6 : vector<128x64xf32>
    %cst = arith.constant 0.000000e+00 : f32
    %8 = vector.broadcast %cst : f32 to vector<128x64xf32>
    %9 = arith.cmpf ogt, %7, %8 : vector<128x64xf32>
    %cst_5 = arith.constant 0.000000e+00 : f32
    %10 = vector.broadcast %cst_5 : f32 to vector<128x64xf32>
    %11 = arith.mulf %10, %7 : vector<128x64xf32>
    %12 = arith.select %9, %7, %11 : vector<128x64xi1>, vector<128x64xf32>
    %13 = arith.truncf %12 : vector<128x64xf32> to vector<128x64xbf16>
    %c0_6 = arith.constant 0 : index
    %c0_7 = arith.constant 0 : index
    %14 = vector.load %arg4[%c0_6, %c0_7] : memref<128x64xbf16, #tpu.memory_space<vmem>>, vector<128x64xbf16>
    tpu.vector_store %arg4[%c0_6, %c0_7], %13 {strides = array<i32>} : memref<128x64xbf16, #tpu.memory_space<vmem>>, vector<128x64xbf16>,
    return
  }
  func.func @transform_0(%arg0: i32) -> (i32, i32) {
    %c0_i32 = arith.constant 0 : i32
    %c0_i32_0 = arith.constant 0 : i32
    return %arg0, %c0_i32 : i32, i32
  }
  func.func @transform_1(%arg0: i32) -> (i32, i32) {
    %c0_i32 = arith.constant 0 : i32
    %c0_i32_0 = arith.constant 0 : i32
    %c0_i32_1 = arith.constant 0 : i32
    return %c0_i32, %c0_i32_0 : i32, i32
  }
  func.func @transform_2(%arg0: i32) -> (i32, i32) {
    %c0_i32 = arith.constant 0 : i32
    %c0_i32_0 = arith.constant 0 : i32
    %c0_i32_1 = arith.constant 0 : i32
    return %c0_i32, %c0_i32_0 : i32, i32
  }
  func.func @transform_3(%arg0: i32) -> (i32, i32) {
    %c0_i32 = arith.constant 0 : i32
    %c0_i32_0 = arith.constant 0 : i32
    return %arg0, %c0_i32 : i32, i32
  }
}

module attributes {stable_mosaic.version = 11 : i64} {
  func.func @_matmul_stats_kernel(%arg0: i32, %arg1: memref<128x576xbf16, #tpu.memory_space<vmem>>, %arg2: memref<576x16xbf16, #tpu.memory_space<vmem>>, %arg3: memref<128x16xbf16, #tpu.memory_space<vmem>>, %arg4: memref<1x1x16xf32, #tpu.memory_space<vmem>>, %arg5: memref<1x1x16xf32, #tpu.memory_space<vmem>>) attributes {dimension_semantics = [#tpu.dimension_semantics<parallel>], iteration_bounds = array<i64: 1>, scalar_prefetch = 0 : i64, scratch_operands = 0 : i64, tpu.core_type = #tpu.core_type<tc>, window_params = [{transform_indices = @transform_0, window_bounds = array<i64: 128, 576>}, {pipeline_mode = #tpu.pipeline_mode<synchronous>, transform_indices = @transform_1, window_bounds = array<i64: 576, 16>}, {transform_indices = @transform_2, window_bounds = array<i64: 128, 16>}, {transform_indices = @transform_3, window_bounds = array<i64: 1, 1, 16>}, {transform_indices = @transform_4, window_bounds = array<i64: 1, 1, 16>}]} {
    %c0 = arith.constant 0 : index
    %c0_0 = arith.constant 0 : index
    %0 = vector.load %arg1[%c0, %c0_0] : memref<128x576xbf16, #tpu.memory_space<vmem>>, vector<128x576xbf16>
    %c0_1 = arith.constant 0 : index
    %c0_2 = arith.constant 0 : index
    %1 = vector.load %arg2[%c0_1, %c0_2] : memref<576x16xbf16, #tpu.memory_space<vmem>>, vector<576x16xbf16>
    %cst = arith.constant dense<0.000000e+00> : vector<128x16xf32>
    %2 = tpu.matmul %0, %1, %cst {dimension_numbers = #tpu.dot_dimension_numbers<[1], [0], [0], [1], [0, 0, 1, 1], [], []>} : vector<128x576xbf16>, vector<576x16xbf16>, vector<128x16xf32> -> vector<128x16xf32>
    %3 = arith.truncf %2 : vector<128x16xf32> to vector<128x16xbf16>
    %c0_3 = arith.constant 0 : index
    %c0_4 = arith.constant 0 : index
    %4 = vector.load %arg3[%c0_3, %c0_4] : memref<128x16xbf16, #tpu.memory_space<vmem>>, vector<128x16xbf16>
    tpu.vector_store %arg3[%c0_3, %c0_4], %3 {strides = array<i32>} : memref<128x16xbf16, #tpu.memory_space<vmem>>, vector<128x16xbf16>,
    %c128_i32 = arith.constant 128 : i32
    %5 = arith.muli %arg0, %c128_i32 : i32
    %6 = tpu.iota {dimensions = array<i32: 0>} : vector<128x1xi32>
    %7 = vector.broadcast %5 : i32 to vector<128x1xi32>
    %8 = arith.addi %7, %6 : vector<128x1xi32>
    %c128_i32_5 = arith.constant 128 : i32
    %9 = vector.broadcast %c128_i32_5 : i32 to vector<128x1xi32>
    %10 = arith.cmpi slt, %8, %9 : vector<128x1xi32>
    %cst_6 = arith.constant 0.000000e+00 : f32
    %11 = vector.shape_cast %10 : vector<128x1xi1> to vector<128x1xi1>
    %12 = vector.broadcast %11 : vector<128x1xi1> to vector<128x16xi1>
    %13 = vector.broadcast %cst_6 : f32 to vector<128x16xf32>
    %14 = arith.select %12, %2, %13 : vector<128x16xi1>, vector<128x16xf32>
    %cst_7 = arith.constant dense<0.000000e+00> : vector<16xf32>
    %15 = vector.multi_reduction <add>, %14, %cst_7 [0] : vector<128x16xf32> to vector<16xf32>
    %16 = vector.shape_cast %15 : vector<16xf32> to vector<1x16xf32>
    %c0_8 = arith.constant 0 : index
    %c0_9 = arith.constant 0 : index
    %c0_10 = arith.constant 0 : index
    %17 = vector.load %arg4[%c0_8, %c0_9, %c0_10] : memref<1x1x16xf32, #tpu.memory_space<vmem>>, vector<1x1x16xf32>
    %18 = vector.shape_cast %17 : vector<1x1x16xf32> to vector<1x16xf32>
    %19 = vector.shape_cast %16 : vector<1x16xf32> to vector<1x1x16xf32>
    tpu.vector_store %arg4[%c0_8, %c0_9, %c0_10], %19 {strides = array<i32>} : memref<1x1x16xf32, #tpu.memory_space<vmem>>, vector<1x1x16xf32>,
    %20 = arith.mulf %14, %14 : vector<128x16xf32>
    %cst_11 = arith.constant dense<0.000000e+00> : vector<16xf32>
    %21 = vector.multi_reduction <add>, %20, %cst_11 [0] : vector<128x16xf32> to vector<16xf32>
    %22 = vector.shape_cast %21 : vector<16xf32> to vector<1x16xf32>
    %c0_12 = arith.constant 0 : index
    %c0_13 = arith.constant 0 : index
    %c0_14 = arith.constant 0 : index
    %23 = vector.load %arg5[%c0_12, %c0_13, %c0_14] : memref<1x1x16xf32, #tpu.memory_space<vmem>>, vector<1x1x16xf32>
    %24 = vector.shape_cast %23 : vector<1x1x16xf32> to vector<1x16xf32>
    %25 = vector.shape_cast %22 : vector<1x16xf32> to vector<1x1x16xf32>
    tpu.vector_store %arg5[%c0_12, %c0_13, %c0_14], %25 {strides = array<i32>} : memref<1x1x16xf32, #tpu.memory_space<vmem>>, vector<1x1x16xf32>,
    return
  }
  func.func @transform_0(%arg0: i32) -> (i32, i32) {
    %c0_i32 = arith.constant 0 : i32
    %c0_i32_0 = arith.constant 0 : i32
    return %arg0, %c0_i32 : i32, i32
  }
  func.func @transform_1(%arg0: i32) -> (i32, i32) {
    %c0_i32 = arith.constant 0 : i32
    %c0_i32_0 = arith.constant 0 : i32
    %c0_i32_1 = arith.constant 0 : i32
    return %c0_i32, %c0_i32_0 : i32, i32
  }
  func.func @transform_2(%arg0: i32) -> (i32, i32) {
    %c0_i32 = arith.constant 0 : i32
    %c0_i32_0 = arith.constant 0 : i32
    return %arg0, %c0_i32 : i32, i32
  }
  func.func @transform_3(%arg0: i32) -> (i32, i32, i32) {
    %c0_i32 = arith.constant 0 : i32
    %c0_i32_0 = arith.constant 0 : i32
    %c0_i32_1 = arith.constant 0 : i32
    return %arg0, %c0_i32, %c0_i32_0 : i32, i32, i32
  }
  func.func @transform_4(%arg0: i32) -> (i32, i32, i32) {
    %c0_i32 = arith.constant 0 : i32
    %c0_i32_0 = arith.constant 0 : i32
    %c0_i32_1 = arith.constant 0 : i32
    return %arg0, %c0_i32, %c0_i32_0 : i32, i32, i32
  }
}

module attributes {stable_mosaic.version = 11 : i64} {
  func.func @_matmul_stats_kernel(%arg0: i32, %arg1: memref<512x16xbf16, #tpu.memory_space<vmem>>, %arg2: memref<512x16xbf16, #tpu.memory_space<vmem>>, %arg3: memref<16x16xbf16, #tpu.memory_space<vmem>>, %arg4: memref<16x16xbf16, #tpu.memory_space<vmem>>, %arg5: memref<512x16xbf16, #tpu.memory_space<vmem>>, %arg6: memref<1x1x16xf32, #tpu.memory_space<vmem>>, %arg7: memref<1x1x16xf32, #tpu.memory_space<vmem>>) attributes {dimension_semantics = [#tpu.dimension_semantics<parallel>], iteration_bounds = array<i64: 1>, scalar_prefetch = 0 : i64, scratch_operands = 0 : i64, tpu.core_type = #tpu.core_type<tc>, window_params = [{transform_indices = @transform_0, window_bounds = array<i64: 512, 16>}, {transform_indices = @transform_1, window_bounds = array<i64: 512, 16>}, {pipeline_mode = #tpu.pipeline_mode<synchronous>, transform_indices = @transform_2, window_bounds = array<i64: 16, 16>}, {pipeline_mode = #tpu.pipeline_mode<synchronous>, transform_indices = @transform_3, window_bounds = array<i64: 16, 16>}, {transform_indices = @transform_4, window_bounds = array<i64: 512, 16>}, {transform_indices = @transform_5, window_bounds = array<i64: 1, 1, 16>}, {transform_indices = @transform_6, window_bounds = array<i64: 1, 1, 16>}]} {
    %c0 = arith.constant 0 : index
    %c0_0 = arith.constant 0 : index
    %0 = vector.load %arg1[%c0, %c0_0] : memref<512x16xbf16, #tpu.memory_space<vmem>>, vector<512x16xbf16>
    %c0_1 = arith.constant 0 : index
    %c0_2 = arith.constant 0 : index
    %1 = vector.load %arg3[%c0_1, %c0_2] : memref<16x16xbf16, #tpu.memory_space<vmem>>, vector<16x16xbf16>
    %cst = arith.constant dense<0.000000e+00> : vector<512x16xf32>
    %2 = tpu.matmul %0, %1, %cst {dimension_numbers = #tpu.dot_dimension_numbers<[1], [0], [0], [1], [0, 0, 1, 1], [], []>} : vector<512x16xbf16>, vector<16x16xbf16>, vector<512x16xf32> -> vector<512x16xf32>
    %c0_3 = arith.constant 0 : index
    %c0_4 = arith.constant 0 : index
    %3 = vector.load %arg2[%c0_3, %c0_4] : memref<512x16xbf16, #tpu.memory_space<vmem>>, vector<512x16xbf16>
    %c0_5 = arith.constant 0 : index
    %c0_6 = arith.constant 0 : index
    %4 = vector.load %arg4[%c0_5, %c0_6] : memref<16x16xbf16, #tpu.memory_space<vmem>>, vector<16x16xbf16>
    %cst_7 = arith.constant dense<0.000000e+00> : vector<512x16xf32>
    %5 = tpu.matmul %3, %4, %cst_7 {dimension_numbers = #tpu.dot_dimension_numbers<[1], [0], [0], [1], [0, 0, 1, 1], [], []>} : vector<512x16xbf16>, vector<16x16xbf16>, vector<512x16xf32> -> vector<512x16xf32>
    %6 = arith.addf %2, %5 : vector<512x16xf32>
    %7 = arith.truncf %6 : vector<512x16xf32> to vector<512x16xbf16>
    %c0_8 = arith.constant 0 : index
    %c0_9 = arith.constant 0 : index
    %8 = vector.load %arg5[%c0_8, %c0_9] : memref<512x16xbf16, #tpu.memory_space<vmem>>, vector<512x16xbf16>
    tpu.vector_store %arg5[%c0_8, %c0_9], %7 {strides = array<i32>} : memref<512x16xbf16, #tpu.memory_space<vmem>>, vector<512x16xbf16>,
    %c512_i32 = arith.constant 512 : i32
    %9 = arith.muli %arg0, %c512_i32 : i32
    %10 = tpu.iota {dimensions = array<i32: 0>} : vector<512x1xi32>
    %11 = vector.broadcast %9 : i32 to vector<512x1xi32>
    %12 = arith.addi %11, %10 : vector<512x1xi32>
    %c512_i32_10 = arith.constant 512 : i32
    %13 = vector.broadcast %c512_i32_10 : i32 to vector<512x1xi32>
    %14 = arith.cmpi slt, %12, %13 : vector<512x1xi32>
    %cst_11 = arith.constant 0.000000e+00 : f32
    %15 = vector.shape_cast %14 : vector<512x1xi1> to vector<512x1xi1>
    %16 = vector.broadcast %15 : vector<512x1xi1> to vector<512x16xi1>
    %17 = vector.broadcast %cst_11 : f32 to vector<512x16xf32>
    %18 = arith.select %16, %6, %17 : vector<512x16xi1>, vector<512x16xf32>
    %cst_12 = arith.constant dense<0.000000e+00> : vector<16xf32>
    %19 = vector.multi_reduction <add>, %18, %cst_12 [0] : vector<512x16xf32> to vector<16xf32>
    %20 = vector.shape_cast %19 : vector<16xf32> to vector<1x16xf32>
    %c0_13 = arith.constant 0 : index
    %c0_14 = arith.constant 0 : index
    %c0_15 = arith.constant 0 : index
    %21 = vector.load %arg6[%c0_13, %c0_14, %c0_15] : memref<1x1x16xf32, #tpu.memory_space<vmem>>, vector<1x1x16xf32>
    %22 = vector.shape_cast %21 : vector<1x1x16xf32> to vector<1x16xf32>
    %23 = vector.shape_cast %20 : vector<1x16xf32> to vector<1x1x16xf32>
    tpu.vector_store %arg6[%c0_13, %c0_14, %c0_15], %23 {strides = array<i32>} : memref<1x1x16xf32, #tpu.memory_space<vmem>>, vector<1x1x16xf32>,
    %24 = arith.mulf %18, %18 : vector<512x16xf32>
    %cst_16 = arith.constant dense<0.000000e+00> : vector<16xf32>
    %25 = vector.multi_reduction <add>, %24, %cst_16 [0] : vector<512x16xf32> to vector<16xf32>
    %26 = vector.shape_cast %25 : vector<16xf32> to vector<1x16xf32>
    %c0_17 = arith.constant 0 : index
    %c0_18 = arith.constant 0 : index
    %c0_19 = arith.constant 0 : index
    %27 = vector.load %arg7[%c0_17, %c0_18, %c0_19] : memref<1x1x16xf32, #tpu.memory_space<vmem>>, vector<1x1x16xf32>
    %28 = vector.shape_cast %27 : vector<1x1x16xf32> to vector<1x16xf32>
    %29 = vector.shape_cast %26 : vector<1x16xf32> to vector<1x1x16xf32>
    tpu.vector_store %arg7[%c0_17, %c0_18, %c0_19], %29 {strides = array<i32>} : memref<1x1x16xf32, #tpu.memory_space<vmem>>, vector<1x1x16xf32>,
    return
  }
  func.func @transform_0(%arg0: i32) -> (i32, i32) {
    %c0_i32 = arith.constant 0 : i32
    %c0_i32_0 = arith.constant 0 : i32
    return %arg0, %c0_i32 : i32, i32
  }
  func.func @transform_1(%arg0: i32) -> (i32, i32) {
    %c0_i32 = arith.constant 0 : i32
    %c0_i32_0 = arith.constant 0 : i32
    return %arg0, %c0_i32 : i32, i32
  }
  func.func @transform_2(%arg0: i32) -> (i32, i32) {
    %c0_i32 = arith.constant 0 : i32
    %c0_i32_0 = arith.constant 0 : i32
    %c0_i32_1 = arith.constant 0 : i32
    return %c0_i32, %c0_i32_0 : i32, i32
  }
  func.func @transform_3(%arg0: i32) -> (i32, i32) {
    %c0_i32 = arith.constant 0 : i32
    %c0_i32_0 = arith.constant 0 : i32
    %c0_i32_1 = arith.constant 0 : i32
    return %c0_i32, %c0_i32_0 : i32, i32
  }
  func.func @transform_4(%arg0: i32) -> (i32, i32) {
    %c0_i32 = arith.constant 0 : i32
    %c0_i32_0 = arith.constant 0 : i32
    return %arg0, %c0_i32 : i32, i32
  }
  func.func @transform_5(%arg0: i32) -> (i32, i32, i32) {
    %c0_i32 = arith.constant 0 : i32
    %c0_i32_0 = arith.constant 0 : i32
    %c0_i32_1 = arith.constant 0 : i32
    return %arg0, %c0_i32, %c0_i32_0 : i32, i32, i32
  }
  func.func @transform_6(%arg0: i32) -> (i32, i32, i32) {
    %c0_i32 = arith.constant 0 : i32
    %c0_i32_0 = arith.constant 0 : i32
    %c0_i32_1 = arith.constant 0 : i32
    return %arg0, %c0_i32, %c0_i32_0 : i32, i32, i32
  }
}

module attributes {stable_mosaic.version = 11 : i64} {
  func.func @_scale_shift_act_kernel(%arg0: i32, %arg1: memref<512x16xbf16, #tpu.memory_space<vmem>>, %arg2: memref<1x16xf32, #tpu.memory_space<vmem>>, %arg3: memref<1x16xf32, #tpu.memory_space<vmem>>, %arg4: memref<512x16xbf16, #tpu.memory_space<vmem>>) attributes {dimension_semantics = [#tpu.dimension_semantics<parallel>], iteration_bounds = array<i64: 1>, scalar_prefetch = 0 : i64, scratch_operands = 0 : i64, tpu.core_type = #tpu.core_type<tc>, window_params = [{transform_indices = @transform_0, window_bounds = array<i64: 512, 16>}, {pipeline_mode = #tpu.pipeline_mode<synchronous>, transform_indices = @transform_1, window_bounds = array<i64: 1, 16>}, {pipeline_mode = #tpu.pipeline_mode<synchronous>, transform_indices = @transform_2, window_bounds = array<i64: 1, 16>}, {transform_indices = @transform_3, window_bounds = array<i64: 512, 16>}]} {
    %c0 = arith.constant 0 : index
    %c0_0 = arith.constant 0 : index
    %0 = vector.load %arg1[%c0, %c0_0] : memref<512x16xbf16, #tpu.memory_space<vmem>>, vector<512x16xbf16>
    %1 = arith.extf %0 : vector<512x16xbf16> to vector<512x16xf32>
    %c0_1 = arith.constant 0 : index
    %c0_2 = arith.constant 0 : index
    %2 = vector.load %arg2[%c0_1, %c0_2] : memref<1x16xf32, #tpu.memory_space<vmem>>, vector<1x16xf32>
    %3 = vector.broadcast %2 : vector<1x16xf32> to vector<512x16xf32>
    %4 = arith.mulf %1, %3 : vector<512x16xf32>
    %c0_3 = arith.constant 0 : index
    %c0_4 = arith.constant 0 : index
    %5 = vector.load %arg3[%c0_3, %c0_4] : memref<1x16xf32, #tpu.memory_space<vmem>>, vector<1x16xf32>
    %6 = vector.broadcast %5 : vector<1x16xf32> to vector<512x16xf32>
    %7 = arith.addf %4, %6 : vector<512x16xf32>
    %cst = arith.constant 0.000000e+00 : f32
    %8 = vector.broadcast %cst : f32 to vector<512x16xf32>
    %9 = arith.cmpf ogt, %7, %8 : vector<512x16xf32>
    %cst_5 = arith.constant 0.000000e+00 : f32
    %10 = vector.broadcast %cst_5 : f32 to vector<512x16xf32>
    %11 = arith.mulf %10, %7 : vector<512x16xf32>
    %12 = arith.select %9, %7, %11 : vector<512x16xi1>, vector<512x16xf32>
    %13 = arith.truncf %12 : vector<512x16xf32> to vector<512x16xbf16>
    %c0_6 = arith.constant 0 : index
    %c0_7 = arith.constant 0 : index
    %14 = vector.load %arg4[%c0_6, %c0_7] : memref<512x16xbf16, #tpu.memory_space<vmem>>, vector<512x16xbf16>
    tpu.vector_store %arg4[%c0_6, %c0_7], %13 {strides = array<i32>} : memref<512x16xbf16, #tpu.memory_space<vmem>>, vector<512x16xbf16>,
    return
  }
  func.func @transform_0(%arg0: i32) -> (i32, i32) {
    %c0_i32 = arith.constant 0 : i32
    %c0_i32_0 = arith.constant 0 : i32
    return %arg0, %c0_i32 : i32, i32
  }
  func.func @transform_1(%arg0: i32) -> (i32, i32) {
    %c0_i32 = arith.constant 0 : i32
    %c0_i32_0 = arith.constant 0 : i32
    %c0_i32_1 = arith.constant 0 : i32
    return %c0_i32, %c0_i32_0 : i32, i32
  }
  func.func @transform_2(%arg0: i32) -> (i32, i32) {
    %c0_i32 = arith.constant 0 : i32
    %c0_i32_0 = arith.constant 0 : i32
    %c0_i32_1 = arith.constant 0 : i32
    return %c0_i32, %c0_i32_0 : i32, i32
  }
  func.func @transform_3(%arg0: i32) -> (i32, i32) {
    %c0_i32 = arith.constant 0 : i32
    %c0_i32_0 = arith.constant 0 : i32
    return %arg0, %c0_i32 : i32, i32
  }
}

</mosaic_0001>

<bundles_post_ra>
// kernel: feedback_block_forward.17
= control target key start
LH: loop header
LB: loop body
LE: loop exit
PB: predicated region body
PF: predicated region fallthrough
CT: control target
= control target key end

     0   :  { %vm204_vm0 = vcmask 125952   ;;  %s448_s0 = inlined_call_operand.vmem [shape: bf16[128,16], index: 0, kind: input, shape index: {}]   ;;  %s449_s1 = inlined_call_operand.vmem [shape: f32[1,16], index: 1, kind: input, shape index: {}]   ;;  %s450_s2 = inlined_call_operand.vmem [shape: f32[1,16], index: 2, kind: input, shape index: {}]   ;;  %s451_s3 = inlined_call_operand.vmem [shape: bf16[128,16], index: 3, kind: output, shape index: {}]  }
   0x1   :  { %v260_v0 = vld [vmem:[%s448_s0] sm:$0xff]   ;;  %v291_v4 = vld [vmem:[%s448_s0 + $0x8] sm:$0xff]   ;;  %v292_v5 = vld [vmem:[%s448_s0 + $0x10] sm:$0xff]  }
   0x2   :  { %v324_v1 = vld [vmem:[%s449_s1] ss:$0 sm:$0xff]  ;;  %v261_v2 = vunpack.c.l.bf16 %v260_v0  ;;  %v262_v3 = vunpack.c.h.bf16 %v260_v0  ;;  %v293_v6 = vld [vmem:[%s448_s0 + $0x18] sm:$0xff]   ;;  %v265_v8 = vunpack.c.l.bf16 %v291_v4  ;;  %v266_v9 = vunpack.c.h.bf16 %v291_v4  ;;  %v295_v40 = vld [vmem:[%s448_s0 + $0x28] sm:$0xff]  }
   0x3   :  { %v338_v7 = vld [vmem:[%s450_s2] ss:$0 sm:$0xff]  ;;  %v269_v10 = vunpack.c.l.bf16 %v292_v5  ;;  %v270_v11 = vunpack.c.h.bf16 %v292_v5  ;;  %v273_v14 = vunpack.c.l.bf16 %v293_v6  ;;  %v274_v15 = vunpack.c.h.bf16 %v293_v6  ;;  %v296_v52 = vld [vmem:[%s448_s0 + $0x30] sm:$0xff]  }
   0x4   :  { %v53_v12 = vmul.f32 %v261_v2, %v324_v1  ;;  %v54_v13 = vmul.f32 %v262_v3, %v324_v1  ;;  %v55_v16 = vmul.f32 %v265_v8, %v324_v1  ;;  %v56_v17 = vmul.f32 %v266_v9, %v324_v1  ;;  %v294_v39 = vld [vmem:[%s448_s0 + $0x20] sm:$0xff]  }
   0x5   :  { %v57_v18 = vmul.f32 %v269_v10, %v324_v1  ;;  %v58_v19 = vmul.f32 %v270_v11, %v324_v1  ;;  %v59_v22 = vmul.f32 %v273_v14, %v324_v1  ;;  %v60_v23 = vmul.f32 %v274_v15, %v324_v1 }
   0x6   :  { %v76_v20 = vadd.f32 %v338_v7, %v53_v12  ;;  %v77_v21 = vadd.f32 %v338_v7, %v54_v13  ;;  %v78_v24 = vadd.f32 %v338_v7, %v55_v16  ;;  %v79_v25 = vadd.f32 %v338_v7, %v56_v17  ;;  %v297_v17 = vld [vmem:[%s448_s0 + $0x38] sm:$0xff]  }
   0x7   :  { %v80_v26 = vadd.f32 %v338_v7, %v57_v18  ;;  %v81_v27 = vadd.f32 %v338_v7, %v58_v19  ;;  %v82_v46 = vadd.f32 %v338_v7, %v59_v22  ;;  %v83_v47 = vadd.f32 %v338_v7, %v60_v23 }
   0x8   :  { %vm92_vm1 = vcmp.gt.f32.partialorder %v76_v20, 0.0  ;;  %v108_v28 = vmul.f32 0.0, %v76_v20  ;;  %vm93_vm2 = vcmp.gt.f32.partialorder %v77_v21, 0.0  ;;  %v109_v29 = vmul.f32 0.0, %v77_v21 }
   0x9   :  { %vm94_vm3 = vcmp.gt.f32.partialorder %v78_v24, 0.0  ;;  %v110_v30 = vmul.f32 0.0, %v78_v24  ;;  %vm95_vm4 = vcmp.gt.f32.partialorder %v79_v25, 0.0  ;;  %v111_v31 = vmul.f32 0.0, %v79_v25 }
   0xa   :  { %v124_v32 = vsel %vm92_vm1, %v76_v20, %v108_v28  ;;  %v125_v33 = vsel %vm93_vm2, %v77_v21, %v109_v29  ;;  %vm96_vm5 = vcmp.gt.f32.partialorder %v80_v26, 0.0  ;;  %v112_v34 = vmul.f32 0.0, %v80_v26 }
   0xb   :  { %v243_v35 = vpack.c.bf16 %v124_v32, %v124_v32  ;;  %v244_v36 = vpack.c.bf16 %v125_v33, %v125_v33  ;;  %v126_v37 = vsel %vm94_vm3, %v78_v24, %v110_v30  ;;  %v127_v38 = vsel %vm95_vm4, %v79_v25, %v111_v31 }
   0xc   :  { %v245_v41 = vpack.c.bf16 %v126_v37, %v126_v37  ;;  %v246_v42 = vpack.c.bf16 %v127_v38, %v127_v38  ;;  %v128_v43 = vsel %vm96_vm5, %v80_v26, %v112_v34  ;;  %vm97_vm6 = vcmp.gt.f32.partialorder %v81_v27, 0.0 }
   0xd   :  { %205 = vst.msk [vmem:[%s451_s3] sm:$0xf] %vm204_vm0, %v243_v35  ;;  %206 = vst.msk [vmem:[%s451_s3 + $0x4] sm:$0xf] %vm204_vm0, %v244_v36  ;;  %v247_v44 = vpack.c.bf16 %v128_v43, %v128_v43  ;;  %v113_v45 = vmul.f32 0.0, %v81_v27  ;;  %v277_v48 = vunpack.c.l.bf16 %v294_v39  ;;  %v278_v49 = vunpack.c.h.bf16 %v294_v39 }
   0xe   :  { %207 = vst.msk [vmem:[%s451_s3 + $0x8] sm:$0xf] %vm204_vm0, %v245_v41  ;;  %208 = vst.msk [vmem:[%s451_s3 + $0xc] sm:$0xf] %vm204_vm0, %v246_v42  ;;  %v281_v50 = vunpack.c.l.bf16 %v295_v40  ;;  %v282_v51 = vunpack.c.h.bf16 %v295_v40  ;;  %vm98_vm7 = vcmp.gt.f32.partialorder %v82_v46, 0.0  ;;  %v114_v54 = vmul.f32 0.0, %v82_v46 }
   0xf   :  { %209 = vst.msk [vmem:[%s451_s3 + $0x10] sm:$0xf] %vm204_vm0, %v247_v44  ;;  %v129_v53 = vsel %vm97_vm6, %v81_v27, %v113_v45  ;;  %vm99_vm8 = vcmp.gt.f32.partialorder %v83_v47, 0.0  ;;  %v115_v56 = vmul.f32 0.0, %v83_v47  ;;  %v61_v57 = vmul.f32 %v277_v48, %v324_v1 }
  0x10   :  { %v248_v55 = vpack.c.bf16 %v129_v53, %v129_v53  ;;  %v62_v58 = vmul.f32 %v278_v49, %v324_v1  ;;  %v130_v59 = vsel %vm98_vm7, %v82_v46, %v114_v54  ;;  %v63_v60 = vmul.f32 %v281_v50, %v324_v1 }
  0x11   :  { %v64_v61 = vmul.f32 %v282_v51, %v324_v1  ;;  %v285_v62 = vunpack.c.l.bf16 %v296_v52  ;;  %v249_v63 = vpack.c.bf16 %v130_v59, %v130_v59  ;;  %v131_v0 = vsel %vm99_vm8, %v83_v47, %v115_v56 }
  0x12   :  { %210 = vst.msk [vmem:[%s451_s3 + $0x14] sm:$0xf] %vm204_vm0, %v248_v55  ;;  %v84_v2 = vadd.f32 %v338_v7, %v61_v57  ;;  %v85_v3 = vadd.f32 %v338_v7, %v62_v58  ;;  %v250_v4 = vpack.c.bf16 %v131_v0, %v131_v0  ;;  %v86_v5 = vadd.f32 %v338_v7, %v63_v60 }
  0x13   :  { %v87_v6 = vadd.f32 %v338_v7, %v64_v61  ;;  %v65_v8 = vmul.f32 %v285_v62, %v324_v1  ;;  %211 = vst.msk [vmem:[%s451_s3 + $0x18] sm:$0xf] %vm204_vm0, %v249_v63  ;;  %v286_v16 = vunpack.c.h.bf16 %v296_v52  ;;  %v289_v26 = vunpack.c.l.bf16 %v297_v17 }
  0x14   :  { %vm100_vm9 = vcmp.gt.f32.partialorder %v84_v2, 0.0  ;;  %v116_v9 = vmul.f32 0.0, %v84_v2  ;;  %vm101_vm10 = vcmp.gt.f32.partialorder %v85_v3, 0.0  ;;  %v117_v10 = vmul.f32 0.0, %v85_v3  ;;  %212 = vst.msk [vmem:[%s451_s3 + $0x1c] sm:$0xf] %vm204_vm0, %v250_v4 }
  0x15   :  { %vm102_vm11 = vcmp.gt.f32.partialorder %v86_v5, 0.0  ;;  %v118_v11 = vmul.f32 0.0, %v86_v5  ;;  %vm103_vm12 = vcmp.gt.f32.partialorder %v87_v6, 0.0  ;;  %v119_v12 = vmul.f32 0.0, %v87_v6 }
  0x16   :  { %v132_v13 = vsel %vm100_vm9, %v84_v2, %v116_v9  ;;  %v133_v14 = vsel %vm101_vm10, %v85_v3, %v117_v10  ;;  %v88_v15 = vadd.f32 %v338_v7, %v65_v8  ;;  %v66_v25 = vmul.f32 %v286_v16, %v324_v1 }
  0x17   :  { %v251_v18 = vpack.c.bf16 %v132_v13, %v132_v13  ;;  %v252_v19 = vpack.c.bf16 %v133_v14, %v133_v14  ;;  %v134_v20 = vsel %vm102_vm11, %v86_v5, %v118_v11  ;;  %v135_v21 = vsel %vm103_vm12, %v87_v6, %v119_v12 }
  0x18   :  { %v253_v22 = vpack.c.bf16 %v134_v20, %v134_v20  ;;  %v254_v23 = vpack.c.bf16 %v135_v21, %v135_v21  ;;  %vm104_vm13 = vcmp.gt.f32.partialorder %v88_v15, 0.0  ;;  %v120_v24 = vmul.f32 0.0, %v88_v15 }
  0x19   :  { %213 = vst.msk [vmem:[%s451_s3 + $0x20] sm:$0xf] %vm204_vm0, %v251_v18  ;;  %214 = vst.msk [vmem:[%s451_s3 + $0x24] sm:$0xf] %vm204_vm0, %v252_v19  ;;  %v290_v27 = vunpack.c.h.bf16 %v297_v17  ;;  %v89_v30 = vadd.f32 %v338_v7, %v66_v25  ;;  %v67_v31 = vmul.f32 %v289_v26, %v324_v1 }
  0x1a   :  { %215 = vst.msk [vmem:[%s451_s3 + $0x28] sm:$0xf] %vm204_vm0, %v253_v22  ;;  %216 = vst.msk [vmem:[%s451_s3 + $0x2c] sm:$0xf] %vm204_vm0, %v254_v23  ;;  %v136_v28 = vsel %vm104_vm13, %v88_v15, %v120_v24 }
  0x1b   :  { %v255_v29 = vpack.c.bf16 %v136_v28, %v136_v28  ;;  %v68_v32 = vmul.f32 %v290_v27, %v324_v1  ;;  %vm105_vm14 = vcmp.gt.f32.partialorder %v89_v30, 0.0  ;;  %v121_v33 = vmul.f32 0.0, %v89_v30 }
  0x1c   :  { %v90_v34 = vadd.f32 %v338_v7, %v67_v31 }
  0x1d   :  { %217 = vst.msk [vmem:[%s451_s3 + $0x30] sm:$0xf] %vm204_vm0, %v255_v29  ;;  %v91_v35 = vadd.f32 %v338_v7, %v68_v32  ;;  %v137_v36 = vsel %vm105_vm14, %v89_v30, %v121_v33 }
  0x1e   :  { %vm106_vm15 = vcmp.gt.f32.partialorder %v90_v34, 0.0  ;;  %v122_v37 = vmul.f32 0.0, %v90_v34  ;;  %v256_v38 = vpack.c.bf16 %v137_v36, %v137_v36 }
  0x1f   :  { %vm107_vm1 = vcmp.gt.f32.partialorder %v91_v35, 0.0  ;;  %v123_v39 = vmul.f32 0.0, %v91_v35 }
  0x20   :  { %v138_v40 = vsel %vm106_vm15, %v90_v34, %v122_v37  ;;  %218 = vst.msk [vmem:[%s451_s3 + $0x34] sm:$0xf] %vm204_vm0, %v256_v38 }
  0x21   :  { %v257_v1 = vpack.c.bf16 %v138_v40, %v138_v40  ;;  %v139_v41 = vsel %vm107_vm1, %v91_v35, %v123_v39 }
  0x22   :  { %v258_v42 = vpack.c.bf16 %v139_v41, %v139_v41 }
  0x23   :  { %219 = vst.msk [vmem:[%s451_s3 + $0x38] sm:$0xf] %vm204_vm0, %v257_v1 }
  0x24   :  { %220 = vst.msk [vmem:[%s451_s3 + $0x3c] sm:$0xf] %vm204_vm0, %v258_v42 }

// kernel: feedback_block_forward.16
= control target key start
LH: loop header
LB: loop body
LE: loop exit
PB: predicated region body
PF: predicated region fallthrough
CT: control target
= control target key end

     0   :  { %vm103_vm0 = vcmask 130048   ;;  %vm456_vm1 = vcmask 125952   ;;  %vm609_vm2 = vcmask 122880   ;;  %s1022_s3 = inlined_call_operand.vmem [shape: bf16[16,16], index: 3, kind: input, shape index: {}]   ;;  %s1023_s2 = inlined_call_operand.vmem [shape: bf16[16,16], index: 2, kind: input, shape index: {}]   ;;  %s1024_s1 = inlined_call_operand.vmem [shape: bf16[128,16], index: 1, kind: input, shape index: {}, may-alias: {0,1}]   ;;  %s1025_s0 = inlined_call_operand.vmem [shape: bf16[128,16], index: 0, kind: input, shape index: {}, may-alias: {0,1}]   ;;  %s1026_s4 = inlined_call_operand.vmem [shape: bf16[128,16], index: 4, kind: output, shape index: {0}]   ;;  %s1027_s5 = inlined_call_operand.vmem [shape: f32[1,1,16], index: 5, kind: output, shape index: {1}]   ;;  %s1028_s6 = inlined_call_operand.vmem [shape: f32[1,1,16], index: 6, kind: output, shape index: {2}]  }
   0x1   :  { %v797_v0 = vld [vmem:[%s1022_s3] sm:$0xff]   ;;  %v801_v4 = vld [vmem:[%s1024_s1 + $0x8] sm:$0xff]   ;;  %v803_v6 = vld [vmem:[%s1024_s1 + $0x10] sm:$0xff]  }
   0x2   :  { %v798_v1 = vld [vmem:[%s1023_s2] sm:$0xff]   ;;  %761 = vmatprep.subr.bf16.mxu0 %v797_v0  ;;  %v802_v5 = vld [vmem:[%s1025_s0 + $0x8] sm:$0xff]   ;;  %v804_v7 = vld [vmem:[%s1025_s0 + $0x10] sm:$0xff]  }
   0x3   :  { %v799_v2 = vld [vmem:[%s1024_s1] sm:$0xff]   ;;  %779 = vmatprep.subr.bf16.mxu1 %v798_v1  ;;  %762 = vmatpush3.bf16.msra.mxu0 %v797_v0  ;;  %v805_v8 = vld [vmem:[%s1024_s1 + $0x18] sm:$0xff]   ;;  %v809_v12 = vld [vmem:[%s1024_s1 + $0x28] sm:$0xff]  }
   0x4   :  { %v800_v3 = vld [vmem:[%s1025_s0] sm:$0xff]   ;;  %780 = vmatpush3.bf16.msra.mxu1 %v798_v1  ;;  %763 = vmatprep.mubr.msk.bf16.mxu0 %vm103_vm0, %v799_v2  ;;  %v806_v9 = vld [vmem:[%s1025_s0 + $0x18] sm:$0xff]   ;;  %v810_v13 = vld [vmem:[%s1025_s0 + $0x28] sm:$0xff]  }
   0x5   :  { %781 = vmatprep.mubr.msk.bf16.mxu1 %vm103_vm0, %v800_v3  ;;  %v807_v10 = vld [vmem:[%s1024_s1 + $0x20] sm:$0xff]   ;;  %v811_v14 = vld [vmem:[%s1024_s1 + $0x30] sm:$0xff]   ;;  %v813_v16 = vld [vmem:[%s1024_s1 + $0x38] sm:$0xff]  }
   0x6   :  { %764 = vmatmul.mubr.msk.bf16.vlgmr.msra.gmra.mxu0 %vm103_vm0, %v801_v4  ;;  %v808_v11 = vld [vmem:[%s1025_s0 + $0x20] sm:$0xff]   ;;  %v812_v15 = vld [vmem:[%s1025_s0 + $0x30] sm:$0xff]   ;;  %v814_v17 = vld [vmem:[%s1025_s0 + $0x38] sm:$0xff]  }
   0x7   :  { %782 = vmatmul.mubr.msk.bf16.vlgmr.msra.gmra.mxu1 %vm103_vm0, %v802_v5  ;;  %767 = vmatprep.mubr.msk.bf16.mxu0 %vm103_vm0, %v803_v6 }
   0x8   :  { %785 = vmatprep.mubr.msk.bf16.mxu1 %vm103_vm0, %v804_v7 }
   0xe   :  { %768 = vmatmul.mubr.msk.bf16.gmra.mxu0 %vm103_vm0, %v805_v8 }
   0xf   :  { %786 = vmatmul.mubr.msk.bf16.gmra.mxu1 %vm103_vm0, %v806_v9  ;;  %771 = vmatprep.mubr.msk.bf16.mxu0 %vm103_vm0, %v807_v10 }
  0x10   :  { %789 = vmatprep.mubr.msk.bf16.mxu1 %vm103_vm0, %v808_v11 }
  0x16   :  { %772 = vmatmul.mubr.msk.bf16.gmra.mxu0 %vm103_vm0, %v809_v12 }
  0x17   :  { %790 = vmatmul.mubr.msk.bf16.gmra.mxu1 %vm103_vm0, %v810_v13  ;;  %775 = vmatprep.mubr.msk.bf16.mxu0 %vm103_vm0, %v811_v14 }
  0x18   :  { %793 = vmatprep.mubr.msk.bf16.mxu1 %vm103_vm0, %v812_v15 }
  0x1e   :  { %776 = vmatmul.mubr.msk.bf16.gmra.mxu0 %vm103_vm0, %v813_v16 }
  0x1f   :  { %794 = vmatmul.mubr.msk.bf16.gmra.mxu1 %vm103_vm0, %v814_v17 }
  0xc6   :  { %v765_v18 = vpop.f32.mrf.mxu0 }
  0xc7   :  { %v783_v19 = vpop.f32.mrf.mxu1 }
  0xc8   :  { %v338_v20 = vadd.f32 %v783_v19, %v765_v18  ;;  %v162_v21 = vpop.f32.mrf.mxu0 }
  0xc9   :  { %v329_v22 = vpop.f32.mrf.mxu1 }
  0xca   :  { %v729_v23 = vpack.c.bf16 %v338_v20, %v338_v20  ;;  %v330_v24 = vadd.f32 %v329_v22, %v162_v21  ;;  %v766_v25 = vpop.f32.mrf.mxu0  ;;  %v613_v34 = vmul.f32 %v338_v20, %v338_v20  ;;  %v575_v43 = vsel %vm103_vm0, %v338_v20, 0.0 }
  0xcb   :  { %v784_v26 = vpop.f32.mrf.mxu1 }
  0xcc   :  { %459 = vst.msk [vmem:[%s1026_s4 + $0x8] sm:$0xf] %vm456_vm1, %v729_v23  ;;  %v727_v27 = vpack.c.bf16 %v330_v24, %v330_v24  ;;  %v165_v28 = vpop.f32.mrf.mxu0  ;;  %v341_v29 = vadd.f32 %v784_v26, %v766_v25  ;;  %v611_v31 = vmul.f32 %v330_v24, %v330_v24  ;;  %v572_v35 = vsel %vm103_vm0, %v330_v24, 0.0 }
  0xcd   :  { %v332_v30 = vpop.f32.mrf.mxu1  ;;  %v630_v55 = vsel %vm103_vm0, %v613_v34, 0.0 }
  0xce   :  { %457 = vst.msk [vmem:[%s1026_s4] sm:$0xf] %vm456_vm1, %v727_v27  ;;  %v333_v32 = vadd.f32 %v332_v30, %v165_v28  ;;  %v769_v33 = vpop.f32.mrf.mxu0  ;;  %v730_v36 = vpack.c.bf16 %v341_v29, %v341_v29  ;;  %v627_v46 = vsel %vm103_vm0, %v611_v31, 0.0  ;;  %v614_v47 = vmul.f32 %v341_v29, %v341_v29 }
  0xcf   :  { %v787_v37 = vpop.f32.mrf.mxu1  ;;  %v577_v56 = vsel %vm103_vm0, %v341_v29, 0.0 }
  0xd0   :  { %v728_v38 = vpack.c.bf16 %v333_v32, %v333_v32  ;;  %v573_v39 = vsel %vm103_vm0, %v333_v32, 0.0  ;;  %v612_v40 = vmul.f32 %v333_v32, %v333_v32  ;;  %v354_v41 = vadd.f32 %v787_v37, %v769_v33  ;;  %v178_v42 = vpop.f32.mrf.mxu0  ;;  %460 = vst.msk [vmem:[%s1026_s4 + $0xc] sm:$0xf] %vm456_vm1, %v730_v36 }
  0xd1   :  { %v574_v44 = vadd.f32 %v573_v39, %v572_v35  ;;  %v345_v45 = vpop.f32.mrf.mxu1  ;;  %v632_v63 = vsel %vm103_vm0, %v614_v47, 0.0 }
  0xd2   :  { %458 = vst.msk [vmem:[%s1026_s4 + $0x4] sm:$0xf] %vm456_vm1, %v728_v38  ;;  %v628_v48 = vsel %vm103_vm0, %v612_v40, 0.0  ;;  %v733_v49 = vpack.c.bf16 %v354_v41, %v354_v41  ;;  %v770_v50 = vpop.f32.mrf.mxu0  ;;  %v346_v53 = vadd.f32 %v345_v45, %v178_v42  ;;  %v617_v8 = vmul.f32 %v354_v41, %v354_v41 }
  0xd3   :  { %v576_v51 = vadd.f32 %v575_v43, %v574_v44  ;;  %v629_v52 = vadd.f32 %v628_v48, %v627_v46  ;;  %v788_v54 = vpop.f32.mrf.mxu1  ;;  %v583_v20 = vsel %vm103_vm0, %v354_v41, 0.0 }
  0xd4   :  { %463 = vst.msk [vmem:[%s1026_s4 + $0x18] sm:$0xf] %vm456_vm1, %v733_v49  ;;  %v357_v57 = vadd.f32 %v788_v54, %v770_v50  ;;  %v181_v58 = vpop.f32.mrf.mxu0  ;;  %v731_v60 = vpack.c.bf16 %v346_v53, %v346_v53  ;;  %v579_v0 = vsel %vm103_vm0, %v346_v53, 0.0  ;;  %v615_v1 = vmul.f32 %v346_v53, %v346_v53 }
  0xd5   :  { %v631_v59 = vadd.f32 %v630_v55, %v629_v52  ;;  %v578_v61 = vadd.f32 %v577_v56, %v576_v51  ;;  %v348_v62 = vpop.f32.mrf.mxu1  ;;  %v638_v29 = vsel %vm103_vm0, %v617_v8, 0.0 }
  0xd6   :  { %v734_v2 = vpack.c.bf16 %v357_v57, %v357_v57  ;;  %v773_v3 = vpop.f32.mrf.mxu0  ;;  %461 = vst.msk [vmem:[%s1026_s4 + $0x10] sm:$0xf] %vm456_vm1, %v731_v60  ;;  %v349_v6 = vadd.f32 %v348_v62, %v181_v58  ;;  %v634_v9 = vsel %vm103_vm0, %v615_v1, 0.0  ;;  %v618_v21 = vmul.f32 %v357_v57, %v357_v57 }
  0xd7   :  { %v580_v4 = vadd.f32 %v579_v0, %v578_v61  ;;  %v633_v5 = vadd.f32 %v632_v63, %v631_v59  ;;  %v791_v7 = vpop.f32.mrf.mxu1  ;;  %v585_v30 = vsel %vm103_vm0, %v357_v57, 0.0 }
  0xd8   :  { %464 = vst.msk [vmem:[%s1026_s4 + $0x1c] sm:$0xf] %vm456_vm1, %v734_v2  ;;  %v370_v10 = vadd.f32 %v791_v7, %v773_v3  ;;  %v194_v11 = vpop.f32.mrf.mxu0  ;;  %v732_v13 = vpack.c.bf16 %v349_v6, %v349_v6  ;;  %v581_v14 = vsel %vm103_vm0, %v349_v6, 0.0  ;;  %v616_v15 = vmul.f32 %v349_v6, %v349_v6 }
  0xd9   :  { %v635_v12 = vadd.f32 %v634_v9, %v633_v5  ;;  %v361_v16 = vpop.f32.mrf.mxu1  ;;  %v582_v17 = vadd.f32 %v581_v14, %v580_v4  ;;  %v640_v38 = vsel %vm103_vm0, %v618_v21, 0.0 }
  0xda   :  { %v737_v18 = vpack.c.bf16 %v370_v10, %v370_v10  ;;  %v774_v19 = vpop.f32.mrf.mxu0  ;;  %462 = vst.msk [vmem:[%s1026_s4 + $0x14] sm:$0xf] %vm456_vm1, %v732_v13  ;;  %v636_v22 = vsel %vm103_vm0, %v616_v15, 0.0  ;;  %v362_v23 = vadd.f32 %v361_v16, %v194_v11  ;;  %v621_v42 = vmul.f32 %v370_v10, %v370_v10 }
  0xdb   :  { %v792_v24 = vpop.f32.mrf.mxu1  ;;  %v584_v25 = vadd.f32 %v583_v20, %v582_v17  ;;  %v637_v26 = vadd.f32 %v636_v22, %v635_v12  ;;  %v591_v56 = vsel %vm103_vm0, %v370_v10, 0.0 }
  0xdc   :  { %467 = vst.msk [vmem:[%s1026_s4 + $0x28] sm:$0xf] %vm456_vm1, %v737_v18  ;;  %v373_v27 = vadd.f32 %v792_v24, %v774_v19  ;;  %v197_v28 = vpop.f32.mrf.mxu0  ;;  %v735_v31 = vpack.c.bf16 %v362_v23, %v362_v23  ;;  %v619_v32 = vmul.f32 %v362_v23, %v362_v23  ;;  %v587_v39 = vsel %vm103_vm0, %v362_v23, 0.0 }
  0xdd   :  { %v364_v33 = vpop.f32.mrf.mxu1  ;;  %v639_v34 = vadd.f32 %v638_v29, %v637_v26  ;;  %v586_v35 = vadd.f32 %v585_v30, %v584_v25  ;;  %v646_v1 = vsel %vm103_vm0, %v621_v42, 0.0 }
  0xde   :  { %v738_v36 = vpack.c.bf16 %v373_v27, %v373_v27  ;;  %v777_v37 = vpop.f32.mrf.mxu0  ;;  %465 = vst.msk [vmem:[%s1026_s4 + $0x20] sm:$0xf] %vm456_vm1, %v735_v31  ;;  %v365_v40 = vadd.f32 %v364_v33, %v197_v28  ;;  %v642_v47 = vsel %vm103_vm0, %v619_v32, 0.0  ;;  %v622_v57 = vmul.f32 %v373_v27, %v373_v27 }
  0xdf   :  { %v795_v41 = vpop.f32.mrf.mxu1  ;;  %v588_v43 = vadd.f32 %v587_v39, %v586_v35  ;;  %v641_v44 = vadd.f32 %v640_v38, %v639_v34  ;;  %v593_v2 = vsel %vm103_vm0, %v373_v27, 0.0 }
  0xe0   :  { %468 = vst.msk [vmem:[%s1026_s4 + $0x2c] sm:$0xf] %vm456_vm1, %v738_v36  ;;  %v386_v45 = vadd.f32 %v795_v41, %v777_v37  ;;  %v210_v46 = vpop.f32.mrf.mxu0  ;;  %v736_v48 = vpack.c.bf16 %v365_v40, %v365_v40  ;;  %v589_v49 = vsel %vm103_vm0, %v365_v40, 0.0  ;;  %v620_v50 = vmul.f32 %v365_v40, %v365_v40 }
  0xe1   :  { %v377_v51 = vpop.f32.mrf.mxu1  ;;  %v643_v52 = vadd.f32 %v642_v47, %v641_v44  ;;  %v590_v53 = vadd.f32 %v589_v49, %v588_v43  ;;  %v648_v9 = vsel %vm103_vm0, %v622_v57, 0.0 }
  0xe2   :  { %v741_v54 = vpack.c.bf16 %v386_v45, %v386_v45  ;;  %v778_v55 = vpop.f32.mrf.mxu0  ;;  %466 = vst.msk [vmem:[%s1026_s4 + $0x24] sm:$0xf] %vm456_vm1, %v736_v48  ;;  %v644_v58 = vsel %vm103_vm0, %v620_v50, 0.0  ;;  %v378_v59 = vadd.f32 %v377_v51, %v210_v46  ;;  %v625_v12 = vmul.f32 %v386_v45, %v386_v45 }
  0xe3   :  { %v796_v60 = vpop.f32.mrf.mxu1  ;;  %v592_v61 = vadd.f32 %v591_v56, %v590_v53  ;;  %v645_v62 = vadd.f32 %v644_v58, %v643_v52  ;;  %v599_v21 = vsel %vm103_vm0, %v386_v45, 0.0 }
  0xe4   :  { %471 = vst.msk [vmem:[%s1026_s4 + $0x38] sm:$0xf] %vm456_vm1, %v741_v54  ;;  %v389_v63 = vadd.f32 %v796_v60, %v778_v55  ;;  %v213_v0 = vpop.f32.mrf.mxu0  ;;  %v739_v3 = vpack.c.bf16 %v378_v59, %v378_v59  ;;  %v623_v4 = vmul.f32 %v378_v59, %v378_v59  ;;  %v595_v10 = vsel %vm103_vm0, %v378_v59, 0.0 }
  0xe5   :  { %v380_v5 = vpop.f32.mrf.mxu1  ;;  %v647_v6 = vadd.f32 %v646_v1, %v645_v62  ;;  %v594_v7 = vadd.f32 %v593_v2, %v592_v61  ;;  %v654_v26 = vsel %vm103_vm0, %v625_v12, 0.0 }
  0xe6   :  { %v742_v8 = vpack.c.bf16 %v389_v63, %v389_v63  ;;  %469 = vst.msk [vmem:[%s1026_s4 + $0x30] sm:$0xf] %vm456_vm1, %v739_v3  ;;  %v381_v11 = vadd.f32 %v380_v5, %v213_v0  ;;  %v650_v15 = vsel %vm103_vm0, %v623_v4, 0.0  ;;  %v626_v22 = vmul.f32 %v389_v63, %v389_v63 }
  0xe7   :  { %v596_v13 = vadd.f32 %v595_v10, %v594_v7  ;;  %v649_v14 = vadd.f32 %v648_v9, %v647_v6  ;;  %v601_v27 = vsel %vm103_vm0, %v389_v63, 0.0 }
  0xe8   :  { %472 = vst.msk [vmem:[%s1026_s4 + $0x3c] sm:$0xf] %vm456_vm1, %v742_v8  ;;  %v740_v16 = vpack.c.bf16 %v381_v11, %v381_v11  ;;  %v597_v17 = vsel %vm103_vm0, %v381_v11, 0.0  ;;  %v624_v18 = vmul.f32 %v381_v11, %v381_v11  ;;  %v656_v30 = vsel %vm103_vm0, %v626_v22, 0.0 }
  0xe9   :  { %v651_v19 = vadd.f32 %v650_v15, %v649_v14  ;;  %v598_v20 = vadd.f32 %v597_v17, %v596_v13 }
  0xea   :  { %470 = vst.msk [vmem:[%s1026_s4 + $0x34] sm:$0xf] %vm456_vm1, %v740_v16  ;;  %v652_v23 = vsel %vm103_vm0, %v624_v18, 0.0 }
  0xeb   :  { %v600_v24 = vadd.f32 %v599_v21, %v598_v20  ;;  %v653_v25 = vadd.f32 %v652_v23, %v651_v19 }
  0xed   :  { %v602_v28 = vadd.f32 %v601_v27, %v600_v24  ;;  %v655_v29 = vadd.f32 %v654_v26, %v653_v25 }
  0xef   :  { %v603_v31 = vrot.slane %v602_v28, 4  ;;  %v657_v32 = vadd.f32 %v656_v30, %v655_v29 }
  0xf1   :  { %v604_v33 = vadd.f32 %v603_v31, %v602_v28  ;;  %v658_v34 = vrot.slane %v657_v32, 4 }
  0xf3   :  { %v605_v35 = vrot.slane %v604_v33, 2  ;;  %v659_v36 = vadd.f32 %v658_v34, %v657_v32 }
  0xf5   :  { %v606_v37 = vadd.f32 %v605_v35, %v604_v33  ;;  %v660_v38 = vrot.slane %v659_v36, 2 }
  0xf7   :  { %v607_v39 = vrot.slane %v606_v37, 1  ;;  %v661_v40 = vadd.f32 %v660_v38, %v659_v36 }
  0xf9   :  { %v608_v41 = vadd.f32 %v607_v39, %v606_v37  ;;  %v662_v42 = vrot.slane %v661_v40, 1 }
  0xfb   :  { %610 = vst.msk [vmem:[%s1027_s5] sm:$0x1] %vm609_vm2, %v608_v41  ;;  %v663_v43 = vadd.f32 %v662_v42, %v661_v40 }
  0xfd   :  { %664 = vst.msk [vmem:[%s1028_s6] sm:$0x1] %vm609_vm2, %v663_v43 }

// kernel: feedback_block_forward.18
= control target key start
LH: loop header
LB: loop body
LE: loop exit
PB: predicated region body
PF: predicated region fallthrough
CT: control target
= control target key end

     0   :  { %v700_v0 = vmov 0   ;;  %vm175_vm0 = vcmask 130048   ;;  %vm361_vm1 = vcmask 519168   ;;  %vm477_vm2 = vcmask 523264   ;;  %s953_s1 = inlined_call_operand.vmem [shape: bf16[144,64], index: 1, kind: input, shape index: {}]   ;;  %s954_s0 = inlined_call_operand.vmem [shape: bf16[128,144], index: 0, kind: input, shape index: {}]   ;;  %s955_s2 = inlined_call_operand.vmem [shape: bf16[128,64], index: 2, kind: output, shape index: {0}]   ;;  %s956_s3 = inlined_call_operand.vmem [shape: f32[1,1,64], index: 3, kind: output, shape index: {1}]   ;;  %s957_s4 = inlined_call_operand.vmem [shape: f32[1,1,64], index: 4, kind: output, shape index: {2}]  }
   0x1   :  { %200 = vmatprep.subr.bf16.mxu0 %v700_v0  ;;  %v667_v1 = vld [vmem:[%s953_s1 + $0x38] sm:$0xff]   ;;  %648 = vmatprep.subr.bf16.mxu1 %v700_v0  ;;  %v668_v2 = vld [vmem:[%s953_s1 + $0x30] sm:$0xff]   ;;  %v669_v3 = vld [vmem:[%s953_s1 + $0x28] sm:$0xff]   ;;  %vm515_vm3 = vcmask 516096  }
   0x2   :  { %201 = vmatpush1.bf16.msra.mxu0 %v667_v1  ;;  %657 = vmatpush1.bf16.msra.mxu1 %v667_v1  ;;  %v670_v4 = vld [vmem:[%s953_s1 + $0x20] sm:$0xff]   ;;  %v671_v7 = vld [vmem:[%s953_s1 + $0x18] sm:$0xff]   ;;  %v672_v8 = vld [vmem:[%s953_s1 + $0x10] sm:$0xff]  }
   0x3   :  { %202 = vmatprep.subr.bf16.mxu0 %v700_v0  ;;  %649 = vmatprep.subr.bf16.mxu1 %v700_v0  ;;  %v678_v5 = vld [vmem:[%s954_s0 + $0x4] ss:$8 sps:$4 sm:$0xff]   ;;  %v676_v12 = vld [vmem:[%s954_s0] ss:$8 sps:$4 sm:$0xff]   ;;  %v679_v14 = vld [vmem:[%s954_s0 + $0x14] ss:$8 sps:$4 sm:$0xff]  }
   0x4   :  { %608 = vmatprep.mubr.msk.bf16.mxu0 %vm175_vm0, %v678_v5  ;;  %v684_v6 = vld [vmem:[%s954_s0 + $0x44] ss:$8 sps:$4 sm:$0xff]   ;;  %v682_v13 = vld [vmem:[%s954_s0 + $0x40] ss:$8 sps:$4 sm:$0xff]   ;;  %v688_v15 = vld [vmem:[%s954_s0 + $0x54] ss:$8 sps:$4 sm:$0xff]  }
   0x5   :  { %612 = vmatprep.mubr.msk.bf16.mxu1 %vm175_vm0, %v684_v6  ;;  %v673_v9 = vld [vmem:[%s953_s1 + $0x8] sm:$0xff]   ;;  %v674_v10 = vld [vmem:[%s953_s1] sm:$0xff]   ;;  %v681_v16 = vld [vmem:[%s954_s0 + $0x10] ss:$8 sps:$4 sm:$0xff]  }
   0x6   :  { %203 = vmatpush1.bf16.msra.mxu0 %v668_v2  ;;  %658 = vmatpush1.bf16.msra.mxu1 %v668_v2  ;;  %v675_v11 = vld [vmem:[%s953_s1 + $0x40] sm:$0xff]   ;;  %v690_v17 = vld [vmem:[%s954_s0 + $0x50] ss:$8 sps:$4 sm:$0xff]   ;;  %v691_v22 = vld [vmem:[%s954_s0 + $0x34] ss:$8 sps:$4 sm:$0xff]  }
   0x7   :  { %204 = vmatprep.subr.bf16.mxu0 %v700_v0  ;;  %650 = vmatprep.subr.bf16.mxu1 %v700_v0  ;;  %v685_v18 = vld [vmem:[%s954_s0 + $0x24] ss:$8 sps:$4 sm:$0xff]   ;;  %v687_v20 = vld [vmem:[%s954_s0 + $0x20] ss:$8 sps:$4 sm:$0xff]   ;;  %v697_v23 = vld [vmem:[%s954_s0 + $0x74] ss:$8 sps:$4 sm:$0xff]  }
   0x8   :  { %v694_v19 = vld [vmem:[%s954_s0 + $0x64] ss:$8 sps:$4 sm:$0xff]   ;;  %v696_v21 = vld [vmem:[%s954_s0 + $0x60] ss:$8 sps:$4 sm:$0xff]   ;;  %v693_v24 = vld [vmem:[%s954_s0 + $0x30] ss:$8 sps:$4 sm:$0xff]  }
   0x9   :  { %v699_v25 = vld [vmem:[%s954_s0 + $0x70] ss:$8 sps:$4 sm:$0xff]  }
   0xa   :  { %205 = vmatpush1.bf16.msra.mxu0 %v669_v3  ;;  %659 = vmatpush1.bf16.msra.mxu1 %v669_v3 }
   0xb   :  { %206 = vmatprep.subr.bf16.mxu0 %v700_v0  ;;  %651 = vmatprep.subr.bf16.mxu1 %v700_v0 }
   0xe   :  { %207 = vmatpush1.bf16.msra.mxu0 %v670_v4  ;;  %660 = vmatpush1.bf16.msra.mxu1 %v670_v4 }
   0xf   :  { %208 = vmatprep.subr.bf16.mxu0 %v700_v0  ;;  %652 = vmatprep.subr.bf16.mxu1 %v700_v0 }
  0x12   :  { %209 = vmatpush1.bf16.msra.mxu0 %v671_v7  ;;  %661 = vmatpush1.bf16.msra.mxu1 %v671_v7 }
  0x13   :  { %210 = vmatprep.subr.bf16.mxu0 %v700_v0  ;;  %653 = vmatprep.subr.bf16.mxu1 %v700_v0 }
  0x16   :  { %211 = vmatpush1.bf16.msra.mxu0 %v672_v8  ;;  %662 = vmatpush1.bf16.msra.mxu1 %v672_v8 }
  0x17   :  { %212 = vmatprep.subr.bf16.mxu0 %v700_v0  ;;  %654 = vmatprep.subr.bf16.mxu1 %v700_v0 }
  0x1a   :  { %213 = vmatpush1.bf16.msra.mxu0 %v673_v9  ;;  %663 = vmatpush1.bf16.msra.mxu1 %v673_v9 }
  0x1b   :  { %214 = vmatprep.subr.bf16.mxu0 %v700_v0  ;;  %655 = vmatprep.subr.bf16.mxu1 %v700_v0 }
  0x1e   :  { %215 = vmatpush1.bf16.msra.mxu0 %v674_v10  ;;  %664 = vmatpush1.bf16.msra.mxu1 %v674_v10 }
  0x1f   :  { %230 = vmatprep.subr.bf16.mxu0 %v700_v0  ;;  %656 = vmatprep.subr.bf16.mxu1 %v700_v0 }
  0x22   :  { %231 = vmatpush2.bf16.msra.mxu0 %v675_v11  ;;  %665 = vmatpush2.bf16.msra.mxu1 %v675_v11 }
  0x25   :  { %233 = vmatmul.mubr.bf16.vlgmr.msra.gmra.mxu0 %v676_v12  ;;  %265 = vmatmul.mubr.bf16.vlgmr.msra.gmra.mxu1 %v682_v13 }
  0x26   :  { %609 = vmatprep.mubr.msk.bf16.mxu0 %vm175_vm0, %v679_v14  ;;  %613 = vmatprep.mubr.msk.bf16.mxu1 %vm175_vm0, %v688_v15 }
  0x2d   :  { %241 = vmatmul.mubr.bf16.gmra.mxu0 %v681_v16  ;;  %273 = vmatmul.mubr.bf16.gmra.mxu1 %v690_v17 }
  0x2e   :  { %610 = vmatprep.mubr.msk.bf16.mxu0 %vm175_vm0, %v685_v18  ;;  %614 = vmatprep.mubr.msk.bf16.mxu1 %vm175_vm0, %v694_v19 }
  0x35   :  { %249 = vmatmul.mubr.bf16.gmra.mxu0 %v687_v20  ;;  %281 = vmatmul.mubr.bf16.gmra.mxu1 %v696_v21 }
  0x36   :  { %611 = vmatprep.mubr.msk.bf16.mxu0 %vm175_vm0, %v691_v22  ;;  %615 = vmatprep.mubr.msk.bf16.mxu1 %vm175_vm0, %v697_v23 }
  0x3d   :  { %257 = vmatmul.mubr.bf16.gmra.mxu0 %v693_v24  ;;  %289 = vmatmul.mubr.bf16.gmra.mxu1 %v699_v25 }
  0xe5   :  { %v234_v26 = vpop.f32.mrf.mxu0  ;;  %v809_v27 = vpop.f32.mrf.mxu1 }
  0xe6   :  { %v632_v28 = vpack.c.bf16 %v234_v26, %v234_v26  ;;  %v640_v29 = vpack.c.bf16 %v809_v27, %v809_v27  ;;  %v517_v51 = vmul.f32 %v234_v26, %v234_v26  ;;  %v478_v54 = vsel %vm477_vm2, %v234_v26, 0.0 }
  0xe7   :  { %v236_v30 = vpop.f32.mrf.mxu0  ;;  %v268_v31 = vpop.f32.mrf.mxu1 }
  0xe8   :  { %362 = vst.msk [vmem:[%s955_s2] sm:$0xf] %vm361_vm1, %v632_v28  ;;  %370 = vst.msk [vmem:[%s955_s2 + $0x20] sm:$0xf] %vm361_vm1, %v640_v29  ;;  %v533_v1 = vsel %vm477_vm2, %v517_v51, 0.0  ;;  %v493_v51 = vsel %vm477_vm2, %v809_v27, 0.0 }
  0xe9   :  { %v237_v32 = vpop.f32.mrf.mxu0  ;;  %v821_v33 = vpop.f32.mrf.mxu1 }
  0xea   :  { %v633_v34 = vpack.c.bf16 %v237_v32, %v237_v32  ;;  %v641_v35 = vpack.c.bf16 %v821_v33, %v821_v33  ;;  %v518_v46 = vmul.f32 %v237_v32, %v237_v32  ;;  %v479_v52 = vsel %vm477_vm2, %v237_v32, 0.0 }
  0xeb   :  { %v239_v36 = vpop.f32.mrf.mxu0  ;;  %v271_v37 = vpop.f32.mrf.mxu1  ;;  %v480_v62 = vadd.f32 %v479_v52, %v478_v54  ;;  %v526_v52 = vmul.f32 %v821_v33, %v821_v33 }
  0xec   :  { %363 = vst.msk [vmem:[%s955_s2 + $0x4] sm:$0xf] %vm361_vm1, %v633_v34  ;;  %371 = vst.msk [vmem:[%s955_s2 + $0x24] sm:$0xf] %vm361_vm1, %v641_v35  ;;  %v534_v58 = vsel %vm477_vm2, %v518_v46, 0.0  ;;  %v525_v36 = vmul.f32 %v809_v27, %v809_v27  ;;  %v495_v27 = vsel %vm477_vm2, %v821_v33, 0.0 }
  0xed   :  { %v242_v38 = vpop.f32.mrf.mxu0  ;;  %v833_v39 = vpop.f32.mrf.mxu1  ;;  %v535_v5 = vadd.f32 %v534_v58, %v533_v1 }
  0xee   :  { %v634_v40 = vpack.c.bf16 %v242_v38, %v242_v38  ;;  %v642_v41 = vpack.c.bf16 %v833_v39, %v833_v39  ;;  %v519_v53 = vmul.f32 %v242_v38, %v242_v38  ;;  %v481_v59 = vsel %vm477_vm2, %v242_v38, 0.0 }
  0xef   :  { %v244_v42 = vpop.f32.mrf.mxu0  ;;  %v276_v43 = vpop.f32.mrf.mxu1  ;;  %v482_v6 = vadd.f32 %v481_v59, %v480_v62  ;;  %v527_v58 = vmul.f32 %v833_v39, %v833_v39  ;;  %v497_v62 = vsel %vm477_vm2, %v833_v39, 0.0 }
  0xf0   :  { %364 = vst.msk [vmem:[%s955_s2 + $0x8] sm:$0xf] %vm361_vm1, %v634_v40  ;;  %372 = vst.msk [vmem:[%s955_s2 + $0x28] sm:$0xf] %vm361_vm1, %v642_v41  ;;  %v536_v2 = vsel %vm477_vm2, %v519_v53, 0.0 }
  0xf1   :  { %v245_v44 = vpop.f32.mrf.mxu0  ;;  %v845_v45 = vpop.f32.mrf.mxu1  ;;  %v537_v14 = vadd.f32 %v536_v2, %v535_v5  ;;  %v552_v2 = vsel %vm477_vm2, %v527_v58, 0.0 }
  0xf2   :  { %v635_v47 = vpack.c.bf16 %v245_v44, %v245_v44  ;;  %v643_v48 = vpack.c.bf16 %v845_v45, %v845_v45  ;;  %v520_v55 = vmul.f32 %v245_v44, %v245_v44  ;;  %v483_v3 = vsel %vm477_vm2, %v245_v44, 0.0 }
  0xf3   :  { %v247_v49 = vpop.f32.mrf.mxu0  ;;  %v279_v50 = vpop.f32.mrf.mxu1  ;;  %v484_v15 = vadd.f32 %v483_v3, %v482_v6  ;;  %v499_v33 = vsel %vm477_vm2, %v845_v45, 0.0 }
  0xf4   :  { %365 = vst.msk [vmem:[%s955_s2 + $0xc] sm:$0xf] %vm361_vm1, %v635_v47  ;;  %373 = vst.msk [vmem:[%s955_s2 + $0x2c] sm:$0xf] %vm361_vm1, %v643_v48  ;;  %v538_v7 = vsel %vm477_vm2, %v520_v55, 0.0 }
  0xf5   :  { %v250_v56 = vpop.f32.mrf.mxu0  ;;  %v859_v57 = vpop.f32.mrf.mxu1  ;;  %v539_v20 = vadd.f32 %v538_v7, %v537_v14 }
  0xf6   :  { %v636_v60 = vpack.c.bf16 %v250_v56, %v250_v56  ;;  %v644_v61 = vpack.c.bf16 %v859_v57, %v859_v57  ;;  %v521_v4 = vmul.f32 %v250_v56, %v250_v56  ;;  %v485_v10 = vsel %vm477_vm2, %v250_v56, 0.0 }
  0xf7   :  { %v252_v63 = vpop.f32.mrf.mxu0  ;;  %v284_v0 = vpop.f32.mrf.mxu1  ;;  %v486_v21 = vadd.f32 %v485_v10, %v484_v15  ;;  %v548_v56 = vsel %vm477_vm2, %v525_v36, 0.0  ;;  %v529_v3 = vmul.f32 %v859_v57, %v859_v57  ;;  %v501_v39 = vsel %vm477_vm2, %v859_v57, 0.0 }
  0xf8   :  { %366 = vst.msk [vmem:[%s955_s2 + $0x10] sm:$0xf] %vm361_vm1, %v636_v60  ;;  %374 = vst.msk [vmem:[%s955_s2 + $0x30] sm:$0xf] %vm361_vm1, %v644_v61  ;;  %v540_v18 = vsel %vm477_vm2, %v521_v4, 0.0  ;;  %v550_v61 = vsel %vm477_vm2, %v526_v52, 0.0  ;;  %v528_v63 = vmul.f32 %v845_v45, %v845_v45 }
  0xf9   :  { %v253_v8 = vpop.f32.mrf.mxu0  ;;  %v877_v9 = vpop.f32.mrf.mxu1  ;;  %v541_v30 = vadd.f32 %v540_v18, %v539_v20 }
  0xfa   :  { %v637_v11 = vpack.c.bf16 %v253_v8, %v253_v8  ;;  %v522_v12 = vmul.f32 %v253_v8, %v253_v8  ;;  %v645_v13 = vpack.c.bf16 %v877_v9, %v877_v9  ;;  %v487_v19 = vsel %vm477_vm2, %v253_v8, 0.0 }
  0xfb   :  { %v255_v16 = vpop.f32.mrf.mxu0  ;;  %v287_v17 = vpop.f32.mrf.mxu1  ;;  %v488_v31 = vadd.f32 %v487_v19, %v486_v21  ;;  %v554_v6 = vsel %vm477_vm2, %v528_v63, 0.0  ;;  %v530_v7 = vmul.f32 %v877_v9, %v877_v9  ;;  %v503_v45 = vsel %vm477_vm2, %v877_v9, 0.0 }
  0xfc   :  { %367 = vst.msk [vmem:[%s955_s2 + $0x14] sm:$0xf] %vm361_vm1, %v637_v11  ;;  %375 = vst.msk [vmem:[%s955_s2 + $0x34] sm:$0xf] %vm361_vm1, %v645_v13  ;;  %v542_v22 = vsel %vm477_vm2, %v522_v12, 0.0  ;;  %v556_v11 = vsel %vm477_vm2, %v529_v3, 0.0 }
  0xfd   :  { %v258_v23 = vpop.f32.mrf.mxu0  ;;  %v290_v24 = vpop.f32.mrf.mxu1  ;;  %v543_v37 = vadd.f32 %v542_v22, %v541_v30  ;;  %v558_v15 = vsel %vm477_vm2, %v530_v7, 0.0 }
  0xfe   :  { %v638_v25 = vpack.c.bf16 %v258_v23, %v258_v23  ;;  %v489_v26 = vsel %vm477_vm2, %v258_v23, 0.0  ;;  %v523_v28 = vmul.f32 %v258_v23, %v258_v23  ;;  %v646_v29 = vpack.c.bf16 %v290_v24, %v290_v24 }
  0xff   :  { %v260_v32 = vpop.f32.mrf.mxu0  ;;  %v292_v34 = vpop.f32.mrf.mxu1  ;;  %v490_v38 = vadd.f32 %v489_v26, %v488_v31  ;;  %v531_v12 = vmul.f32 %v290_v24, %v290_v24  ;;  %v505_v16 = vsel %vm477_vm2, %v290_v24, 0.0 }
 0x100   :  { %368 = vst.msk [vmem:[%s955_s2 + $0x18] sm:$0xf] %vm361_vm1, %v638_v25  ;;  %v544_v35 = vsel %vm477_vm2, %v523_v28, 0.0  ;;  %376 = vst.msk [vmem:[%s955_s2 + $0x38] sm:$0xf] %vm361_vm1, %v646_v29 }
 0x101   :  { %v261_v40 = vpop.f32.mrf.mxu0  ;;  %v293_v41 = vpop.f32.mrf.mxu1  ;;  %v545_v47 = vadd.f32 %v544_v35, %v543_v37  ;;  %v560_v19 = vsel %vm477_vm2, %v531_v12, 0.0 }
 0x102   :  { %v639_v42 = vpack.c.bf16 %v261_v40, %v261_v40  ;;  %v491_v43 = vsel %vm477_vm2, %v261_v40, 0.0  ;;  %v524_v44 = vmul.f32 %v261_v40, %v261_v40  ;;  %v647_v46 = vpack.c.bf16 %v293_v41, %v293_v41 }
 0x103   :  { %v492_v48 = vadd.f32 %v491_v43, %v490_v38  ;;  %v263_v49 = vpop.f32.mrf.mxu0  ;;  %v295_v50 = vpop.f32.mrf.mxu1  ;;  %v532_v17 = vmul.f32 %v293_v41, %v293_v41  ;;  %v507_v20 = vsel %vm477_vm2, %v293_v41, 0.0 }
 0x104   :  { %369 = vst.msk [vmem:[%s955_s2 + $0x1c] sm:$0xf] %vm361_vm1, %v639_v42  ;;  %v546_v53 = vsel %vm477_vm2, %v524_v44, 0.0  ;;  %377 = vst.msk [vmem:[%s955_s2 + $0x3c] sm:$0xf] %vm361_vm1, %v647_v46 }
 0x105   :  { %v494_v54 = vadd.f32 %v493_v51, %v492_v48  ;;  %v547_v55 = vadd.f32 %v546_v53, %v545_v47  ;;  %v562_v23 = vsel %vm477_vm2, %v532_v17, 0.0 }
 0x107   :  { %v496_v59 = vadd.f32 %v495_v27, %v494_v54  ;;  %v549_v60 = vadd.f32 %v548_v56, %v547_v55 }
 0x109   :  { %v551_v0 = vadd.f32 %v550_v61, %v549_v60  ;;  %v498_v1 = vadd.f32 %v497_v62, %v496_v59 }
 0x10b   :  { %v500_v4 = vadd.f32 %v499_v33, %v498_v1  ;;  %v553_v5 = vadd.f32 %v552_v2, %v551_v0 }
 0x10d   :  { %v502_v8 = vadd.f32 %v501_v39, %v500_v4  ;;  %v555_v10 = vadd.f32 %v554_v6, %v553_v5 }
 0x10f   :  { %v504_v13 = vadd.f32 %v503_v45, %v502_v8  ;;  %v557_v14 = vadd.f32 %v556_v11, %v555_v10 }
 0x111   :  { %v559_v18 = vadd.f32 %v558_v15, %v557_v14  ;;  %v506_v57 = vadd.f32 %v505_v16, %v504_v13 }
 0x113   :  { %v561_v21 = vadd.f32 %v560_v19, %v559_v18  ;;  %v508_v22 = vadd.f32 %v507_v20, %v506_v57 }
 0x115   :  { %v509_v25 = vrot.slane %v508_v22, 4  ;;  %v563_v9 = vadd.f32 %v562_v23, %v561_v21 }
 0x117   :  { %v510_v26 = vadd.f32 %v509_v25, %v508_v22  ;;  %v564_v28 = vrot.slane %v563_v9, 4 }
 0x119   :  { %v511_v29 = vrot.slane %v510_v26, 2  ;;  %v565_v30 = vadd.f32 %v564_v28, %v563_v9 }
 0x11b   :  { %v512_v31 = vadd.f32 %v511_v29, %v510_v26  ;;  %v566_v32 = vrot.slane %v565_v30, 2 }
 0x11d   :  { %v513_v24 = vrot.slane %v512_v31, 1  ;;  %v567_v34 = vadd.f32 %v566_v32, %v565_v30 }
 0x11f   :  { %v514_v35 = vadd.f32 %v513_v24, %v512_v31  ;;  %v568_v36 = vrot.slane %v567_v34, 1 }
 0x121   :  { %516 = vst.msk [vmem:[%s956_s3] sm:$0x1] %vm515_vm3, %v514_v35  ;;  %v569_v37 = vadd.f32 %v568_v36, %v567_v34 }
 0x123   :  { %570 = vst.msk [vmem:[%s957_s4] sm:$0x1] %vm515_vm3, %v569_v37 }

// kernel: tile.23
= control target key start
LH: loop header
LB: loop body
LE: loop exit
PB: predicated region body
PF: predicated region fallthrough
CT: control target
= control target key end

     0   :  { %s22_s0 = inlined_call_operand.vmem [shape: f32[16], index: 0, kind: input, shape index: {}]   ;;  %s23_s1 = inlined_call_operand.vmem [shape: f32[4,16], index: 1, kind: output, shape index: {}]  }
   0x1   :  { %v4_v0 = vld [vmem:[%s22_s0] ss:$0 sm:$0xff] }
   0x2   :  { %5 = vst [vmem:[%s23_s1] sm:$0xf] %v4_v0 }

// kernel: tile.28
= control target key start
LH: loop header
LB: loop body
LE: loop exit
PB: predicated region body
PF: predicated region fallthrough
CT: control target
= control target key end

     0   :  { %vm8_vm0 = vcmask 130048   ;;  %s40_s8 = smov 16   ;;  %s41_s9 = smov 32   ;;  %vm14_vm1 = vcmask 523648   ;;  %vm20_vm2 = vcmask 392448   ;;  %vm26_vm3 = vcmask 261248   ;;  %s58_s0 = inlined_call_operand.vmem [shape: f32[4,16], index: 0, kind: input, shape index: {}]   ;;  %s59_s1 = inlined_call_operand.vmem [shape: f32[1,64], index: 1, kind: output, shape index: {}]  }
   0x1   :  { %v5_v0 = vld [vmem:[%s58_s0] sm:$0xf]  ;;  %s39_s0 = smov 48  }
   0x2   :  { %6 = vst [vmem:[#allocation1] sm:$0xf] %v5_v0 }
   0x9   :  { %v11_v1 = vld [vmem:[#allocation1 + $0x3] sm:$0x1]   ;;  %v23_v2 = vld [vmem:[#allocation1 + $0x1] sm:$0x1]   ;;  %v7_v3 = vld [vmem:[#allocation1] sm:$0x1]  }
   0xa   :  { %12 = vrot.lane.b32.xlu0 %v11_v1, %s39_s0  ;;  %24 = vrot.lane.b32.xlu1 %v23_v2, %s40_s8  ;;  %v17_v4 = vld [vmem:[#allocation1 + $0x2] sm:$0x1]   ;;  %9 = vst.msk [vmem:[#allocation0] sm:$0x1] %vm8_vm0, %v7_v3  }
   0xe   :  { %18 = vrot.lane.b32.xlu0 %v17_v4, %s41_s9 }
  0x7c   :  { %v13_v5 = vpop.permute.xlu0 %12   ;;  %v25_v6 = vpop.permute.xlu1 %24  }
  0x7d   :  { %15 = vst.msk [vmem:[#allocation0] sm:$0x1] %vm14_vm1, %v13_v5  }
  0x80   :  { %v19_v7 = vpop.permute.xlu0 %18  }
  0x81   :  { %21 = vst.msk [vmem:[#allocation0] sm:$0x1] %vm20_vm2, %v19_v7  }
  0x82   :  { %27 = vst.msk [vmem:[#allocation0] sm:$0x1] %vm26_vm3, %v25_v6  }
  0x89   :  { %v32_v8 = vld [vmem:[#allocation0] sm:$0x1] }
  0x8a   :  { %35 = vst [vmem:[%s59_s1] sm:$0x1] %v32_v8 }

// kernel: feedback_block_forward.19
= control target key start
LH: loop header
LB: loop body
LE: loop exit
PB: predicated region body
PF: predicated region fallthrough
CT: control target
= control target key end

     0   :  { %vm204_vm0 = vcmask 519168   ;;  %s448_s0 = inlined_call_operand.vmem [shape: bf16[128,64], index: 0, kind: input, shape index: {}]   ;;  %s449_s1 = inlined_call_operand.vmem [shape: f32[1,64], index: 1, kind: input, shape index: {}]   ;;  %s450_s2 = inlined_call_operand.vmem [shape: f32[1,64], index: 2, kind: input, shape index: {}]   ;;  %s451_s3 = inlined_call_operand.vmem [shape: bf16[128,64], index: 3, kind: output, shape index: {}]  }
   0x1   :  { %v260_v0 = vld [vmem:[%s448_s0] sm:$0xff]   ;;  %v291_v4 = vld [vmem:[%s448_s0 + $0x8] sm:$0xff]   ;;  %v292_v5 = vld [vmem:[%s448_s0 + $0x10] sm:$0xff]  }
   0x2   :  { %v324_v1 = vld [vmem:[%s449_s1] ss:$0 sm:$0xff]  ;;  %v261_v2 = vunpack.c.l.bf16 %v260_v0  ;;  %v262_v3 = vunpack.c.h.bf16 %v260_v0  ;;  %v293_v6 = vld [vmem:[%s448_s0 + $0x18] sm:$0xff]   ;;  %v265_v8 = vunpack.c.l.bf16 %v291_v4  ;;  %v266_v9 = vunpack.c.h.bf16 %v291_v4  ;;  %v295_v40 = vld [vmem:[%s448_s0 + $0x28] sm:$0xff]  }
   0x3   :  { %v338_v7 = vld [vmem:[%s450_s2] ss:$0 sm:$0xff]  ;;  %v269_v10 = vunpack.c.l.bf16 %v292_v5  ;;  %v270_v11 = vunpack.c.h.bf16 %v292_v5  ;;  %v273_v14 = vunpack.c.l.bf16 %v293_v6  ;;  %v274_v15 = vunpack.c.h.bf16 %v293_v6  ;;  %v296_v52 = vld [vmem:[%s448_s0 + $0x30] sm:$0xff]  }
   0x4   :  { %v53_v12 = vmul.f32 %v261_v2, %v324_v1  ;;  %v54_v13 = vmul.f32 %v262_v3, %v324_v1  ;;  %v55_v16 = vmul.f32 %v265_v8, %v324_v1  ;;  %v56_v17 = vmul.f32 %v266_v9, %v324_v1  ;;  %v294_v39 = vld [vmem:[%s448_s0 + $0x20] sm:$0xff]  }
   0x5   :  { %v57_v18 = vmul.f32 %v269_v10, %v324_v1  ;;  %v58_v19 = vmul.f32 %v270_v11, %v324_v1  ;;  %v59_v22 = vmul.f32 %v273_v14, %v324_v1  ;;  %v60_v23 = vmul.f32 %v274_v15, %v324_v1 }
   0x6   :  { %v76_v20 = vadd.f32 %v338_v7, %v53_v12  ;;  %v77_v21 = vadd.f32 %v338_v7, %v54_v13  ;;  %v78_v24 = vadd.f32 %v338_v7, %v55_v16  ;;  %v79_v25 = vadd.f32 %v338_v7, %v56_v17  ;;  %v297_v17 = vld [vmem:[%s448_s0 + $0x38] sm:$0xff]  }
   0x7   :  { %v80_v26 = vadd.f32 %v338_v7, %v57_v18  ;;  %v81_v27 = vadd.f32 %v338_v7, %v58_v19  ;;  %v82_v46 = vadd.f32 %v338_v7, %v59_v22  ;;  %v83_v47 = vadd.f32 %v338_v7, %v60_v23 }
   0x8   :  { %vm92_vm1 = vcmp.gt.f32.partialorder %v76_v20, 0.0  ;;  %v108_v28 = vmul.f32 0.0, %v76_v20  ;;  %vm93_vm2 = vcmp.gt.f32.partialorder %v77_v21, 0.0  ;;  %v109_v29 = vmul.f32 0.0, %v77_v21 }
   0x9   :  { %vm94_vm3 = vcmp.gt.f32.partialorder %v78_v24, 0.0  ;;  %v110_v30 = vmul.f32 0.0, %v78_v24  ;;  %vm95_vm4 = vcmp.gt.f32.partialorder %v79_v25, 0.0  ;;  %v111_v31 = vmul.f32 0.0, %v79_v25 }
   0xa   :  { %v124_v32 = vsel %vm92_vm1, %v76_v20, %v108_v28  ;;  %v125_v33 = vsel %vm93_vm2, %v77_v21, %v109_v29  ;;  %vm96_vm5 = vcmp.gt.f32.partialorder %v80_v26, 0.0  ;;  %v112_v34 = vmul.f32 0.0, %v80_v26 }
   0xb   :  { %v243_v35 = vpack.c.bf16 %v124_v32, %v124_v32  ;;  %v244_v36 = vpack.c.bf16 %v125_v33, %v125_v33  ;;  %v126_v37 = vsel %vm94_vm3, %v78_v24, %v110_v30  ;;  %v127_v38 = vsel %vm95_vm4, %v79_v25, %v111_v31 }
   0xc   :  { %v245_v41 = vpack.c.bf16 %v126_v37, %v126_v37  ;;  %v246_v42 = vpack.c.bf16 %v127_v38, %v127_v38  ;;  %v128_v43 = vsel %vm96_vm5, %v80_v26, %v112_v34  ;;  %vm97_vm6 = vcmp.gt.f32.partialorder %v81_v27, 0.0 }
   0xd   :  { %205 = vst.msk [vmem:[%s451_s3] sm:$0xf] %vm204_vm0, %v243_v35  ;;  %206 = vst.msk [vmem:[%s451_s3 + $0x4] sm:$0xf] %vm204_vm0, %v244_v36  ;;  %v247_v44 = vpack.c.bf16 %v128_v43, %v128_v43  ;;  %v113_v45 = vmul.f32 0.0, %v81_v27  ;;  %v277_v48 = vunpack.c.l.bf16 %v294_v39  ;;  %v278_v49 = vunpack.c.h.bf16 %v294_v39 }
   0xe   :  { %207 = vst.msk [vmem:[%s451_s3 + $0x8] sm:$0xf] %vm204_vm0, %v245_v41  ;;  %208 = vst.msk [vmem:[%s451_s3 + $0xc] sm:$0xf] %vm204_vm0, %v246_v42  ;;  %v281_v50 = vunpack.c.l.bf16 %v295_v40  ;;  %v282_v51 = vunpack.c.h.bf16 %v295_v40  ;;  %vm98_vm7 = vcmp.gt.f32.partialorder %v82_v46, 0.0  ;;  %v114_v54 = vmul.f32 0.0, %v82_v46 }
   0xf   :  { %209 = vst.msk [vmem:[%s451_s3 + $0x10] sm:$0xf] %vm204_vm0, %v247_v44  ;;  %v129_v53 = vsel %vm97_vm6, %v81_v27, %v113_v45  ;;  %vm99_vm8 = vcmp.gt.f32.partialorder %v83_v47, 0.0  ;;  %v115_v56 = vmul.f32 0.0, %v83_v47  ;;  %v61_v57 = vmul.f32 %v277_v48, %v324_v1 }
  0x10   :  { %v248_v55 = vpack.c.bf16 %v129_v53, %v129_v53  ;;  %v62_v58 = vmul.f32 %v278_v49, %v324_v1  ;;  %v130_v59 = vsel %vm98_vm7, %v82_v46, %v114_v54  ;;  %v63_v60 = vmul.f32 %v281_v50, %v324_v1 }
  0x11   :  { %v64_v61 = vmul.f32 %v282_v51, %v324_v1  ;;  %v285_v62 = vunpack.c.l.bf16 %v296_v52  ;;  %v249_v63 = vpack.c.bf16 %v130_v59, %v130_v59  ;;  %v131_v0 = vsel %vm99_vm8, %v83_v47, %v115_v56 }
  0x12   :  { %210 = vst.msk [vmem:[%s451_s3 + $0x14] sm:$0xf] %vm204_vm0, %v248_v55  ;;  %v84_v2 = vadd.f32 %v338_v7, %v61_v57  ;;  %v85_v3 = vadd.f32 %v338_v7, %v62_v58  ;;  %v250_v4 = vpack.c.bf16 %v131_v0, %v131_v0  ;;  %v86_v5 = vadd.f32 %v338_v7, %v63_v60 }
  0x13   :  { %v87_v6 = vadd.f32 %v338_v7, %v64_v61  ;;  %v65_v8 = vmul.f32 %v285_v62, %v324_v1  ;;  %211 = vst.msk [vmem:[%s451_s3 + $0x18] sm:$0xf] %vm204_vm0, %v249_v63  ;;  %v286_v16 = vunpack.c.h.bf16 %v296_v52  ;;  %v289_v26 = vunpack.c.l.bf16 %v297_v17 }
  0x14   :  { %vm100_vm9 = vcmp.gt.f32.partialorder %v84_v2, 0.0  ;;  %v116_v9 = vmul.f32 0.0, %v84_v2  ;;  %vm101_vm10 = vcmp.gt.f32.partialorder %v85_v3, 0.0  ;;  %v117_v10 = vmul.f32 0.0, %v85_v3  ;;  %212 = vst.msk [vmem:[%s451_s3 + $0x1c] sm:$0xf] %vm204_vm0, %v250_v4 }
  0x15   :  { %vm102_vm11 = vcmp.gt.f32.partialorder %v86_v5, 0.0  ;;  %v118_v11 = vmul.f32 0.0, %v86_v5  ;;  %vm103_vm12 = vcmp.gt.f32.partialorder %v87_v6, 0.0  ;;  %v119_v12 = vmul.f32 0.0, %v87_v6 }
  0x16   :  { %v132_v13 = vsel %vm100_vm9, %v84_v2, %v116_v9  ;;  %v133_v14 = vsel %vm101_vm10, %v85_v3, %v117_v10  ;;  %v88_v15 = vadd.f32 %v338_v7, %v65_v8  ;;  %v66_v25 = vmul.f32 %v286_v16, %v324_v1 }
  0x17   :  { %v251_v18 = vpack.c.bf16 %v132_v13, %v132_v13  ;;  %v252_v19 = vpack.c.bf16 %v133_v14, %v133_v14  ;;  %v134_v20 = vsel %vm102_vm11, %v86_v5, %v118_v11  ;;  %v135_v21 = vsel %vm103_vm12, %v87_v6, %v119_v12 }
  0x18   :  { %v253_v22 = vpack.c.bf16 %v134_v20, %v134_v20  ;;  %v254_v23 = vpack.c.bf16 %v135_v21, %v135_v21  ;;  %vm104_vm13 = vcmp.gt.f32.partialorder %v88_v15, 0.0  ;;  %v120_v24 = vmul.f32 0.0, %v88_v15 }
  0x19   :  { %213 = vst.msk [vmem:[%s451_s3 + $0x20] sm:$0xf] %vm204_vm0, %v251_v18  ;;  %214 = vst.msk [vmem:[%s451_s3 + $0x24] sm:$0xf] %vm204_vm0, %v252_v19  ;;  %v290_v27 = vunpack.c.h.bf16 %v297_v17  ;;  %v89_v30 = vadd.f32 %v338_v7, %v66_v25  ;;  %v67_v31 = vmul.f32 %v289_v26, %v324_v1 }
  0x1a   :  { %215 = vst.msk [vmem:[%s451_s3 + $0x28] sm:$0xf] %vm204_vm0, %v253_v22  ;;  %216 = vst.msk [vmem:[%s451_s3 + $0x2c] sm:$0xf] %vm204_vm0, %v254_v23  ;;  %v136_v28 = vsel %vm104_vm13, %v88_v15, %v120_v24 }
  0x1b   :  { %v255_v29 = vpack.c.bf16 %v136_v28, %v136_v28  ;;  %v68_v32 = vmul.f32 %v290_v27, %v324_v1  ;;  %vm105_vm14 = vcmp.gt.f32.partialorder %v89_v30, 0.0  ;;  %v121_v33 = vmul.f32 0.0, %v89_v30 }
  0x1c   :  { %v90_v34 = vadd.f32 %v338_v7, %v67_v31 }
  0x1d   :  { %217 = vst.msk [vmem:[%s451_s3 + $0x30] sm:$0xf] %vm204_vm0, %v255_v29  ;;  %v91_v35 = vadd.f32 %v338_v7, %v68_v32  ;;  %v137_v36 = vsel %vm105_vm14, %v89_v30, %v121_v33 }
  0x1e   :  { %vm106_vm15 = vcmp.gt.f32.partialorder %v90_v34, 0.0  ;;  %v122_v37 = vmul.f32 0.0, %v90_v34  ;;  %v256_v38 = vpack.c.bf16 %v137_v36, %v137_v36 }
  0x1f   :  { %vm107_vm1 = vcmp.gt.f32.partialorder %v91_v35, 0.0  ;;  %v123_v39 = vmul.f32 0.0, %v91_v35 }
  0x20   :  { %v138_v40 = vsel %vm106_vm15, %v90_v34, %v122_v37  ;;  %218 = vst.msk [vmem:[%s451_s3 + $0x34] sm:$0xf] %vm204_vm0, %v256_v38 }
  0x21   :  { %v257_v1 = vpack.c.bf16 %v138_v40, %v138_v40  ;;  %v139_v41 = vsel %vm107_vm1, %v91_v35, %v123_v39 }
  0x22   :  { %v258_v42 = vpack.c.bf16 %v139_v41, %v139_v41 }
  0x23   :  { %219 = vst.msk [vmem:[%s451_s3 + $0x38] sm:$0xf] %vm204_vm0, %v257_v1 }
  0x24   :  { %220 = vst.msk [vmem:[%s451_s3 + $0x3c] sm:$0xf] %vm204_vm0, %v258_v42 }

// kernel: feedback_block_forward.20
= control target key start
LH: loop header
LB: loop body
LE: loop exit
PB: predicated region body
PF: predicated region fallthrough
CT: control target
= control target key end

     0   :  { %vm551_vm0 = vcmask 523264   ;;  %vm931_vm1 = vcmask 125952   ;;  %vm1047_vm2 = vcmask 130048   ;;  %vm1085_vm3 = vcmask 122880   ;;  %s2016_s1 = inlined_call_operand.vmem [shape: bf16[576,16], index: 1, kind: input, shape index: {}]   ;;  %s2017_s0 = inlined_call_operand.vmem [shape: bf16[128,576], index: 0, kind: input, shape index: {}]   ;;  %s2018_s2 = inlined_call_operand.vmem [shape: bf16[128,16], index: 2, kind: output, shape index: {0}]   ;;  %s2019_s3 = inlined_call_operand.vmem [shape: f32[1,1,16], index: 3, kind: output, shape index: {1}]   ;;  %s2020_s4 = inlined_call_operand.vmem [shape: f32[1,1,16], index: 4, kind: output, shape index: {2}]  }
   0x1   :  { %v1441_v0 = vld [vmem:[%s2016_s1 + $0x78] sm:$0xff]   ;;  %v1445_v4 = vld [vmem:[%s2016_s1 + $0x70] sm:$0xff]   ;;  %v1449_v8 = vld [vmem:[%s2016_s1 + $0x68] sm:$0xff]  }
   0x2   :  { %v1442_v1 = vld [vmem:[%s2016_s1 + $0xf8] sm:$0xff]   ;;  %1269 = vmatprep.subr.bf16.mxu0 %v1441_v0  ;;  %v1446_v5 = vld [vmem:[%s2016_s1 + $0xf0] sm:$0xff]   ;;  %v1450_v9 = vld [vmem:[%s2016_s1 + $0xe8] sm:$0xff]  }
   0x3   :  { %v1443_v2 = vld [vmem:[%s2016_s1 + $0x38] sm:$0xff]   ;;  %1333 = vmatprep.subr.bf16.mxu1 %v1442_v1  ;;  %v1447_v6 = vld [vmem:[%s2016_s1 + $0x30] sm:$0xff]   ;;  %v1451_v10 = vld [vmem:[%s2016_s1 + $0x28] sm:$0xff]  }
   0x4   :  { %v1444_v3 = vld [vmem:[%s2016_s1 + $0xb8] sm:$0xff]   ;;  %1270 = vmatpush3.bf16.msra.mxu0 %v1443_v2  ;;  %v1448_v7 = vld [vmem:[%s2016_s1 + $0xb0] sm:$0xff]   ;;  %v1452_v11 = vld [vmem:[%s2016_s1 + $0xa8] sm:$0xff]  }
   0x5   :  { %1334 = vmatpush3.bf16.msra.mxu1 %v1444_v3  ;;  %1271 = vmatprep.subr.bf16.mxu0 %v1445_v4  ;;  %v1453_v12 = vld [vmem:[%s2016_s1 + $0x60] sm:$0xff]   ;;  %v1457_v16 = vld [vmem:[%s2016_s1 + $0x58] sm:$0xff]   ;;  %v1461_v20 = vld [vmem:[%s2016_s1 + $0x50] sm:$0xff]  }
   0x6   :  { %1335 = vmatprep.subr.bf16.mxu1 %v1446_v5  ;;  %v1454_v13 = vld [vmem:[%s2016_s1 + $0xe0] sm:$0xff]   ;;  %v1458_v17 = vld [vmem:[%s2016_s1 + $0xd8] sm:$0xff]   ;;  %v1462_v21 = vld [vmem:[%s2016_s1 + $0xd0] sm:$0xff]  }
   0x7   :  { %v1455_v14 = vld [vmem:[%s2016_s1 + $0x20] sm:$0xff]   ;;  %v1459_v18 = vld [vmem:[%s2016_s1 + $0x18] sm:$0xff]   ;;  %v1463_v22 = vld [vmem:[%s2016_s1 + $0x10] sm:$0xff]  }
   0x8   :  { %1272 = vmatpush3.bf16.msra.mxu0 %v1447_v6  ;;  %v1456_v15 = vld [vmem:[%s2016_s1 + $0xa0] sm:$0xff]   ;;  %v1460_v19 = vld [vmem:[%s2016_s1 + $0x98] sm:$0xff]   ;;  %v1464_v23 = vld [vmem:[%s2016_s1 + $0x90] sm:$0xff]  }
   0x9   :  { %1336 = vmatpush3.bf16.msra.mxu1 %v1448_v7  ;;  %1273 = vmatprep.subr.bf16.mxu0 %v1449_v8  ;;  %v1465_v24 = vld [vmem:[%s2016_s1 + $0x48] sm:$0xff]   ;;  %v1469_v28 = vld [vmem:[%s2016_s1 + $0x40] sm:$0xff]   ;;  %v1479_v36 = vld [vmem:[%s2016_s1 + $0x118] sm:$0xff]  }
   0xa   :  { %1337 = vmatprep.subr.bf16.mxu1 %v1450_v9  ;;  %v1466_v25 = vld [vmem:[%s2016_s1 + $0xc8] sm:$0xff]   ;;  %v1470_v29 = vld [vmem:[%s2016_s1 + $0xc0] sm:$0xff]   ;;  %v1492_v42 = vld [vmem:[%s2016_s1 + $0x110] sm:$0xff]  }
   0xb   :  { %v1467_v26 = vld [vmem:[%s2016_s1 + $0x8] sm:$0xff]   ;;  %v1471_v30 = vld [vmem:[%s2016_s1] sm:$0xff]   ;;  %v1488_v43 = vld [vmem:[%s2017_s0 + $0x5c] ss:$20 sps:$4 sm:$0xff]  }
   0xc   :  { %1274 = vmatpush3.bf16.msra.mxu0 %v1451_v10  ;;  %v1468_v27 = vld [vmem:[%s2016_s1 + $0x88] sm:$0xff]   ;;  %v1472_v31 = vld [vmem:[%s2016_s1 + $0x80] sm:$0xff]   ;;  %v1493_v47 = vld [vmem:[%s2017_s0 + $0x7c] ss:$20 sps:$4 sm:$0xff]  }
   0xd   :  { %1338 = vmatpush3.bf16.msra.mxu1 %v1452_v11  ;;  %1275 = vmatprep.subr.bf16.mxu0 %v1453_v12  ;;  %v1473_v32 = vld [vmem:[%s2017_s0] ss:$20 sps:$4 sm:$0xff]   ;;  %v1475_v33 = vld [vmem:[%s2017_s0 + $0x4] ss:$20 sps:$4 sm:$0xff]   ;;  %v1476_v34 = vld [vmem:[%s2017_s0 + $0x8] ss:$20 sps:$4 sm:$0xff]  }
   0xe   :  { %1339 = vmatprep.subr.bf16.mxu1 %v1454_v13  ;;  %v1478_v35 = vld [vmem:[%s2017_s0 + $0xc] ss:$20 sps:$4 sm:$0xff]   ;;  %608 = vmatprep.mubr.bf16.mxu0 %v1475_v33  ;;  %v1482_v38 = vld [vmem:[%s2017_s0 + $0x34] ss:$20 sps:$4 sm:$0xff]   ;;  %v1485_v40 = vld [vmem:[%s2017_s0 + $0x30] ss:$20 sps:$4 sm:$0xff]  }
   0xf   :  { %705 = vmatprep.mubr.bf16.mxu1 %v1478_v35  ;;  %v1480_v37 = vld [vmem:[%s2017_s0 + $0x2c] ss:$20 sps:$4 sm:$0xff]   ;;  %v1484_v39 = vld [vmem:[%s2017_s0 + $0x28] ss:$20 sps:$4 sm:$0xff]   ;;  %v1490_v44 = vld [vmem:[%s2017_s0 + $0x50] ss:$20 sps:$4 sm:$0xff]  }
  0x10   :  { %1276 = vmatpush3.bf16.msra.mxu0 %v1455_v14  ;;  %v1486_v41 = vld [vmem:[%s2017_s0 + $0x54] ss:$20 sps:$4 sm:$0xff]   ;;  %v1491_v45 = vld [vmem:[%s2017_s0 + $0x58] ss:$20 sps:$4 sm:$0xff]   ;;  %v1518_v49 = vld [vmem:[%s2016_s1 + $0x100] sm:$0xff]  }
  0x11   :  { %1340 = vmatpush3.bf16.msra.mxu1 %v1456_v15  ;;  %1277 = vmatprep.subr.bf16.mxu0 %v1457_v16  ;;  %v1505_v46 = vld [vmem:[%s2016_s1 + $0x108] sm:$0xff]   ;;  %v1495_v48 = vld [vmem:[%s2017_s0 + $0x84] ss:$20 sps:$4 sm:$0xff]   ;;  %v1498_v51 = vld [vmem:[%s2017_s0 + $0x80] ss:$20 sps:$4 sm:$0xff]  }
  0x12   :  { %1341 = vmatprep.subr.bf16.mxu1 %v1458_v17  ;;  %v1497_v50 = vld [vmem:[%s2017_s0 + $0x78] ss:$20 sps:$4 sm:$0xff]   ;;  %v1503_v54 = vld [vmem:[%s2017_s0 + $0xa0] ss:$20 sps:$4 sm:$0xff]   ;;  %v1504_v55 = vld [vmem:[%s2017_s0 + $0xa8] ss:$20 sps:$4 sm:$0xff]  }
  0x13   :  { %v1499_v52 = vld [vmem:[%s2017_s0 + $0xa4] ss:$20 sps:$4 sm:$0xff]   ;;  %v1501_v53 = vld [vmem:[%s2017_s0 + $0xac] ss:$20 sps:$4 sm:$0xff]   ;;  %v1508_v57 = vld [vmem:[%s2017_s0 + $0xd4] ss:$20 sps:$4 sm:$0xff]  }
  0x14   :  { %1278 = vmatpush3.bf16.msra.mxu0 %v1459_v18  ;;  %v1506_v56 = vld [vmem:[%s2017_s0 + $0xcc] ss:$20 sps:$4 sm:$0xff]   ;;  %v1510_v58 = vld [vmem:[%s2017_s0 + $0xc8] ss:$20 sps:$4 sm:$0xff]   ;;  %v1511_v59 = vld [vmem:[%s2017_s0 + $0xd0] ss:$20 sps:$4 sm:$0xff]  }
  0x15   :  { %1342 = vmatpush3.bf16.msra.mxu1 %v1460_v19  ;;  %1279 = vmatprep.subr.bf16.mxu0 %v1461_v20  ;;  %v1512_v60 = vld [vmem:[%s2017_s0 + $0xf4] ss:$20 sps:$4 sm:$0xff]   ;;  %v1514_v61 = vld [vmem:[%s2017_s0 + $0xfc] ss:$20 sps:$4 sm:$0xff]   ;;  %v1517_v63 = vld [vmem:[%s2017_s0 + $0xf8] ss:$20 sps:$4 sm:$0xff]  }
  0x16   :  { %1343 = vmatprep.subr.bf16.mxu1 %v1462_v21  ;;  %v1516_v62 = vld [vmem:[%s2017_s0 + $0xf0] ss:$20 sps:$4 sm:$0xff]   ;;  %v1523_v2 = vld [vmem:[%s2017_s0 + $0x118] ss:$20 sps:$4 sm:$0xff]   ;;  %v1524_v3 = vld [vmem:[%s2017_s0 + $0x120] ss:$20 sps:$4 sm:$0xff]  }
  0x17   :  { %v1519_v0 = vld [vmem:[%s2017_s0 + $0x11c] ss:$20 sps:$4 sm:$0xff]   ;;  %v1521_v1 = vld [vmem:[%s2017_s0 + $0x124] ss:$20 sps:$4 sm:$0xff]   ;;  %v1529_v8 = vld [vmem:[%s2017_s0 + $0x60] ss:$20 sps:$4 sm:$0xff]  }
  0x18   :  { %1280 = vmatpush3.bf16.msra.mxu0 %v1463_v22  ;;  %v1525_v4 = vld [vmem:[%s2017_s0 + $0x10] ss:$20 sps:$4 sm:$0xff]   ;;  %v1527_v6 = vld [vmem:[%s2017_s0 + $0x38] ss:$20 sps:$4 sm:$0xff]   ;;  %v1530_v9 = vld [vmem:[%s2017_s0 + $0x100] ss:$20 sps:$4 sm:$0xff]  }
  0x19   :  { %1344 = vmatpush3.bf16.msra.mxu1 %v1464_v23  ;;  %1281 = vmatprep.subr.bf16.mxu0 %v1465_v24  ;;  %v1526_v5 = vld [vmem:[%s2017_s0 + $0xb0] ss:$20 sps:$4 sm:$0xff]   ;;  %v1528_v7 = vld [vmem:[%s2017_s0 + $0xd8] ss:$20 sps:$4 sm:$0xff]   ;;  %v1531_v10 = vld [vmem:[%s2017_s0 + $0x88] ss:$20 sps:$4 sm:$0xff]  }
  0x1a   :  { %1345 = vmatprep.subr.bf16.mxu1 %v1466_v25  ;;  %v1532_v11 = vld [vmem:[%s2017_s0 + $0x128] ss:$20 sps:$4 sm:$0xff]  }
  0x1c   :  { %1282 = vmatpush3.bf16.msra.mxu0 %v1467_v26 }
  0x1d   :  { %1346 = vmatpush3.bf16.msra.mxu1 %v1468_v27  ;;  %1283 = vmatprep.subr.bf16.mxu0 %v1469_v28 }
  0x1e   :  { %1347 = vmatprep.subr.bf16.mxu1 %v1470_v29 }
  0x20   :  { %1284 = vmatpush3.bf16.msra.mxu0 %v1471_v30 }
  0x21   :  { %1348 = vmatpush3.bf16.msra.mxu1 %v1472_v31  ;;  %1409 = vmatprep.subr.bf16.mxu0 %v1479_v36 }
  0x22   :  { %1433 = vmatprep.subr.bf16.mxu1 %v1479_v36 }
  0x23   :  { %609 = vmatmul.mubr.bf16.vlgmr.msra.gmra.mxu0 %v1473_v32 }
  0x24   :  { %706 = vmatmul.mubr.bf16.vlgmr.msra.gmra.mxu1 %v1476_v34  ;;  %1410 = vmatpush3.bf16.msra.mxu0 %v1479_v36 }
  0x25   :  { %616 = vmatprep.mubr.bf16.mxu0 %v1480_v37  ;;  %713 = vmatprep.mubr.bf16.mxu1 %v1482_v38 }
  0x26   :  { %1437 = vmatpush3.bf16.msra.mxu1 %v1479_v36  ;;  %1411 = vmatprep.subr.bf16.mxu0 %v1492_v42 }
  0x27   :  { %1434 = vmatprep.subr.bf16.mxu1 %v1492_v42 }
  0x28   :  { %1412 = vmatpush3.bf16.msra.mxu0 %v1492_v42 }
  0x29   :  { %1413 = vmatprep.subr.bf16.mxu0 %v1505_v46 }
  0x2a   :  { %1438 = vmatpush3.bf16.msra.mxu1 %v1492_v42 }
  0x2b   :  { %617 = vmatmul.mubr.bf16.gmra.mxu0 %v1484_v39  ;;  %1435 = vmatprep.subr.bf16.mxu1 %v1505_v46 }
  0x2c   :  { %714 = vmatmul.mubr.bf16.gmra.mxu1 %v1485_v40  ;;  %624 = vmatprep.mubr.bf16.mxu0 %v1486_v41 }
  0x2d   :  { %721 = vmatprep.mubr.bf16.mxu1 %v1488_v43  ;;  %1414 = vmatpush3.bf16.msra.mxu0 %v1505_v46 }
  0x2e   :  { %1439 = vmatpush3.bf16.msra.mxu1 %v1505_v46  ;;  %1415 = vmatprep.subr.bf16.mxu0 %v1518_v49 }
  0x2f   :  { %1436 = vmatprep.subr.bf16.mxu1 %v1518_v49 }
  0x31   :  { %1416 = vmatpush3.bf16.msra.mxu0 %v1518_v49 }
  0x32   :  { %1440 = vmatpush3.bf16.msra.mxu1 %v1518_v49 }
  0x33   :  { %625 = vmatmul.mubr.bf16.gmra.mxu0 %v1490_v44 }
  0x34   :  { %722 = vmatmul.mubr.bf16.gmra.mxu1 %v1491_v45  ;;  %632 = vmatprep.mubr.bf16.mxu0 %v1493_v47 }
  0x35   :  { %729 = vmatprep.mubr.bf16.mxu1 %v1495_v48 }
  0x3b   :  { %633 = vmatmul.mubr.bf16.gmra.mxu0 %v1497_v50 }
  0x3c   :  { %730 = vmatmul.mubr.bf16.gmra.mxu1 %v1498_v51  ;;  %640 = vmatprep.mubr.bf16.mxu0 %v1499_v52 }
  0x3d   :  { %737 = vmatprep.mubr.bf16.mxu1 %v1501_v53 }
  0x43   :  { %641 = vmatmul.mubr.bf16.gmra.mxu0 %v1503_v54 }
  0x44   :  { %738 = vmatmul.mubr.bf16.gmra.mxu1 %v1504_v55  ;;  %648 = vmatprep.mubr.bf16.mxu0 %v1506_v56 }
  0x45   :  { %745 = vmatprep.mubr.bf16.mxu1 %v1508_v57 }
  0x4b   :  { %649 = vmatmul.mubr.bf16.gmra.mxu0 %v1510_v58 }
  0x4c   :  { %746 = vmatmul.mubr.bf16.gmra.mxu1 %v1511_v59  ;;  %656 = vmatprep.mubr.bf16.mxu0 %v1512_v60 }
  0x4d   :  { %753 = vmatprep.mubr.bf16.mxu1 %v1514_v61 }
  0x53   :  { %657 = vmatmul.mubr.bf16.gmra.mxu0 %v1516_v62 }
  0x54   :  { %754 = vmatmul.mubr.bf16.gmra.mxu1 %v1517_v63  ;;  %664 = vmatprep.mubr.bf16.mxu0 %v1519_v0 }
  0x55   :  { %761 = vmatprep.mubr.bf16.mxu1 %v1521_v1 }
  0x5b   :  { %665 = vmatmul.mubr.bf16.gmra.mxu0 %v1523_v2 }
  0x5c   :  { %762 = vmatmul.mubr.bf16.gmra.mxu1 %v1524_v3  ;;  %1417 = vmatprep.mubr.msk.bf16.mxu0 %vm551_vm0, %v1525_v4 }
  0x5d   :  { %1425 = vmatprep.mubr.msk.bf16.mxu1 %vm551_vm0, %v1526_v5 }
  0x63   :  { %1418 = vmatmul.mubr.msk.bf16.vlgmr.msra.gmra.mxu0 %vm551_vm0, %v1527_v6 }
  0x64   :  { %1426 = vmatmul.mubr.msk.bf16.vlgmr.msra.gmra.mxu1 %vm551_vm0, %v1528_v7  ;;  %1421 = vmatprep.mubr.msk.bf16.mxu0 %vm551_vm0, %v1529_v8 }
  0x65   :  { %1429 = vmatprep.mubr.msk.bf16.mxu1 %vm551_vm0, %v1530_v9 }
  0x6b   :  { %1422 = vmatmul.mubr.msk.bf16.gmra.mxu0 %vm551_vm0, %v1531_v10 }
  0x6c   :  { %1430 = vmatmul.mubr.msk.bf16.gmra.mxu1 %vm551_vm0, %v1532_v11 }
  0xe3   :  { %v1285_v12 = vpop.f32.mrf.mxu0 }
  0xe4   :  { %v1349_v13 = vpop.f32.mrf.mxu1 }
  0xe5   :  { %v1286_v14 = vpop.f32.mrf.mxu0 }
  0xe6   :  { %v1350_v15 = vpop.f32.mrf.mxu1  ;;  %v1287_v6 = vadd.f32 %v1286_v14, %v1285_v12 }
  0xe7   :  { %v1288_v16 = vpop.f32.mrf.mxu0  ;;  %v1351_v7 = vadd.f32 %v1350_v15, %v1349_v13 }
  0xe8   :  { %v1352_v17 = vpop.f32.mrf.mxu1 }
  0xe9   :  { %v1289_v18 = vpop.f32.mrf.mxu0 }
  0xea   :  { %v1353_v19 = vpop.f32.mrf.mxu1  ;;  %v1290_v9 = vadd.f32 %v1289_v18, %v1288_v16 }
  0xeb   :  { %v1291_v20 = vpop.f32.mrf.mxu0  ;;  %v1354_v10 = vadd.f32 %v1353_v19, %v1352_v17  ;;  %v708_v17 = vadd.f32 %v1351_v7, %v1287_v6 }
  0xec   :  { %v1355_v21 = vpop.f32.mrf.mxu1 }
  0xed   :  { %v1292_v22 = vpop.f32.mrf.mxu0  ;;  %v711_v19 = vadd.f32 %v1354_v10, %v1290_v9 }
  0xee   :  { %v1356_v23 = vpop.f32.mrf.mxu1  ;;  %v1293_v11 = vadd.f32 %v1292_v22, %v1291_v20 }
  0xef   :  { %v1294_v24 = vpop.f32.mrf.mxu0 }
  0xf0   :  { %v1358_v25 = vpop.f32.mrf.mxu1 }
  0xf1   :  { %v1295_v26 = vpop.f32.mrf.mxu0 }
  0xf2   :  { %v1359_v27 = vpop.f32.mrf.mxu1 }
  0xf3   :  { %v1297_v28 = vpop.f32.mrf.mxu0 }
  0xf4   :  { %v1361_v29 = vpop.f32.mrf.mxu1 }
  0xf5   :  { %v1298_v30 = vpop.f32.mrf.mxu0 }
  0xf6   :  { %v1362_v31 = vpop.f32.mrf.mxu1 }
  0xf7   :  { %v1794_v32 = vpop.f32.mrf.mxu0 }
  0xf8   :  { %2021 = vst [vmem:[#allocation2_spill] sm:$0xff] %v1794_v32  ;;  %v1796_v33 = vpop.f32.mrf.mxu1 }
  0xf9   :  { %2022 = vst [vmem:[#allocation3_spill] sm:$0xff] %v1796_v33  ;;  %v1798_v34 = vpop.f32.mrf.mxu0 }
  0xfa   :  { %2023 = vst [vmem:[#allocation4_spill] sm:$0xff] %v1798_v34  ;;  %v1800_v35 = vpop.f32.mrf.mxu1 }
  0xfb   :  { %2024 = vst [vmem:[#allocation5_spill] sm:$0xff] %v1800_v35  ;;  %v1802_v36 = vpop.f32.mrf.mxu0 }
  0xfc   :  { %v1804_v37 = vpop.f32.mrf.mxu1 }
  0xfd   :  { %v1806_v38 = vpop.f32.mrf.mxu0 }
  0xfe   :  { %v1808_v39 = vpop.f32.mrf.mxu1 }
  0xff   :  { %v1810_v40 = vpop.f32.mrf.mxu0 }
 0x100   :  { %v1812_v41 = vpop.f32.mrf.mxu1 }
 0x101   :  { %v1814_v42 = vpop.f32.mrf.mxu0 }
 0x102   :  { %v1816_v43 = vpop.f32.mrf.mxu1 }
 0x103   :  { %v1309_v44 = vpop.f32.mrf.mxu0 }
 0x104   :  { %v1373_v45 = vpop.f32.mrf.mxu1 }
 0x105   :  { %v1310_v46 = vpop.f32.mrf.mxu0 }
 0x106   :  { %v1374_v47 = vpop.f32.mrf.mxu1 }
 0x107   :  { %v1312_v48 = vpop.f32.mrf.mxu0  ;;  %v1375_v32 = vadd.f32 %v1374_v47, %v1373_v45  ;;  %v1372_v47 = vadd.f32 %v1816_v43, %v1812_v41  ;;  %v2035_v41 = vld [vmem:[#allocation3_spill] sm:$0xff]  ;;  %v2036_v43 = vld [vmem:[#allocation5_spill] sm:$0xff] }
 0x108   :  { %v1376_v49 = vpop.f32.mrf.mxu1 }
 0x109   :  { %v1313_v50 = vpop.f32.mrf.mxu0 }
 0x10a   :  { %v1377_v51 = vpop.f32.mrf.mxu1 }
 0x10b   :  { %v1315_v52 = vpop.f32.mrf.mxu0 }
 0x10c   :  { %v1379_v53 = vpop.f32.mrf.mxu1 }
 0x10d   :  { %v1316_v54 = vpop.f32.mrf.mxu0 }
 0x10e   :  { %v1380_v55 = vpop.f32.mrf.mxu1  ;;  %v1317_v35 = vadd.f32 %v1316_v54, %v1315_v52  ;;  %v1866_v52 = vadd.f32 %v2036_v43, %v2035_v41 }
 0x10f   :  { %v1318_v56 = vpop.f32.mrf.mxu0 }
 0x110   :  { %v1382_v57 = vpop.f32.mrf.mxu1 }
 0x111   :  { %v1319_v58 = vpop.f32.mrf.mxu0 }
 0x112   :  { %v1383_v59 = vpop.f32.mrf.mxu1  ;;  %v1320_v20 = vadd.f32 %v1319_v58, %v1318_v56 }
 0x113   :  { %v1818_v60 = vpop.f32.mrf.mxu0 }
 0x114   :  { %2025 = vst [vmem:[#allocation6_spill] sm:$0xff] %v1818_v60  ;;  %v1820_v61 = vpop.f32.mrf.mxu1  ;;  %v1296_v60 = vadd.f32 %v1295_v26, %v1294_v24  ;;  %v1378_v26 = vadd.f32 %v1377_v51, %v1376_v49 }
 0x115   :  { %2026 = vst [vmem:[#allocation7_spill] sm:$0xff] %v1820_v61  ;;  %v1822_v62 = vpop.f32.mrf.mxu0  ;;  %v1357_v61 = vadd.f32 %v1356_v23, %v1355_v21  ;;  %v1384_v21 = vadd.f32 %v1383_v59, %v1382_v57 }
 0x116   :  { %2027 = vst [vmem:[#allocation8_spill] sm:$0xff] %v1822_v62  ;;  %v1824_v63 = vpop.f32.mrf.mxu1 }
 0x117   :  { %2028 = vst [vmem:[#allocation9_spill] sm:$0xff] %v1824_v63  ;;  %v1826_v0 = vpop.f32.mrf.mxu0  ;;  %v1360_v63 = vadd.f32 %v1359_v27, %v1358_v25  ;;  %v716_v14 = vadd.f32 %v1357_v61, %v1293_v11  ;;  %v1314_v25 = vadd.f32 %v1313_v50, %v1312_v48 }
 0x118   :  { %2029 = vst [vmem:[#allocation10_spill] sm:$0xff] %v1826_v0  ;;  %v1828_v1 = vpop.f32.mrf.mxu1  ;;  %v1381_v0 = vadd.f32 %v1380_v55, %v1379_v53 }
 0x119   :  { %2030 = vst [vmem:[#allocation11_spill] sm:$0xff] %v1828_v1  ;;  %v1830_v2 = vpop.f32.mrf.mxu0  ;;  %v1299_v1 = vadd.f32 %v1298_v30, %v1297_v28  ;;  %v719_v18 = vadd.f32 %v1360_v63, %v1296_v60  ;;  %v1305_v30 = vadd.f32 %v1806_v38, %v1802_v36  ;;  %v751_v38 = vadd.f32 %v1384_v21, %v1320_v20 }
 0x11a   :  { %2031 = vst [vmem:[#allocation12_spill] sm:$0xff] %v1830_v2  ;;  %v1832_v3 = vpop.f32.mrf.mxu1  ;;  %v1363_v2 = vadd.f32 %v1362_v31, %v1361_v29  ;;  %v748_v16 = vadd.f32 %v1381_v0, %v1317_v35  ;;  %v1369_v31 = vadd.f32 %v1808_v39, %v1804_v37  ;;  %v743_v55 = vadd.f32 %v1378_v26, %v1314_v25 }
 0x11b   :  { %2032 = vst [vmem:[#allocation13_spill] sm:$0xff] %v1832_v3  ;;  %v1327_v4 = vpop.f32.mrf.mxu0  ;;  %v1311_v3 = vadd.f32 %v1310_v46, %v1309_v44  ;;  %v1308_v46 = vadd.f32 %v1814_v42, %v1810_v40  ;;  %v2033_v40 = vld [vmem:[#allocation2_spill] sm:$0xff]  ;;  %v2034_v42 = vld [vmem:[#allocation4_spill] sm:$0xff] }
 0x11c   :  { %v1391_v5 = vpop.f32.mrf.mxu1  ;;  %v1840_v24 = vadd.f32 %v1363_v2, %v1299_v1  ;;  %v1862_v51 = vadd.f32 %v2034_v42, %v2033_v40  ;;  %v732_v60 = vadd.f32 %v1369_v31, %v1305_v30  ;;  %v2037_v61 = vld [vmem:[#allocation6_spill] sm:$0xff] }
 0x11d   :  { %v1328_v8 = vpop.f32.mrf.mxu0  ;;  %v740_v29 = vadd.f32 %v1375_v32, %v1311_v3  ;;  %v735_v3 = vadd.f32 %v1372_v47, %v1308_v46 }
 0x11e   :  { %v1392_v62 = vpop.f32.mrf.mxu1  ;;  %v1329_v50 = vadd.f32 %v1328_v8, %v1327_v4  ;;  %v2039_v4 = vld [vmem:[#allocation7_spill] sm:$0xff] }
 0x11f   :  { %v1834_v33 = vpop.f32.mrf.mxu0  ;;  %v1393_v36 = vadd.f32 %v1392_v62, %v1391_v5  ;;  %v2038_v62 = vld [vmem:[#allocation8_spill] sm:$0xff]  ;;  %v2040_v5 = vld [vmem:[#allocation9_spill] sm:$0xff] }
 0x120   :  { %v1836_v34 = vpop.f32.mrf.mxu1  ;;  %v1323_v63 = vadd.f32 %v2038_v62, %v2037_v61  ;;  %v1387_v6 = vadd.f32 %v2040_v5, %v2039_v4  ;;  %v2043_v47 = vld [vmem:[#allocation11_spill] sm:$0xff] }
 0x121   :  { %v1331_v12 = vpop.f32.mrf.mxu0  ;;  %v764_v9 = vadd.f32 %v1393_v36, %v1329_v50 }
 0x122   :  { %v1838_v13 = vpop.f32.mrf.mxu1  ;;  %v1332_v11 = vadd.f32 %v1331_v12, %v1834_v33 }
 0x123   :  { %v1419_v15 = vpop.f32.mrf.mxu0  ;;  %v1396_v21 = vadd.f32 %v1838_v13, %v1836_v34 }
 0x124   :  { %v813_v22 = vadd.f32 %v1419_v15, %v716_v14  ;;  %v1427_v23 = vpop.f32.mrf.mxu1 }
 0x125   :  { %v1842_v27 = vadd.f32 %v1427_v23, %v748_v16  ;;  %v804_v28 = vpop.f32.mrf.mxu0  ;;  %v767_v42 = vadd.f32 %v1396_v21, %v1332_v11 }
 0x126   :  { %v1255_v35 = vpack.c.bf16 %v813_v22, %v813_v22  ;;  %v805_v44 = vadd.f32 %v804_v28, %v708_v17  ;;  %v836_v45 = vpop.f32.mrf.mxu1  ;;  %v1051_v23 = vsel %vm1047_vm2, %v813_v22, 0.0 }
 0x127   :  { %v1263_v48 = vpack.c.bf16 %v1842_v27, %v1842_v27  ;;  %v1854_v49 = vadd.f32 %v836_v45, %v740_v29  ;;  %v1420_v32 = vpop.f32.mrf.mxu0  ;;  %v2042_v45 = vld [vmem:[#allocation12_spill] sm:$0xff] }
 0x128   :  { %934 = vst.msk [vmem:[%s2018_s2 + $0x8] sm:$0xf] %vm931_vm1, %v1255_v35  ;;  %v1253_v37 = vpack.c.bf16 %v805_v44, %v805_v44  ;;  %v1428_v39 = vpop.f32.mrf.mxu1  ;;  %v816_v56 = vadd.f32 %v1420_v32, %v719_v18  ;;  %v1087_v0 = vmul.f32 %v805_v44, %v805_v44  ;;  %v1048_v14 = vsel %vm1047_vm2, %v805_v44, 0.0  ;;  %v2041_v44 = vld [vmem:[#allocation10_spill] sm:$0xff] }
 0x129   :  { %942 = vst.msk [vmem:[%s2018_s2 + $0x28] sm:$0xf] %vm931_vm1, %v1263_v48  ;;  %v1261_v53 = vpack.c.bf16 %v1854_v49, %v1854_v49  ;;  %v807_v54 = vpop.f32.mrf.mxu0  ;;  %v1878_v57 = vadd.f32 %v1428_v39, %v751_v38  ;;  %v1089_v18 = vmul.f32 %v813_v22, %v813_v22  ;;  %v756_v35 = vadd.f32 %v1387_v6, %v1323_v63  ;;  %v2044_v48 = vld [vmem:[#allocation13_spill] sm:$0xff] }
 0x12a   :  { %932 = vst.msk [vmem:[%s2018_s2] sm:$0xf] %vm931_vm1, %v1253_v37  ;;  %v808_v58 = vadd.f32 %v807_v54, %v711_v19  ;;  %v839_v59 = vpop.f32.mrf.mxu1  ;;  %v1256_v7 = vpack.c.bf16 %v816_v56, %v816_v56  ;;  %v1103_v25 = vsel %vm1047_vm2, %v1087_v0, 0.0  ;;  %v1090_v13 = vmul.f32 %v816_v56, %v816_v56 }
 0x12b   :  { %940 = vst.msk [vmem:[%s2018_s2 + $0x20] sm:$0xf] %vm931_vm1, %v1261_v53  ;;  %v1886_v1 = vadd.f32 %v839_v59, %v743_v55  ;;  %v1423_v2 = vpop.f32.mrf.mxu0  ;;  %v1264_v8 = vpack.c.bf16 %v1878_v57, %v1878_v57  ;;  %v1326_v46 = vadd.f32 %v2042_v45, %v2041_v44  ;;  %v1390_v32 = vadd.f32 %v2044_v48, %v2043_v47 }
 0x12c   :  { %v1431_v10 = vpop.f32.mrf.mxu1  ;;  %v1254_v15 = vpack.c.bf16 %v808_v58, %v808_v58  ;;  %v1049_v16 = vsel %vm1047_vm2, %v808_v58, 0.0  ;;  %935 = vst.msk [vmem:[%s2018_s2 + $0xc] sm:$0xf] %vm931_vm1, %v1256_v7  ;;  %v1088_v20 = vmul.f32 %v808_v58, %v808_v58  ;;  %v829_v26 = vadd.f32 %v1423_v2, %v732_v60 }
 0x12d   :  { %v820_v17 = vpop.f32.mrf.mxu0  ;;  %943 = vst.msk [vmem:[%s2018_s2 + $0x2c] sm:$0xf] %vm931_vm1, %v1264_v8  ;;  %v1050_v19 = vadd.f32 %v1049_v16, %v1048_v14  ;;  %v1262_v33 = vpack.c.bf16 %v1886_v1, %v1886_v1  ;;  %v1918_v30 = vadd.f32 %v1431_v10, %v764_v9  ;;  %v1106_v50 = vsel %vm1047_vm2, %v1089_v18, 0.0 }
 0x12e   :  { %v852_v12 = vpop.f32.mrf.mxu1  ;;  %933 = vst.msk [vmem:[%s2018_s2 + $0x4] sm:$0xf] %vm931_vm1, %v1254_v15  ;;  %v1104_v29 = vsel %vm1047_vm2, %v1088_v20, 0.0  ;;  %v821_v34 = vadd.f32 %v820_v17, %v1840_v24  ;;  %v1259_v31 = vpack.c.bf16 %v829_v26, %v829_v26  ;;  %v1053_v39 = vsel %vm1047_vm2, %v816_v56, 0.0 }
 0x12f   :  { %v1052_v28 = vadd.f32 %v1051_v23, %v1050_v19  ;;  %941 = vst.msk [vmem:[%s2018_s2 + $0x24] sm:$0xf] %vm931_vm1, %v1262_v33  ;;  %v1105_v22 = vadd.f32 %v1104_v29, %v1103_v25  ;;  %v1267_v36 = vpack.c.bf16 %v1918_v30, %v1918_v30  ;;  %v1424_v37 = vpop.f32.mrf.mxu0  ;;  %v853_v43 = vadd.f32 %v852_v12, %v756_v35 }
 0x130   :  { %v1432_v38 = vpop.f32.mrf.mxu1  ;;  %938 = vst.msk [vmem:[%s2018_s2 + $0x18] sm:$0xf] %vm931_vm1, %v1259_v31  ;;  %v1257_v40 = vpack.c.bf16 %v821_v34, %v821_v34  ;;  %v1108_v53 = vsel %vm1047_vm2, %v1090_v13, 0.0  ;;  %v1091_v54 = vmul.f32 %v821_v34, %v821_v34  ;;  %v832_v55 = vadd.f32 %v1424_v37, %v735_v3 }
 0x131   :  { %v1107_v24 = vadd.f32 %v1106_v50, %v1105_v22  ;;  %946 = vst.msk [vmem:[%s2018_s2 + $0x38] sm:$0xf] %vm931_vm1, %v1267_v36  ;;  %v1054_v41 = vadd.f32 %v1053_v39, %v1052_v28  ;;  %v1942_v56 = vadd.f32 %v1432_v38, %v767_v42  ;;  %v1265_v59 = vpack.c.bf16 %v853_v43, %v853_v43  ;;  %v823_v60 = vpop.f32.mrf.mxu0 }
 0x132   :  { %936 = vst.msk [vmem:[%s2018_s2 + $0x10] sm:$0xf] %vm931_vm1, %v1257_v40  ;;  %v855_v61 = vpop.f32.mrf.mxu1  ;;  %v1055_v62 = vsel %vm1047_vm2, %v821_v34, 0.0  ;;  %v1260_v63 = vpack.c.bf16 %v832_v55, %v832_v55  ;;  %v727_v0 = vadd.f32 %v1866_v52, %v1862_v51  ;;  %v759_v2 = vadd.f32 %v1390_v32, %v1326_v46 }
 0x133   :  { %v1109_v58 = vadd.f32 %v1108_v53, %v1107_v24  ;;  %v1056_v4 = vadd.f32 %v1055_v62, %v1054_v41  ;;  %944 = vst.msk [vmem:[%s2018_s2 + $0x30] sm:$0xf] %vm931_vm1, %v1265_v59  ;;  %v1268_v3 = vpack.c.bf16 %v1942_v56, %v1942_v56  ;;  %v1110_v5 = vsel %vm1047_vm2, %v1091_v54, 0.0 }
 0x134   :  { %939 = vst.msk [vmem:[%s2018_s2 + $0x1c] sm:$0xf] %vm931_vm1, %v1260_v63  ;;  %v824_v6 = vadd.f32 %v823_v60, %v727_v0  ;;  %v856_v7 = vadd.f32 %v855_v61, %v759_v2  ;;  %v1093_v51 = vmul.f32 %v829_v26, %v829_v26  ;;  %v1059_v15 = vsel %vm1047_vm2, %v829_v26, 0.0 }
 0x135   :  { %v1111_v52 = vadd.f32 %v1110_v5, %v1109_v58  ;;  %947 = vst.msk [vmem:[%s2018_s2 + $0x3c] sm:$0xf] %vm931_vm1, %v1268_v3  ;;  %v1094_v16 = vmul.f32 %v832_v55, %v832_v55  ;;  %v1095_v20 = vmul.f32 %v1854_v49, %v1854_v49  ;;  %v1061_v12 = vsel %vm1047_vm2, %v832_v55, 0.0 }
 0x136   :  { %v1258_v8 = vpack.c.bf16 %v824_v6, %v824_v6  ;;  %v1057_v9 = vsel %vm1047_vm2, %v824_v6, 0.0  ;;  %v1092_v10 = vmul.f32 %v824_v6, %v824_v6  ;;  %v1266_v11 = vpack.c.bf16 %v856_v7, %v856_v7 }
 0x137   :  { %v1058_v14 = vadd.f32 %v1057_v9, %v1056_v4  ;;  %v1114_v33 = vsel %vm1047_vm2, %v1093_v51, 0.0  ;;  %v1063_v25 = vsel %vm1047_vm2, %v1854_v49, 0.0  ;;  %v1096_v26 = vmul.f32 %v1886_v1, %v1886_v1 }
 0x138   :  { %937 = vst.msk [vmem:[%s2018_s2 + $0x14] sm:$0xf] %vm931_vm1, %v1258_v8  ;;  %v1112_v17 = vsel %vm1047_vm2, %v1092_v10, 0.0  ;;  %945 = vst.msk [vmem:[%s2018_s2 + $0x34] sm:$0xf] %vm931_vm1, %v1266_v11  ;;  %v1116_v28 = vsel %vm1047_vm2, %v1094_v16, 0.0  ;;  %v1097_v13 = vmul.f32 %v1842_v27, %v1842_v27  ;;  %v1098_v45 = vmul.f32 %v1878_v57, %v1878_v57 }
 0x139   :  { %v1060_v18 = vadd.f32 %v1059_v15, %v1058_v14  ;;  %v1113_v19 = vadd.f32 %v1112_v17, %v1111_v52  ;;  %v1118_v22 = vsel %vm1047_vm2, %v1095_v20, 0.0  ;;  %v1065_v31 = vsel %vm1047_vm2, %v1886_v1, 0.0 }
 0x13a   :  { %v1067_v49 = vsel %vm1047_vm2, %v1842_v27, 0.0  ;;  %v1120_v46 = vsel %vm1047_vm2, %v1096_v26, 0.0  ;;  %v1122_v32 = vsel %vm1047_vm2, %v1097_v13, 0.0  ;;  %v1069_v50 = vsel %vm1047_vm2, %v1878_v57, 0.0 }
 0x13b   :  { %v1062_v21 = vadd.f32 %v1061_v12, %v1060_v18  ;;  %v1115_v23 = vadd.f32 %v1114_v33, %v1113_v19  ;;  %v1099_v36 = vmul.f32 %v853_v43, %v853_v43  ;;  %v1124_v38 = vsel %vm1047_vm2, %v1098_v45, 0.0 }
 0x13c   :  { %v1071_v39 = vsel %vm1047_vm2, %v853_v43, 0.0  ;;  %v1100_v27 = vmul.f32 %v856_v7, %v856_v7  ;;  %v1101_v42 = vmul.f32 %v1918_v30, %v1918_v30  ;;  %v1073_v53 = vsel %vm1047_vm2, %v856_v7, 0.0 }
 0x13d   :  { %v1064_v29 = vadd.f32 %v1063_v25, %v1062_v21  ;;  %v1117_v34 = vadd.f32 %v1116_v28, %v1115_v23  ;;  %v1126_v41 = vsel %vm1047_vm2, %v1099_v36, 0.0  ;;  %v1075_v57 = vsel %vm1047_vm2, %v1918_v30, 0.0 }
 0x13e   :  { %v1102_v58 = vmul.f32 %v1942_v56, %v1942_v56  ;;  %v1128_v43 = vsel %vm1047_vm2, %v1100_v27, 0.0  ;;  %v1130_v61 = vsel %vm1047_vm2, %v1101_v42, 0.0  ;;  %v1077_v62 = vsel %vm1047_vm2, %v1942_v56, 0.0 }
 0x13f   :  { %v1119_v35 = vadd.f32 %v1118_v22, %v1117_v34  ;;  %v1066_v44 = vadd.f32 %v1065_v31, %v1064_v29 }
 0x140   :  { %v1132_v2 = vsel %vm1047_vm2, %v1102_v58, 0.0 }
 0x141   :  { %v1068_v47 = vadd.f32 %v1067_v49, %v1066_v44  ;;  %v1121_v48 = vadd.f32 %v1120_v46, %v1119_v35 }
 0x143   :  { %v1070_v37 = vadd.f32 %v1069_v50, %v1068_v47  ;;  %v1123_v1 = vadd.f32 %v1122_v32, %v1121_v48 }
 0x145   :  { %v1072_v24 = vadd.f32 %v1071_v39, %v1070_v37  ;;  %v1125_v40 = vadd.f32 %v1124_v38, %v1123_v1 }
 0x147   :  { %v1074_v54 = vadd.f32 %v1073_v53, %v1072_v24  ;;  %v1127_v55 = vadd.f32 %v1126_v41, %v1125_v40 }
 0x149   :  { %v1076_v59 = vadd.f32 %v1075_v57, %v1074_v54  ;;  %v1129_v60 = vadd.f32 %v1128_v43, %v1127_v55 }
 0x14b   :  { %v1078_v63 = vadd.f32 %v1077_v62, %v1076_v59  ;;  %v1131_v0 = vadd.f32 %v1130_v61, %v1129_v60 }
 0x14d   :  { %v1079_v4 = vrot.slane %v1078_v63, 4  ;;  %v1133_v3 = vadd.f32 %v1132_v2, %v1131_v0 }
 0x14f   :  { %v1080_v5 = vadd.f32 %v1079_v4, %v1078_v63  ;;  %v1134_v30 = vrot.slane %v1133_v3, 4 }
 0x151   :  { %v1081_v6 = vrot.slane %v1080_v5, 2  ;;  %v1135_v7 = vadd.f32 %v1134_v30, %v1133_v3 }
 0x153   :  { %v1082_v51 = vadd.f32 %v1081_v6, %v1080_v5  ;;  %v1136_v52 = vrot.slane %v1135_v7, 2 }
 0x155   :  { %v1083_v8 = vrot.slane %v1082_v51, 1  ;;  %v1137_v9 = vadd.f32 %v1136_v52, %v1135_v7 }
 0x157   :  { %v1084_v10 = vadd.f32 %v1083_v8, %v1082_v51  ;;  %v1138_v11 = vrot.slane %v1137_v9, 1 }
 0x159   :  { %1086 = vst.msk [vmem:[%s2019_s3] sm:$0x1] %vm1085_vm3, %v1084_v10  ;;  %v1139_v56 = vadd.f32 %v1138_v11, %v1137_v9 }
 0x15b   :  { %1140 = vst.msk [vmem:[%s2020_s4] sm:$0x1] %vm1085_vm3, %v1139_v56 }

// kernel: feedback_block_forward.27
= control target key start
LH: loop header
LB: loop body
LE: loop exit
PB: predicated region body
PF: predicated region fallthrough
CT: control target
= control target key end

     0   :  { %vm732_vm0 = vcmask 125952   ;;  %s1608_s0 = inlined_call_operand.vmem [shape: bf16[512,16], index: 0, kind: input, shape index: {}]   ;;  %s1609_s1 = inlined_call_operand.vmem [shape: f32[1,16], index: 1, kind: input, shape index: {}]   ;;  %s1610_s2 = inlined_call_operand.vmem [shape: f32[1,16], index: 2, kind: input, shape index: {}]   ;;  %s1611_s3 = inlined_call_operand.vmem [shape: bf16[512,16], index: 3, kind: output, shape index: {}]  }
   0x1   :  { %v932_v0 = vld [vmem:[%s1608_s0] sm:$0xff]   ;;  %v1059_v4 = vld [vmem:[%s1608_s0 + $0x8] sm:$0xff]   ;;  %v1060_v5 = vld [vmem:[%s1608_s0 + $0x10] sm:$0xff]  }
   0x2   :  { %v1118_v1 = vld [vmem:[%s1609_s1] ss:$0 sm:$0xff]  ;;  %v933_v2 = vunpack.c.l.bf16 %v932_v0  ;;  %v934_v3 = vunpack.c.h.bf16 %v932_v0  ;;  %v1061_v6 = vld [vmem:[%s1608_s0 + $0x18] sm:$0xff]   ;;  %v937_v8 = vunpack.c.l.bf16 %v1059_v4  ;;  %v938_v9 = vunpack.c.h.bf16 %v1059_v4  ;;  %v1063_v40 = vld [vmem:[%s1608_s0 + $0x28] sm:$0xff]  }
   0x3   :  { %v1132_v7 = vld [vmem:[%s1610_s2] ss:$0 sm:$0xff]  ;;  %v941_v10 = vunpack.c.l.bf16 %v1060_v5  ;;  %v942_v11 = vunpack.c.h.bf16 %v1060_v5  ;;  %v945_v14 = vunpack.c.l.bf16 %v1061_v6  ;;  %v946_v15 = vunpack.c.h.bf16 %v1061_v6  ;;  %v1064_v52 = vld [vmem:[%s1608_s0 + $0x30] sm:$0xff]  }
   0x4   :  { %v149_v12 = vmul.f32 %v933_v2, %v1118_v1  ;;  %v150_v13 = vmul.f32 %v934_v3, %v1118_v1  ;;  %v151_v16 = vmul.f32 %v937_v8, %v1118_v1  ;;  %v152_v17 = vmul.f32 %v938_v9, %v1118_v1  ;;  %v1062_v39 = vld [vmem:[%s1608_s0 + $0x20] sm:$0xff]  }
   0x5   :  { %v153_v18 = vmul.f32 %v941_v10, %v1118_v1  ;;  %v154_v19 = vmul.f32 %v942_v11, %v1118_v1  ;;  %v155_v22 = vmul.f32 %v945_v14, %v1118_v1  ;;  %v156_v23 = vmul.f32 %v946_v15, %v1118_v1 }
   0x6   :  { %v220_v20 = vadd.f32 %v1132_v7, %v149_v12  ;;  %v221_v21 = vadd.f32 %v1132_v7, %v150_v13  ;;  %v222_v24 = vadd.f32 %v1132_v7, %v151_v16  ;;  %v223_v25 = vadd.f32 %v1132_v7, %v152_v17  ;;  %v1065_v17 = vld [vmem:[%s1608_s0 + $0x38] sm:$0xff]  }
   0x7   :  { %v224_v26 = vadd.f32 %v1132_v7, %v153_v18  ;;  %v225_v27 = vadd.f32 %v1132_v7, %v154_v19  ;;  %v226_v46 = vadd.f32 %v1132_v7, %v155_v22  ;;  %v227_v47 = vadd.f32 %v1132_v7, %v156_v23  ;;  %v1066_v18 = vld [vmem:[%s1608_s0 + $0x40] sm:$0xff]   ;;  %v1067_v23 = vld [vmem:[%s1608_s0 + $0x48] sm:$0xff]  }
   0x8   :  { %vm284_vm1 = vcmp.gt.f32.partialorder %v220_v20, 0.0  ;;  %v348_v28 = vmul.f32 0.0, %v220_v20  ;;  %vm285_vm2 = vcmp.gt.f32.partialorder %v221_v21, 0.0  ;;  %v349_v29 = vmul.f32 0.0, %v221_v21 }
   0x9   :  { %vm286_vm3 = vcmp.gt.f32.partialorder %v222_v24, 0.0  ;;  %v350_v30 = vmul.f32 0.0, %v222_v24  ;;  %vm287_vm4 = vcmp.gt.f32.partialorder %v223_v25, 0.0  ;;  %v351_v31 = vmul.f32 0.0, %v223_v25 }
   0xa   :  { %v412_v32 = vsel %vm284_vm1, %v220_v20, %v348_v28  ;;  %v413_v33 = vsel %vm285_vm2, %v221_v21, %v349_v29  ;;  %vm288_vm5 = vcmp.gt.f32.partialorder %v224_v26, 0.0  ;;  %v352_v34 = vmul.f32 0.0, %v224_v26 }
   0xb   :  { %v867_v35 = vpack.c.bf16 %v412_v32, %v412_v32  ;;  %v868_v36 = vpack.c.bf16 %v413_v33, %v413_v33  ;;  %v414_v37 = vsel %vm286_vm3, %v222_v24, %v350_v30  ;;  %v415_v38 = vsel %vm287_vm4, %v223_v25, %v351_v31 }
   0xc   :  { %v869_v41 = vpack.c.bf16 %v414_v37, %v414_v37  ;;  %v870_v42 = vpack.c.bf16 %v415_v38, %v415_v38  ;;  %v416_v43 = vsel %vm288_vm5, %v224_v26, %v352_v34  ;;  %vm289_vm6 = vcmp.gt.f32.partialorder %v225_v27, 0.0 }
   0xd   :  { %733 = vst.msk [vmem:[%s1611_s3] sm:$0xf] %vm732_vm0, %v867_v35  ;;  %734 = vst.msk [vmem:[%s1611_s3 + $0x4] sm:$0xf] %vm732_vm0, %v868_v36  ;;  %v871_v44 = vpack.c.bf16 %v416_v43, %v416_v43  ;;  %v353_v45 = vmul.f32 0.0, %v225_v27  ;;  %v949_v48 = vunpack.c.l.bf16 %v1062_v39  ;;  %v950_v49 = vunpack.c.h.bf16 %v1062_v39 }
   0xe   :  { %735 = vst.msk [vmem:[%s1611_s3 + $0x8] sm:$0xf] %vm732_vm0, %v869_v41  ;;  %736 = vst.msk [vmem:[%s1611_s3 + $0xc] sm:$0xf] %vm732_vm0, %v870_v42  ;;  %v953_v50 = vunpack.c.l.bf16 %v1063_v40  ;;  %v954_v51 = vunpack.c.h.bf16 %v1063_v40  ;;  %vm290_vm7 = vcmp.gt.f32.partialorder %v226_v46, 0.0  ;;  %v354_v54 = vmul.f32 0.0, %v226_v46 }
   0xf   :  { %737 = vst.msk [vmem:[%s1611_s3 + $0x10] sm:$0xf] %vm732_vm0, %v871_v44  ;;  %v417_v53 = vsel %vm289_vm6, %v225_v27, %v353_v45  ;;  %vm291_vm8 = vcmp.gt.f32.partialorder %v227_v47, 0.0  ;;  %v355_v56 = vmul.f32 0.0, %v227_v47  ;;  %v157_v57 = vmul.f32 %v949_v48, %v1118_v1 }
  0x10   :  { %v872_v55 = vpack.c.bf16 %v417_v53, %v417_v53  ;;  %v158_v58 = vmul.f32 %v950_v49, %v1118_v1  ;;  %v418_v59 = vsel %vm290_vm7, %v226_v46, %v354_v54  ;;  %v159_v60 = vmul.f32 %v953_v50, %v1118_v1 }
  0x11   :  { %v160_v61 = vmul.f32 %v954_v51, %v1118_v1  ;;  %v957_v62 = vunpack.c.l.bf16 %v1064_v52  ;;  %v873_v63 = vpack.c.bf16 %v418_v59, %v418_v59  ;;  %v419_v0 = vsel %vm291_vm8, %v227_v47, %v355_v56 }
  0x12   :  { %738 = vst.msk [vmem:[%s1611_s3 + $0x14] sm:$0xf] %vm732_vm0, %v872_v55  ;;  %v228_v2 = vadd.f32 %v1132_v7, %v157_v57  ;;  %v229_v3 = vadd.f32 %v1132_v7, %v158_v58  ;;  %v874_v4 = vpack.c.bf16 %v419_v0, %v419_v0  ;;  %v230_v5 = vadd.f32 %v1132_v7, %v159_v60  ;;  %v1068_v57 = vld [vmem:[%s1608_s0 + $0x50] sm:$0xff]  }
  0x13   :  { %v231_v6 = vadd.f32 %v1132_v7, %v160_v61  ;;  %v161_v8 = vmul.f32 %v957_v62, %v1118_v1  ;;  %739 = vst.msk [vmem:[%s1611_s3 + $0x18] sm:$0xf] %vm732_vm0, %v873_v63  ;;  %v958_v16 = vunpack.c.h.bf16 %v1064_v52  ;;  %v961_v28 = vunpack.c.l.bf16 %v1065_v17  ;;  %v1069_v62 = vld [vmem:[%s1608_s0 + $0x58] sm:$0xff]  }
  0x14   :  { %vm292_vm9 = vcmp.gt.f32.partialorder %v228_v2, 0.0  ;;  %v356_v9 = vmul.f32 0.0, %v228_v2  ;;  %vm293_vm10 = vcmp.gt.f32.partialorder %v229_v3, 0.0  ;;  %v357_v10 = vmul.f32 0.0, %v229_v3  ;;  %740 = vst.msk [vmem:[%s1611_s3 + $0x1c] sm:$0xf] %vm732_vm0, %v874_v4 }
  0x15   :  { %vm294_vm11 = vcmp.gt.f32.partialorder %v230_v5, 0.0  ;;  %v358_v11 = vmul.f32 0.0, %v230_v5  ;;  %vm295_vm12 = vcmp.gt.f32.partialorder %v231_v6, 0.0  ;;  %v359_v12 = vmul.f32 0.0, %v231_v6 }
  0x16   :  { %v420_v13 = vsel %vm292_vm9, %v228_v2, %v356_v9  ;;  %v421_v14 = vsel %vm293_vm10, %v229_v3, %v357_v10  ;;  %v232_v15 = vadd.f32 %v1132_v7, %v161_v8  ;;  %v162_v27 = vmul.f32 %v958_v16, %v1118_v1  ;;  %v1070_v3 = vld [vmem:[%s1608_s0 + $0x60] sm:$0xff]  }
  0x17   :  { %v875_v19 = vpack.c.bf16 %v420_v13, %v420_v13  ;;  %v876_v20 = vpack.c.bf16 %v421_v14, %v421_v14  ;;  %v422_v21 = vsel %vm294_vm11, %v230_v5, %v358_v11  ;;  %v423_v22 = vsel %vm295_vm12, %v231_v6, %v359_v12  ;;  %v1071_v13 = vld [vmem:[%s1608_s0 + $0x68] sm:$0xff]  }
  0x18   :  { %v877_v24 = vpack.c.bf16 %v422_v21, %v422_v21  ;;  %v878_v25 = vpack.c.bf16 %v423_v22, %v423_v22  ;;  %vm296_vm13 = vcmp.gt.f32.partialorder %v232_v15, 0.0  ;;  %v360_v26 = vmul.f32 0.0, %v232_v15 }
  0x19   :  { %741 = vst.msk [vmem:[%s1611_s3 + $0x20] sm:$0xf] %vm732_vm0, %v875_v19  ;;  %742 = vst.msk [vmem:[%s1611_s3 + $0x24] sm:$0xf] %vm732_vm0, %v876_v20  ;;  %v962_v29 = vunpack.c.h.bf16 %v1065_v17  ;;  %v965_v30 = vunpack.c.l.bf16 %v1066_v18  ;;  %v966_v32 = vunpack.c.h.bf16 %v1066_v18  ;;  %v969_v33 = vunpack.c.l.bf16 %v1067_v23 }
  0x1a   :  { %743 = vst.msk [vmem:[%s1611_s3 + $0x28] sm:$0xf] %vm732_vm0, %v877_v24  ;;  %744 = vst.msk [vmem:[%s1611_s3 + $0x2c] sm:$0xf] %vm732_vm0, %v878_v25  ;;  %v424_v31 = vsel %vm296_vm13, %v232_v15, %v360_v26  ;;  %v970_v34 = vunpack.c.h.bf16 %v1067_v23  ;;  %v233_v36 = vadd.f32 %v1132_v7, %v162_v27  ;;  %v163_v37 = vmul.f32 %v961_v28, %v1118_v1 }
  0x1b   :  { %v879_v35 = vpack.c.bf16 %v424_v31, %v424_v31  ;;  %v164_v38 = vmul.f32 %v962_v29, %v1118_v1  ;;  %v165_v39 = vmul.f32 %v965_v30, %v1118_v1  ;;  %v166_v40 = vmul.f32 %v966_v32, %v1118_v1 }
  0x1c   :  { %v167_v41 = vmul.f32 %v969_v33, %v1118_v1  ;;  %v168_v42 = vmul.f32 %v970_v34, %v1118_v1  ;;  %vm297_vm14 = vcmp.gt.f32.partialorder %v233_v36, 0.0  ;;  %v361_v43 = vmul.f32 0.0, %v233_v36 }
  0x1d   :  { %745 = vst.msk [vmem:[%s1611_s3 + $0x30] sm:$0xf] %vm732_vm0, %v879_v35  ;;  %v234_v44 = vadd.f32 %v1132_v7, %v163_v37  ;;  %v235_v45 = vadd.f32 %v1132_v7, %v164_v38  ;;  %v236_v46 = vadd.f32 %v1132_v7, %v165_v39  ;;  %v237_v47 = vadd.f32 %v1132_v7, %v166_v40 }
  0x1e   :  { %v238_v48 = vadd.f32 %v1132_v7, %v167_v41  ;;  %v239_v49 = vadd.f32 %v1132_v7, %v168_v42  ;;  %v425_v50 = vsel %vm297_vm14, %v233_v36, %v361_v43  ;;  %v973_v8 = vunpack.c.l.bf16 %v1068_v57  ;;  %v1072_v41 = vld [vmem:[%s1608_s0 + $0x70] sm:$0xff]  }
  0x1f   :  { %vm298_vm15 = vcmp.gt.f32.partialorder %v234_v44, 0.0  ;;  %v362_v51 = vmul.f32 0.0, %v234_v44  ;;  %vm299_vm1 = vcmp.gt.f32.partialorder %v235_v45, 0.0  ;;  %v880_v52 = vpack.c.bf16 %v425_v50, %v425_v50 }
  0x20   :  { %v363_v53 = vmul.f32 0.0, %v235_v45  ;;  %vm300_vm2 = vcmp.gt.f32.partialorder %v236_v46, 0.0  ;;  %v364_v54 = vmul.f32 0.0, %v236_v46  ;;  %vm301_vm3 = vcmp.gt.f32.partialorder %v237_v47, 0.0 }
  0x21   :  { %v426_v55 = vsel %vm298_vm15, %v234_v44, %v362_v51  ;;  %v365_v56 = vmul.f32 0.0, %v237_v47  ;;  %vm302_vm4 = vcmp.gt.f32.partialorder %v238_v48, 0.0  ;;  %746 = vst.msk [vmem:[%s1611_s3 + $0x34] sm:$0xf] %vm732_vm0, %v880_v52  ;;  %v366_v61 = vmul.f32 0.0, %v238_v48 }
  0x22   :  { %v881_v58 = vpack.c.bf16 %v426_v55, %v426_v55  ;;  %v427_v59 = vsel %vm299_vm1, %v235_v45, %v363_v53  ;;  %v428_v60 = vsel %vm300_vm2, %v236_v46, %v364_v54  ;;  %vm303_vm5 = vcmp.gt.f32.partialorder %v239_v49, 0.0  ;;  %v1073_v45 = vld [vmem:[%s1608_s0 + $0x78] sm:$0xff]  }
  0x23   :  { %v882_v63 = vpack.c.bf16 %v427_v59, %v427_v59  ;;  %v883_v0 = vpack.c.bf16 %v428_v60, %v428_v60  ;;  %v429_v2 = vsel %vm301_vm3, %v237_v47, %v365_v56  ;;  %v430_v5 = vsel %vm302_vm4, %v238_v48, %v366_v61 }
  0x24   :  { %747 = vst.msk [vmem:[%s1611_s3 + $0x38] sm:$0xf] %vm732_vm0, %v881_v58  ;;  %v884_v4 = vpack.c.bf16 %v429_v2, %v429_v2  ;;  %v367_v6 = vmul.f32 0.0, %v239_v49  ;;  %v885_v9 = vpack.c.bf16 %v430_v5, %v430_v5  ;;  %v974_v10 = vunpack.c.h.bf16 %v1068_v57 }
  0x25   :  { %748 = vst.msk [vmem:[%s1611_s3 + $0x3c] sm:$0xf] %vm732_vm0, %v882_v63  ;;  %749 = vst.msk [vmem:[%s1611_s3 + $0x40] sm:$0xf] %vm732_vm0, %v883_v0  ;;  %v977_v11 = vunpack.c.l.bf16 %v1069_v62  ;;  %v978_v12 = vunpack.c.h.bf16 %v1069_v62  ;;  %v169_v15 = vmul.f32 %v973_v8, %v1118_v1  ;;  %v981_v16 = vunpack.c.l.bf16 %v1070_v3  ;;  %v1074_v62 = vld [vmem:[%s1608_s0 + $0x80] sm:$0xff]  }
  0x26   :  { %750 = vst.msk [vmem:[%s1611_s3 + $0x44] sm:$0xf] %vm732_vm0, %v884_v4  ;;  %v431_v14 = vsel %vm303_vm5, %v239_v49, %v367_v6  ;;  %v982_v17 = vunpack.c.h.bf16 %v1070_v3  ;;  %751 = vst.msk [vmem:[%s1611_s3 + $0x48] sm:$0xf] %vm732_vm0, %v885_v9  ;;  %v170_v19 = vmul.f32 %v974_v10, %v1118_v1  ;;  %v985_v25 = vunpack.c.l.bf16 %v1071_v13 }
  0x27   :  { %v886_v18 = vpack.c.bf16 %v431_v14, %v431_v14  ;;  %v171_v20 = vmul.f32 %v977_v11, %v1118_v1  ;;  %v172_v21 = vmul.f32 %v978_v12, %v1118_v1  ;;  %v240_v22 = vadd.f32 %v1132_v7, %v169_v15 }
  0x28   :  { %v173_v23 = vmul.f32 %v981_v16, %v1118_v1  ;;  %v174_v24 = vmul.f32 %v982_v17, %v1118_v1  ;;  %v241_v26 = vadd.f32 %v1132_v7, %v170_v19  ;;  %v986_v29 = vunpack.c.h.bf16 %v1071_v13  ;;  %v1075_v16 = vld [vmem:[%s1608_s0 + $0x88] sm:$0xff]  }
  0x29   :  { %752 = vst.msk [vmem:[%s1611_s3 + $0x4c] sm:$0xf] %vm732_vm0, %v886_v18  ;;  %v242_v27 = vadd.f32 %v1132_v7, %v171_v20  ;;  %v243_v28 = vadd.f32 %v1132_v7, %v172_v21  ;;  %vm304_vm6 = vcmp.gt.f32.partialorder %v240_v22, 0.0  ;;  %v368_v30 = vmul.f32 0.0, %v240_v22 }
  0x2a   :  { %v244_v31 = vadd.f32 %v1132_v7, %v173_v23  ;;  %v245_v32 = vadd.f32 %v1132_v7, %v174_v24  ;;  %vm305_vm7 = vcmp.gt.f32.partialorder %v241_v26, 0.0  ;;  %v369_v33 = vmul.f32 0.0, %v241_v26  ;;  %v1076_v24 = vld [vmem:[%s1608_s0 + $0x90] sm:$0xff]  }
  0x2b   :  { %vm306_vm8 = vcmp.gt.f32.partialorder %v242_v27, 0.0  ;;  %v370_v34 = vmul.f32 0.0, %v242_v27  ;;  %v432_v35 = vsel %vm304_vm6, %v240_v22, %v368_v30  ;;  %vm307_vm9 = vcmp.gt.f32.partialorder %v243_v28, 0.0 }
  0x2c   :  { %v371_v36 = vmul.f32 0.0, %v243_v28  ;;  %vm308_vm10 = vcmp.gt.f32.partialorder %v244_v31, 0.0  ;;  %v887_v37 = vpack.c.bf16 %v432_v35, %v432_v35  ;;  %v433_v38 = vsel %vm305_vm7, %v241_v26, %v369_v33 }
  0x2d   :  { %v434_v39 = vsel %vm306_vm8, %v242_v27, %v370_v34  ;;  %v372_v40 = vmul.f32 0.0, %v244_v31  ;;  %v888_v42 = vpack.c.bf16 %v433_v38, %v433_v38  ;;  %vm309_vm11 = vcmp.gt.f32.partialorder %v245_v32, 0.0 }
  0x2e   :  { %v889_v43 = vpack.c.bf16 %v434_v39, %v434_v39  ;;  %v435_v44 = vsel %vm307_vm9, %v243_v28, %v371_v36  ;;  %753 = vst.msk [vmem:[%s1611_s3 + $0x50] sm:$0xf] %vm732_vm0, %v887_v37  ;;  %v373_v48 = vmul.f32 0.0, %v245_v32  ;;  %v175_v49 = vmul.f32 %v985_v25, %v1118_v1 }
  0x2f   :  { %v890_v46 = vpack.c.bf16 %v435_v44, %v435_v44  ;;  %v436_v47 = vsel %vm308_vm10, %v244_v31, %v372_v40  ;;  %754 = vst.msk [vmem:[%s1611_s3 + $0x54] sm:$0xf] %vm732_vm0, %v888_v42  ;;  %v176_v51 = vmul.f32 %v986_v29, %v1118_v1  ;;  %v989_v52 = vunpack.c.l.bf16 %v1072_v41  ;;  %v1359_v29 = vld [vmem:[%s1608_s0 + $0x98] sm:$0xff]  }
  0x30   :  { %755 = vst.msk [vmem:[%s1611_s3 + $0x58] sm:$0xf] %vm732_vm0, %v889_v43  ;;  %v891_v50 = vpack.c.bf16 %v436_v47, %v436_v47  ;;  %v990_v53 = vunpack.c.h.bf16 %v1072_v41  ;;  %v437_v54 = vsel %vm309_vm11, %v245_v32, %v373_v48  ;;  %v246_v55 = vadd.f32 %v1132_v7, %v175_v49 }
  0x31   :  { %756 = vst.msk [vmem:[%s1611_s3 + $0x5c] sm:$0xf] %vm732_vm0, %v890_v46  ;;  %v993_v56 = vunpack.c.l.bf16 %v1073_v45  ;;  %v994_v57 = vunpack.c.h.bf16 %v1073_v45  ;;  %v892_v58 = vpack.c.bf16 %v437_v54, %v437_v54  ;;  %v247_v59 = vadd.f32 %v1132_v7, %v176_v51 }
  0x32   :  { %757 = vst.msk [vmem:[%s1611_s3 + $0x60] sm:$0xf] %vm732_vm0, %v891_v50  ;;  %v177_v60 = vmul.f32 %v989_v52, %v1118_v1  ;;  %v178_v61 = vmul.f32 %v990_v53, %v1118_v1  ;;  %vm310_vm12 = vcmp.gt.f32.partialorder %v246_v55, 0.0  ;;  %v374_v63 = vmul.f32 0.0, %v246_v55 }
  0x33   :  { %v179_v0 = vmul.f32 %v993_v56, %v1118_v1  ;;  %v180_v2 = vmul.f32 %v994_v57, %v1118_v1  ;;  %758 = vst.msk [vmem:[%s1611_s3 + $0x64] sm:$0xf] %vm732_vm0, %v892_v58  ;;  %vm311_vm13 = vcmp.gt.f32.partialorder %v247_v59, 0.0  ;;  %v375_v3 = vmul.f32 0.0, %v247_v59  ;;  %v1078_v58 = vld [vmem:[%s1608_s0 + $0xa0] sm:$0xff]  }
  0x34   :  { %v248_v4 = vadd.f32 %v1132_v7, %v177_v60  ;;  %v249_v5 = vadd.f32 %v1132_v7, %v178_v61  ;;  %v438_v6 = vsel %vm310_vm12, %v246_v55, %v374_v63  ;;  %v997_v10 = vunpack.c.l.bf16 %v1074_v62 }
  0x35   :  { %v250_v8 = vadd.f32 %v1132_v7, %v179_v0  ;;  %v251_v9 = vadd.f32 %v1132_v7, %v180_v2  ;;  %v893_v11 = vpack.c.bf16 %v438_v6, %v438_v6  ;;  %v439_v12 = vsel %vm311_vm13, %v247_v59, %v375_v3  ;;  %v1080_v6 = vld [vmem:[%s1608_s0 + $0xb0] sm:$0xff]  }
  0x36   :  { %vm312_vm14 = vcmp.gt.f32.partialorder %v248_v4, 0.0  ;;  %v376_v13 = vmul.f32 0.0, %v248_v4  ;;  %v894_v14 = vpack.c.bf16 %v439_v12, %v439_v12  ;;  %vm313_vm15 = vcmp.gt.f32.partialorder %v249_v5, 0.0  ;;  %v1081_v12 = vld [vmem:[%s1608_s0 + $0xb8] sm:$0xff]  }
  0x37   :  { %v377_v15 = vmul.f32 0.0, %v249_v5  ;;  %vm314_vm1 = vcmp.gt.f32.partialorder %v250_v8, 0.0  ;;  %759 = vst.msk [vmem:[%s1611_s3 + $0x68] sm:$0xf] %vm732_vm0, %v893_v11  ;;  %v378_v18 = vmul.f32 0.0, %v250_v8  ;;  %vm315_vm2 = vcmp.gt.f32.partialorder %v251_v9, 0.0 }
  0x38   :  { %v440_v17 = vsel %vm312_vm14, %v248_v4, %v376_v13  ;;  %v379_v19 = vmul.f32 0.0, %v251_v9  ;;  %760 = vst.msk [vmem:[%s1611_s3 + $0x6c] sm:$0xf] %vm732_vm0, %v894_v14  ;;  %v181_v22 = vmul.f32 %v997_v10, %v1118_v1  ;;  %v998_v23 = vunpack.c.h.bf16 %v1074_v62 }
  0x39   :  { %v895_v20 = vpack.c.bf16 %v440_v17, %v440_v17  ;;  %v441_v21 = vsel %vm313_vm15, %v249_v5, %v377_v15  ;;  %v442_v26 = vsel %vm314_vm1, %v250_v8, %v378_v18  ;;  %v1001_v28 = vunpack.c.l.bf16 %v1075_v16  ;;  %v1079_v5 = vld [vmem:[%s1608_s0 + $0xa8] sm:$0xff]  }
  0x3a   :  { %v896_v25 = vpack.c.bf16 %v441_v21, %v441_v21  ;;  %v443_v27 = vsel %vm315_vm2, %v251_v9, %v379_v19  ;;  %v897_v30 = vpack.c.bf16 %v442_v26, %v442_v26  ;;  %v252_v32 = vadd.f32 %v1132_v7, %v181_v22 }
  0x3b   :  { %761 = vst.msk [vmem:[%s1611_s3 + $0x70] sm:$0xf] %vm732_vm0, %v895_v20  ;;  %v898_v31 = vpack.c.bf16 %v443_v27, %v443_v27  ;;  %v182_v33 = vmul.f32 %v998_v23, %v1118_v1  ;;  %v183_v34 = vmul.f32 %v1001_v28, %v1118_v1  ;;  %v1002_v35 = vunpack.c.h.bf16 %v1075_v16 }
  0x3c   :  { %762 = vst.msk [vmem:[%s1611_s3 + $0x74] sm:$0xf] %vm732_vm0, %v896_v25  ;;  %v1005_v36 = vunpack.c.l.bf16 %v1076_v24  ;;  %v1006_v37 = vunpack.c.h.bf16 %v1076_v24  ;;  %763 = vst.msk [vmem:[%s1611_s3 + $0x78] sm:$0xf] %vm732_vm0, %v897_v30  ;;  %vm316_vm3 = vcmp.gt.f32.partialorder %v252_v32, 0.0  ;;  %v380_v38 = vmul.f32 0.0, %v252_v32 }
  0x3d   :  { %764 = vst.msk [vmem:[%s1611_s3 + $0x7c] sm:$0xf] %vm732_vm0, %v898_v31  ;;  %v253_v39 = vadd.f32 %v1132_v7, %v182_v33  ;;  %v1009_v40 = vunpack.c.l.bf16 %v1359_v29  ;;  %v254_v41 = vadd.f32 %v1132_v7, %v183_v34  ;;  %v184_v42 = vmul.f32 %v1002_v35, %v1118_v1 }
  0x3e   :  { %v185_v43 = vmul.f32 %v1005_v36, %v1118_v1  ;;  %v186_v44 = vmul.f32 %v1006_v37, %v1118_v1  ;;  %v444_v45 = vsel %vm316_vm3, %v252_v32, %v380_v38  ;;  %v1010_v3 = vunpack.c.h.bf16 %v1359_v29 }
  0x3f   :  { %vm317_vm4 = vcmp.gt.f32.partialorder %v253_v39, 0.0  ;;  %v381_v46 = vmul.f32 0.0, %v253_v39  ;;  %v187_v47 = vmul.f32 %v1009_v40, %v1118_v1  ;;  %v899_v48 = vpack.c.bf16 %v444_v45, %v444_v45 }
  0x40   :  { %vm318_vm5 = vcmp.gt.f32.partialorder %v254_v41, 0.0  ;;  %v382_v49 = vmul.f32 0.0, %v254_v41  ;;  %v255_v50 = vadd.f32 %v1132_v7, %v184_v42  ;;  %v256_v52 = vadd.f32 %v1132_v7, %v185_v43 }
  0x41   :  { %v445_v51 = vsel %vm317_vm4, %v253_v39, %v381_v46  ;;  %v257_v53 = vadd.f32 %v1132_v7, %v186_v44  ;;  %v258_v54 = vadd.f32 %v1132_v7, %v187_v47  ;;  %765 = vst.msk [vmem:[%s1611_s3 + $0x80] sm:$0xf] %vm732_vm0, %v899_v48  ;;  %v1013_v4 = vunpack.c.l.bf16 %v1078_v58 }
  0x42   :  { %v900_v55 = vpack.c.bf16 %v445_v51, %v445_v51  ;;  %v446_v56 = vsel %vm318_vm5, %v254_v41, %v382_v49  ;;  %vm319_vm6 = vcmp.gt.f32.partialorder %v255_v50, 0.0  ;;  %v383_v57 = vmul.f32 0.0, %v255_v50  ;;  %v1082_v41 = vld [vmem:[%s1608_s0 + $0xc0] sm:$0xff]  }
  0x43   :  { %v901_v59 = vpack.c.bf16 %v446_v56, %v446_v56  ;;  %vm320_vm7 = vcmp.gt.f32.partialorder %v256_v52, 0.0  ;;  %v384_v60 = vmul.f32 0.0, %v256_v52  ;;  %vm321_vm8 = vcmp.gt.f32.partialorder %v257_v53, 0.0 }
  0x44   :  { %766 = vst.msk [vmem:[%s1611_s3 + $0x84] sm:$0xf] %vm732_vm0, %v900_v55  ;;  %v447_v61 = vsel %vm319_vm6, %v255_v50, %v383_v57  ;;  %v385_v62 = vmul.f32 0.0, %v257_v53  ;;  %vm322_vm9 = vcmp.gt.f32.partialorder %v258_v54, 0.0  ;;  %v386_v63 = vmul.f32 0.0, %v258_v54 }
  0x45   :  { %767 = vst.msk [vmem:[%s1611_s3 + $0x88] sm:$0xf] %vm732_vm0, %v901_v59  ;;  %v902_v0 = vpack.c.bf16 %v447_v61, %v447_v61  ;;  %v448_v2 = vsel %vm320_vm7, %v256_v52, %v384_v60  ;;  %v1014_v11 = vunpack.c.h.bf16 %v1078_v58  ;;  %v188_v15 = vmul.f32 %v1010_v3, %v1118_v1  ;;  %v1083_v52 = vld [vmem:[%s1608_s0 + $0xc8] sm:$0xff]  }
  0x46   :  { %v903_v8 = vpack.c.bf16 %v448_v2, %v448_v2  ;;  %v449_v9 = vsel %vm321_vm8, %v257_v53, %v385_v62  ;;  %v450_v10 = vsel %vm322_vm9, %v258_v54, %v386_v63  ;;  %v189_v16 = vmul.f32 %v1013_v4, %v1118_v1 }
  0x47   :  { %768 = vst.msk [vmem:[%s1611_s3 + $0x8c] sm:$0xf] %vm732_vm0, %v902_v0  ;;  %v904_v13 = vpack.c.bf16 %v449_v9, %v449_v9  ;;  %v905_v14 = vpack.c.bf16 %v450_v10, %v450_v10  ;;  %v190_v17 = vmul.f32 %v1014_v11, %v1118_v1  ;;  %v1017_v18 = vunpack.c.l.bf16 %v1079_v5  ;;  %v1084_v9 = vld [vmem:[%s1608_s0 + $0xd0] sm:$0xff]  }
  0x48   :  { %769 = vst.msk [vmem:[%s1611_s3 + $0x90] sm:$0xf] %vm732_vm0, %v903_v8  ;;  %v1018_v19 = vunpack.c.h.bf16 %v1079_v5  ;;  %v1021_v20 = vunpack.c.l.bf16 %v1080_v6  ;;  %v259_v21 = vadd.f32 %v1132_v7, %v188_v15  ;;  %v260_v22 = vadd.f32 %v1132_v7, %v189_v16 }
  0x49   :  { %770 = vst.msk [vmem:[%s1611_s3 + $0x94] sm:$0xf] %vm732_vm0, %v904_v13  ;;  %771 = vst.msk [vmem:[%s1611_s3 + $0x98] sm:$0xf] %vm732_vm0, %v905_v14  ;;  %v1022_v23 = vunpack.c.h.bf16 %v1080_v6  ;;  %v1025_v24 = vunpack.c.l.bf16 %v1081_v12  ;;  %v261_v25 = vadd.f32 %v1132_v7, %v190_v17  ;;  %v191_v26 = vmul.f32 %v1017_v18, %v1118_v1 }
  0x4a   :  { %v192_v27 = vmul.f32 %v1018_v19, %v1118_v1  ;;  %v193_v28 = vmul.f32 %v1021_v20, %v1118_v1  ;;  %vm323_vm10 = vcmp.gt.f32.partialorder %v259_v21, 0.0  ;;  %v387_v29 = vmul.f32 0.0, %v259_v21 }
  0x4b   :  { %vm324_vm11 = vcmp.gt.f32.partialorder %v260_v22, 0.0  ;;  %v388_v30 = vmul.f32 0.0, %v260_v22  ;;  %vm325_vm12 = vcmp.gt.f32.partialorder %v261_v25, 0.0  ;;  %v389_v31 = vmul.f32 0.0, %v261_v25 }
  0x4c   :  { %v262_v32 = vadd.f32 %v1132_v7, %v191_v26  ;;  %v263_v33 = vadd.f32 %v1132_v7, %v192_v27  ;;  %v451_v34 = vsel %vm323_vm10, %v259_v21, %v387_v29  ;;  %v264_v36 = vadd.f32 %v1132_v7, %v193_v28 }
  0x4d   :  { %v452_v35 = vsel %vm324_vm11, %v260_v22, %v388_v30  ;;  %v194_v37 = vmul.f32 %v1022_v23, %v1118_v1  ;;  %v906_v38 = vpack.c.bf16 %v451_v34, %v451_v34  ;;  %v453_v40 = vsel %vm325_vm12, %v261_v25, %v389_v31  ;;  %v1085_v23 = vld [vmem:[%s1608_s0 + $0xd8] sm:$0xff]   ;;  %v1086_v30 = vld [vmem:[%s1608_s0 + $0xe0] sm:$0xff]  }
  0x4e   :  { %v907_v39 = vpack.c.bf16 %v452_v35, %v452_v35  ;;  %vm326_vm13 = vcmp.gt.f32.partialorder %v262_v32, 0.0  ;;  %v908_v42 = vpack.c.bf16 %v453_v40, %v453_v40  ;;  %v390_v43 = vmul.f32 0.0, %v262_v32 }
  0x4f   :  { %vm327_vm14 = vcmp.gt.f32.partialorder %v263_v33, 0.0  ;;  %v391_v44 = vmul.f32 0.0, %v263_v33  ;;  %772 = vst.msk [vmem:[%s1611_s3 + $0x9c] sm:$0xf] %vm732_vm0, %v906_v38  ;;  %vm328_vm15 = vcmp.gt.f32.partialorder %v264_v36, 0.0  ;;  %v392_v45 = vmul.f32 0.0, %v264_v36 }
  0x50   :  { %773 = vst.msk [vmem:[%s1611_s3 + $0xa0] sm:$0xf] %vm732_vm0, %v907_v39  ;;  %v265_v46 = vadd.f32 %v1132_v7, %v194_v37  ;;  %v195_v47 = vmul.f32 %v1025_v24, %v1118_v1  ;;  %774 = vst.msk [vmem:[%s1611_s3 + $0xa4] sm:$0xf] %vm732_vm0, %v908_v42  ;;  %v454_v48 = vsel %vm326_vm13, %v262_v32, %v390_v43  ;;  %v1026_v50 = vunpack.c.h.bf16 %v1081_v12  ;;  %v1087_v39 = vld [vmem:[%s1608_s0 + $0xe8] sm:$0xff]  }
  0x51   :  { %v455_v49 = vsel %vm327_vm14, %v263_v33, %v391_v44  ;;  %v1029_v51 = vunpack.c.l.bf16 %v1082_v41  ;;  %v909_v53 = vpack.c.bf16 %v454_v48, %v454_v48  ;;  %v456_v55 = vsel %vm328_vm15, %v264_v36, %v392_v45 }
  0x52   :  { %v910_v54 = vpack.c.bf16 %v455_v49, %v455_v49  ;;  %vm329_vm1 = vcmp.gt.f32.partialorder %v265_v46, 0.0  ;;  %v911_v56 = vpack.c.bf16 %v456_v55, %v456_v55  ;;  %v393_v57 = vmul.f32 0.0, %v265_v46 }
  0x53   :  { %v266_v58 = vadd.f32 %v1132_v7, %v195_v47  ;;  %v196_v59 = vmul.f32 %v1026_v50, %v1118_v1  ;;  %775 = vst.msk [vmem:[%s1611_s3 + $0xa8] sm:$0xf] %vm732_vm0, %v909_v53  ;;  %v197_v60 = vmul.f32 %v1029_v51, %v1118_v1  ;;  %v1030_v61 = vunpack.c.h.bf16 %v1082_v41 }
  0x54   :  { %776 = vst.msk [vmem:[%s1611_s3 + $0xac] sm:$0xf] %vm732_vm0, %v910_v54  ;;  %v1033_v62 = vunpack.c.l.bf16 %v1083_v52  ;;  %v1034_v63 = vunpack.c.h.bf16 %v1083_v52  ;;  %777 = vst.msk [vmem:[%s1611_s3 + $0xb0] sm:$0xf] %vm732_vm0, %v911_v56  ;;  %v457_v0 = vsel %vm329_vm1, %v265_v46, %v393_v57  ;;  %v1037_v19 = vunpack.c.l.bf16 %v1084_v9 }
  0x55   :  { %vm330_vm2 = vcmp.gt.f32.partialorder %v266_v58, 0.0  ;;  %v394_v2 = vmul.f32 0.0, %v266_v58  ;;  %v267_v3 = vadd.f32 %v1132_v7, %v196_v59  ;;  %v912_v4 = vpack.c.bf16 %v457_v0, %v457_v0  ;;  %v1088_v0 = vld [vmem:[%s1608_s0 + $0xf0] sm:$0xff]  }
  0x56   :  { %v268_v5 = vadd.f32 %v1132_v7, %v197_v60  ;;  %v198_v6 = vmul.f32 %v1030_v61, %v1118_v1  ;;  %v199_v8 = vmul.f32 %v1033_v62, %v1118_v1  ;;  %v200_v12 = vmul.f32 %v1034_v63, %v1118_v1 }
  0x57   :  { %v458_v10 = vsel %vm330_vm2, %v266_v58, %v394_v2  ;;  %vm331_vm3 = vcmp.gt.f32.partialorder %v267_v3, 0.0  ;;  %v395_v11 = vmul.f32 0.0, %v267_v3  ;;  %778 = vst.msk [vmem:[%s1611_s3 + $0xb4] sm:$0xf] %vm732_vm0, %v912_v4  ;;  %v201_v28 = vmul.f32 %v1037_v19, %v1118_v1 }
  0x58   :  { %v913_v13 = vpack.c.bf16 %v458_v10, %v458_v10  ;;  %vm332_vm4 = vcmp.gt.f32.partialorder %v268_v5, 0.0  ;;  %v396_v14 = vmul.f32 0.0, %v268_v5  ;;  %v269_v15 = vadd.f32 %v1132_v7, %v198_v6 }
  0x59   :  { %v459_v16 = vsel %vm331_vm3, %v267_v3, %v395_v11  ;;  %v270_v17 = vadd.f32 %v1132_v7, %v199_v8  ;;  %v271_v18 = vadd.f32 %v1132_v7, %v200_v12  ;;  %v1038_v29 = vunpack.c.h.bf16 %v1084_v9 }
  0x5a   :  { %779 = vst.msk [vmem:[%s1611_s3 + $0xb8] sm:$0xf] %vm732_vm0, %v913_v13  ;;  %v914_v20 = vpack.c.bf16 %v459_v16, %v459_v16  ;;  %v460_v21 = vsel %vm332_vm4, %v268_v5, %v396_v14  ;;  %vm333_vm5 = vcmp.gt.f32.partialorder %v269_v15, 0.0  ;;  %v397_v22 = vmul.f32 0.0, %v269_v15  ;;  %v1089_v13 = vld [vmem:[%s1608_s0 + $0xf8] sm:$0xff]  }
  0x5b   :  { %v915_v24 = vpack.c.bf16 %v460_v21, %v460_v21  ;;  %vm334_vm6 = vcmp.gt.f32.partialorder %v270_v17, 0.0  ;;  %v398_v25 = vmul.f32 0.0, %v270_v17  ;;  %vm335_vm7 = vcmp.gt.f32.partialorder %v271_v18, 0.0 }
  0x5c   :  { %780 = vst.msk [vmem:[%s1611_s3 + $0xbc] sm:$0xf] %vm732_vm0, %v914_v20  ;;  %v461_v26 = vsel %vm333_vm5, %v269_v15, %v397_v22  ;;  %v399_v27 = vmul.f32 0.0, %v271_v18  ;;  %v1041_v33 = vunpack.c.l.bf16 %v1085_v23  ;;  %v1042_v34 = vunpack.c.h.bf16 %v1085_v23 }
  0x5d   :  { %781 = vst.msk [vmem:[%s1611_s3 + $0xc0] sm:$0xf] %vm732_vm0, %v915_v24  ;;  %v916_v31 = vpack.c.bf16 %v461_v26, %v461_v26  ;;  %v462_v32 = vsel %vm334_vm6, %v270_v17, %v398_v25  ;;  %v272_v37 = vadd.f32 %v1132_v7, %v201_v28  ;;  %v202_v38 = vmul.f32 %v1038_v29, %v1118_v1 }
  0x5e   :  { %v917_v35 = vpack.c.bf16 %v462_v32, %v462_v32  ;;  %v463_v36 = vsel %vm335_vm7, %v271_v18, %v399_v27  ;;  %v203_v41 = vmul.f32 %v1041_v33, %v1118_v1  ;;  %v204_v42 = vmul.f32 %v1042_v34, %v1118_v1  ;;  %v1090_v27 = vld [vmem:[%s1609_s1] ss:$0 sm:$0xff] }
  0x5f   :  { %782 = vst.msk [vmem:[%s1611_s3 + $0xc4] sm:$0xf] %vm732_vm0, %v916_v31  ;;  %v918_v40 = vpack.c.bf16 %v463_v36, %v463_v36  ;;  %v1045_v43 = vunpack.c.l.bf16 %v1086_v30  ;;  %vm336_vm8 = vcmp.gt.f32.partialorder %v272_v37, 0.0  ;;  %v400_v44 = vmul.f32 0.0, %v272_v37 }
  0x60   :  { %783 = vst.msk [vmem:[%s1611_s3 + $0xc8] sm:$0xf] %vm732_vm0, %v917_v35  ;;  %v273_v45 = vadd.f32 %v1132_v7, %v202_v38  ;;  %v1046_v46 = vunpack.c.h.bf16 %v1086_v30  ;;  %v274_v47 = vadd.f32 %v1132_v7, %v203_v41  ;;  %v275_v48 = vadd.f32 %v1132_v7, %v204_v42 }
  0x61   :  { %784 = vst.msk [vmem:[%s1611_s3 + $0xcc] sm:$0xf] %vm732_vm0, %v918_v40  ;;  %v205_v49 = vmul.f32 %v1045_v43, %v1118_v1  ;;  %v1049_v50 = vunpack.c.l.bf16 %v1087_v39  ;;  %v464_v51 = vsel %vm336_vm8, %v272_v37, %v400_v44  ;;  %v1050_v63 = vunpack.c.h.bf16 %v1087_v39 }
  0x62   :  { %vm337_vm9 = vcmp.gt.f32.partialorder %v273_v45, 0.0  ;;  %v401_v52 = vmul.f32 0.0, %v273_v45  ;;  %v206_v53 = vmul.f32 %v1046_v46, %v1118_v1  ;;  %v919_v54 = vpack.c.bf16 %v464_v51, %v464_v51 }
  0x63   :  { %vm338_vm10 = vcmp.gt.f32.partialorder %v274_v47, 0.0  ;;  %v402_v55 = vmul.f32 0.0, %v274_v47  ;;  %vm339_vm11 = vcmp.gt.f32.partialorder %v275_v48, 0.0  ;;  %v403_v57 = vmul.f32 0.0, %v275_v48 }
  0x64   :  { %v465_v56 = vsel %vm337_vm9, %v273_v45, %v401_v52  ;;  %v276_v58 = vadd.f32 %v1132_v7, %v205_v49  ;;  %v277_v59 = vadd.f32 %v1132_v7, %v206_v53  ;;  %785 = vst.msk [vmem:[%s1611_s3 + $0xd0] sm:$0xf] %vm732_vm0, %v919_v54  ;;  %v207_v62 = vmul.f32 %v1049_v50, %v1118_v1 }
  0x65   :  { %v920_v60 = vpack.c.bf16 %v465_v56, %v465_v56  ;;  %v466_v61 = vsel %vm338_vm10, %v274_v47, %v402_v55  ;;  %v467_v3 = vsel %vm339_vm11, %v275_v48, %v403_v57  ;;  %v208_v10 = vmul.f32 %v1050_v63, %v1118_v1 }
  0x66   :  { %v921_v2 = vpack.c.bf16 %v466_v61, %v466_v61  ;;  %vm340_vm12 = vcmp.gt.f32.partialorder %v276_v58, 0.0  ;;  %v404_v4 = vmul.f32 0.0, %v276_v58  ;;  %v922_v5 = vpack.c.bf16 %v467_v3, %v467_v3 }
  0x67   :  { %786 = vst.msk [vmem:[%s1611_s3 + $0xd4] sm:$0xf] %vm732_vm0, %v920_v60  ;;  %vm341_vm13 = vcmp.gt.f32.partialorder %v277_v59, 0.0  ;;  %v405_v6 = vmul.f32 0.0, %v277_v59  ;;  %v278_v8 = vadd.f32 %v1132_v7, %v207_v62  ;;  %v1053_v11 = vunpack.c.l.bf16 %v1088_v0 }
  0x68   :  { %787 = vst.msk [vmem:[%s1611_s3 + $0xd8] sm:$0xf] %vm732_vm0, %v921_v2  ;;  %v468_v9 = vsel %vm340_vm12, %v276_v58, %v404_v4  ;;  %v1054_v12 = vunpack.c.h.bf16 %v1088_v0  ;;  %788 = vst.msk [vmem:[%s1611_s3 + $0xdc] sm:$0xf] %vm732_vm0, %v922_v5  ;;  %v279_v18 = vadd.f32 %v1132_v7, %v208_v10  ;;  %v1057_v22 = vunpack.c.l.bf16 %v1089_v13 }
  0x69   :  { %v923_v14 = vpack.c.bf16 %v468_v9, %v468_v9  ;;  %v469_v15 = vsel %vm341_vm13, %v277_v59, %v405_v6  ;;  %vm342_vm14 = vcmp.gt.f32.partialorder %v278_v8, 0.0  ;;  %v406_v16 = vmul.f32 0.0, %v278_v8 }
  0x6a   :  { %v924_v17 = vpack.c.bf16 %v469_v15, %v469_v15  ;;  %v209_v19 = vmul.f32 %v1053_v11, %v1118_v1  ;;  %v210_v20 = vmul.f32 %v1054_v12, %v1118_v1  ;;  %v1058_v23 = vunpack.c.h.bf16 %v1089_v13 }
  0x6b   :  { %789 = vst.msk [vmem:[%s1611_s3 + $0xe0] sm:$0xf] %vm732_vm0, %v923_v14  ;;  %v470_v21 = vsel %vm342_vm14, %v278_v8, %v406_v16  ;;  %vm343_vm15 = vcmp.gt.f32.partialorder %v279_v18, 0.0  ;;  %v407_v25 = vmul.f32 0.0, %v279_v18  ;;  %v211_v28 = vmul.f32 %v1090_v27, %v1057_v22 }
  0x6c   :  { %790 = vst.msk [vmem:[%s1611_s3 + $0xe4] sm:$0xf] %vm732_vm0, %v924_v17  ;;  %v925_v24 = vpack.c.bf16 %v470_v21, %v470_v21  ;;  %v280_v26 = vadd.f32 %v1132_v7, %v209_v19  ;;  %v281_v1 = vadd.f32 %v1132_v7, %v210_v20  ;;  %v212_v29 = vmul.f32 %v1090_v27, %v1058_v23  ;;  %v1091_v7 = vld [vmem:[%s1610_s2] ss:$0 sm:$0xff] }
  0x6d   :  { %v471_v30 = vsel %vm343_vm15, %v279_v18, %v407_v25  ;;  %v282_v34 = vadd.f32 %v1091_v7, %v211_v28 }
  0x6e   :  { %791 = vst.msk [vmem:[%s1611_s3 + $0xe8] sm:$0xf] %vm732_vm0, %v925_v24  ;;  %vm344_vm1 = vcmp.gt.f32.partialorder %v280_v26, 0.0  ;;  %v408_v31 = vmul.f32 0.0, %v280_v26  ;;  %v926_v32 = vpack.c.bf16 %v471_v30, %v471_v30  ;;  %vm345_vm2 = vcmp.gt.f32.partialorder %v281_v1, 0.0 }
  0x6f   :  { %v409_v33 = vmul.f32 0.0, %v281_v1  ;;  %v283_v36 = vadd.f32 %v1091_v7, %v212_v29  ;;  %vm346_vm3 = vcmp.gt.f32.partialorder %v282_v34, 0.0  ;;  %v410_v39 = vmul.f32 0.0, %v282_v34 }
  0x70   :  { %v472_v35 = vsel %vm344_vm1, %v280_v26, %v408_v31  ;;  %792 = vst.msk [vmem:[%s1611_s3 + $0xec] sm:$0xf] %vm732_vm0, %v926_v32 }
  0x71   :  { %v927_v37 = vpack.c.bf16 %v472_v35, %v472_v35  ;;  %v473_v38 = vsel %vm345_vm2, %v281_v1, %v409_v33  ;;  %vm347_vm4 = vcmp.gt.f32.partialorder %v283_v36, 0.0  ;;  %v411_v41 = vmul.f32 0.0, %v283_v36 }
  0x72   :  { %v928_v40 = vpack.c.bf16 %v473_v38, %v473_v38  ;;  %v474_v42 = vsel %vm346_vm3, %v282_v34, %v410_v39 }
  0x73   :  { %793 = vst.msk [vmem:[%s1611_s3 + $0xf0] sm:$0xf] %vm732_vm0, %v927_v37  ;;  %v929_v43 = vpack.c.bf16 %v474_v42, %v474_v42  ;;  %v475_v44 = vsel %vm347_vm4, %v283_v36, %v411_v41 }
  0x74   :  { %794 = vst.msk [vmem:[%s1611_s3 + $0xf4] sm:$0xf] %vm732_vm0, %v928_v40  ;;  %v930_v45 = vpack.c.bf16 %v475_v44, %v475_v44 }
  0x75   :  { %795 = vst.msk [vmem:[%s1611_s3 + $0xf8] sm:$0xf] %vm732_vm0, %v929_v43 }
  0x76   :  { %796 = vst.msk [vmem:[%s1611_s3 + $0xfc] sm:$0xf] %vm732_vm0, %v930_v45 }

// kernel: feedback_block_forward.26
= control target key start
LH: loop header
LB: loop body
LE: loop exit
PB: predicated region body
PF: predicated region fallthrough
CT: control target
= control target key end

     0   :  { %vm319_vm0 = vcmask 130048   ;;  %vm1512_vm1 = vcmask 125952   ;;  %vm2097_vm2 = vcmask 122880   ;;  %s3518_s3 = inlined_call_operand.vmem [shape: bf16[16,16], index: 3, kind: input, shape index: {}]   ;;  %s3519_s2 = inlined_call_operand.vmem [shape: bf16[16,16], index: 2, kind: input, shape index: {}]   ;;  %s3520_s1 = inlined_call_operand.vmem [shape: bf16[512,16], index: 1, kind: input, shape index: {}]   ;;  %s3521_s0 = inlined_call_operand.vmem [shape: bf16[512,16], index: 0, kind: input, shape index: {}]   ;;  %s3522_s4 = inlined_call_operand.vmem [shape: bf16[512,16], index: 4, kind: output, shape index: {0}]   ;;  %s3523_s5 = inlined_call_operand.vmem [shape: f32[1,1,16], index: 5, kind: output, shape index: {1}]   ;;  %s3524_s6 = inlined_call_operand.vmem [shape: f32[1,1,16], index: 6, kind: output, shape index: {2}]  }
   0x1   :  { %v2765_v0 = vld [vmem:[%s3518_s3] sm:$0xff]   ;;  %v2769_v4 = vld [vmem:[%s3520_s1 + $0x8] sm:$0xff]   ;;  %v2771_v6 = vld [vmem:[%s3520_s1 + $0x10] sm:$0xff]  }
   0x2   :  { %v2766_v1 = vld [vmem:[%s3519_s2] sm:$0xff]   ;;  %2633 = vmatprep.subr.bf16.mxu0 %v2765_v0  ;;  %v2770_v5 = vld [vmem:[%s3521_s0 + $0x8] sm:$0xff]   ;;  %v2772_v7 = vld [vmem:[%s3521_s0 + $0x10] sm:$0xff]  }
   0x3   :  { %v2767_v2 = vld [vmem:[%s3520_s1] sm:$0xff]   ;;  %2699 = vmatprep.subr.bf16.mxu1 %v2766_v1  ;;  %2634 = vmatpush3.bf16.msra.mxu0 %v2765_v0  ;;  %v2773_v8 = vld [vmem:[%s3520_s1 + $0x18] sm:$0xff]   ;;  %v2777_v12 = vld [vmem:[%s3520_s1 + $0x28] sm:$0xff]  }
   0x4   :  { %v2768_v3 = vld [vmem:[%s3521_s0] sm:$0xff]   ;;  %2700 = vmatpush3.bf16.msra.mxu1 %v2766_v1  ;;  %2635 = vmatprep.mubr.msk.bf16.mxu0 %vm319_vm0, %v2767_v2  ;;  %v2774_v9 = vld [vmem:[%s3521_s0 + $0x18] sm:$0xff]   ;;  %v2778_v13 = vld [vmem:[%s3521_s0 + $0x28] sm:$0xff]  }
   0x5   :  { %2701 = vmatprep.mubr.msk.bf16.mxu1 %vm319_vm0, %v2768_v3  ;;  %v2775_v10 = vld [vmem:[%s3520_s1 + $0x20] sm:$0xff]   ;;  %v2779_v14 = vld [vmem:[%s3520_s1 + $0x30] sm:$0xff]   ;;  %v2781_v16 = vld [vmem:[%s3520_s1 + $0x38] sm:$0xff]  }
   0x6   :  { %2636 = vmatmul.mubr.msk.bf16.vlgmr.msra.gmra.mxu0 %vm319_vm0, %v2769_v4  ;;  %v2776_v11 = vld [vmem:[%s3521_s0 + $0x20] sm:$0xff]   ;;  %v2780_v15 = vld [vmem:[%s3521_s0 + $0x30] sm:$0xff]   ;;  %v2782_v17 = vld [vmem:[%s3521_s0 + $0x38] sm:$0xff]  }
   0x7   :  { %2702 = vmatmul.mubr.msk.bf16.vlgmr.msra.gmra.mxu1 %vm319_vm0, %v2770_v5  ;;  %2639 = vmatprep.mubr.msk.bf16.mxu0 %vm319_vm0, %v2771_v6  ;;  %v2783_v18 = vld [vmem:[%s3520_s1 + $0x40] sm:$0xff]   ;;  %v2785_v20 = vld [vmem:[%s3520_s1 + $0x48] sm:$0xff]   ;;  %v2787_v22 = vld [vmem:[%s3520_s1 + $0x50] sm:$0xff]  }
   0x8   :  { %2705 = vmatprep.mubr.msk.bf16.mxu1 %vm319_vm0, %v2772_v7  ;;  %v2784_v19 = vld [vmem:[%s3521_s0 + $0x40] sm:$0xff]   ;;  %v2786_v21 = vld [vmem:[%s3521_s0 + $0x48] sm:$0xff]   ;;  %v2788_v23 = vld [vmem:[%s3521_s0 + $0x50] sm:$0xff]  }
   0x9   :  { %v2789_v24 = vld [vmem:[%s3520_s1 + $0x58] sm:$0xff]   ;;  %v2791_v26 = vld [vmem:[%s3520_s1 + $0x60] sm:$0xff]   ;;  %v2793_v28 = vld [vmem:[%s3520_s1 + $0x68] sm:$0xff]  }
   0xa   :  { %v2790_v25 = vld [vmem:[%s3521_s0 + $0x58] sm:$0xff]   ;;  %v2792_v27 = vld [vmem:[%s3521_s0 + $0x60] sm:$0xff]   ;;  %v2794_v29 = vld [vmem:[%s3521_s0 + $0x68] sm:$0xff]  }
   0xb   :  { %v2795_v30 = vld [vmem:[%s3520_s1 + $0x70] sm:$0xff]   ;;  %v2797_v32 = vld [vmem:[%s3520_s1 + $0x78] sm:$0xff]   ;;  %v2799_v34 = vld [vmem:[%s3520_s1 + $0x80] sm:$0xff]  }
   0xc   :  { %v2796_v31 = vld [vmem:[%s3521_s0 + $0x70] sm:$0xff]   ;;  %v2798_v33 = vld [vmem:[%s3521_s0 + $0x78] sm:$0xff]   ;;  %v2800_v35 = vld [vmem:[%s3521_s0 + $0x80] sm:$0xff]  }
   0xd   :  { %v2801_v36 = vld [vmem:[%s3520_s1 + $0x88] sm:$0xff]   ;;  %v2803_v38 = vld [vmem:[%s3520_s1 + $0x90] sm:$0xff]   ;;  %v2805_v40 = vld [vmem:[%s3520_s1 + $0x98] sm:$0xff]  }
   0xe   :  { %2640 = vmatmul.mubr.msk.bf16.gmra.mxu0 %vm319_vm0, %v2773_v8  ;;  %v2802_v37 = vld [vmem:[%s3521_s0 + $0x88] sm:$0xff]   ;;  %v2804_v39 = vld [vmem:[%s3521_s0 + $0x90] sm:$0xff]   ;;  %v2806_v41 = vld [vmem:[%s3521_s0 + $0x98] sm:$0xff]  }
   0xf   :  { %2706 = vmatmul.mubr.msk.bf16.gmra.mxu1 %vm319_vm0, %v2774_v9  ;;  %2643 = vmatprep.mubr.msk.bf16.mxu0 %vm319_vm0, %v2775_v10  ;;  %v2807_v42 = vld [vmem:[%s3520_s1 + $0xa0] sm:$0xff]   ;;  %v2809_v44 = vld [vmem:[%s3520_s1 + $0xa8] sm:$0xff]   ;;  %v2811_v46 = vld [vmem:[%s3520_s1 + $0xb0] sm:$0xff]  }
  0x10   :  { %2709 = vmatprep.mubr.msk.bf16.mxu1 %vm319_vm0, %v2776_v11  ;;  %v2808_v43 = vld [vmem:[%s3521_s0 + $0xa0] sm:$0xff]   ;;  %v2810_v45 = vld [vmem:[%s3521_s0 + $0xa8] sm:$0xff]   ;;  %v2812_v47 = vld [vmem:[%s3521_s0 + $0xb0] sm:$0xff]  }
  0x11   :  { %v2813_v48 = vld [vmem:[%s3520_s1 + $0xb8] sm:$0xff]   ;;  %v2815_v50 = vld [vmem:[%s3520_s1 + $0xc0] sm:$0xff]   ;;  %v2817_v52 = vld [vmem:[%s3520_s1 + $0xc8] sm:$0xff]  }
  0x12   :  { %v2814_v49 = vld [vmem:[%s3521_s0 + $0xb8] sm:$0xff]   ;;  %v2816_v51 = vld [vmem:[%s3521_s0 + $0xc0] sm:$0xff]   ;;  %v2818_v53 = vld [vmem:[%s3521_s0 + $0xc8] sm:$0xff]  }
  0x13   :  { %v2819_v54 = vld [vmem:[%s3520_s1 + $0xd0] sm:$0xff]   ;;  %v2821_v56 = vld [vmem:[%s3520_s1 + $0xd8] sm:$0xff]   ;;  %v2823_v58 = vld [vmem:[%s3520_s1 + $0xe0] sm:$0xff]  }
  0x14   :  { %v2820_v55 = vld [vmem:[%s3521_s0 + $0xd0] sm:$0xff]   ;;  %v2822_v57 = vld [vmem:[%s3521_s0 + $0xd8] sm:$0xff]   ;;  %v2824_v59 = vld [vmem:[%s3521_s0 + $0xe0] sm:$0xff]  }
  0x15   :  { %v2825_v60 = vld [vmem:[%s3520_s1 + $0xe8] sm:$0xff]   ;;  %v2827_v62 = vld [vmem:[%s3520_s1 + $0xf0] sm:$0xff]   ;;  %v2829_v0 = vld [vmem:[%s3520_s1 + $0xf8] sm:$0xff]  }
  0x16   :  { %2644 = vmatmul.mubr.msk.bf16.gmra.mxu0 %vm319_vm0, %v2777_v12  ;;  %v2826_v61 = vld [vmem:[%s3521_s0 + $0xe8] sm:$0xff]   ;;  %v2828_v63 = vld [vmem:[%s3521_s0 + $0xf0] sm:$0xff]   ;;  %v2830_v1 = vld [vmem:[%s3521_s0 + $0xf8] sm:$0xff]  }
  0x17   :  { %2710 = vmatmul.mubr.msk.bf16.gmra.mxu1 %vm319_vm0, %v2778_v13  ;;  %2647 = vmatprep.mubr.msk.bf16.mxu0 %vm319_vm0, %v2779_v14 }
  0x18   :  { %2713 = vmatprep.mubr.msk.bf16.mxu1 %vm319_vm0, %v2780_v15 }
  0x1e   :  { %2648 = vmatmul.mubr.msk.bf16.gmra.mxu0 %vm319_vm0, %v2781_v16 }
  0x1f   :  { %2714 = vmatmul.mubr.msk.bf16.gmra.mxu1 %vm319_vm0, %v2782_v17  ;;  %2651 = vmatprep.mubr.msk.bf16.mxu0 %vm319_vm0, %v2783_v18 }
  0x20   :  { %2717 = vmatprep.mubr.msk.bf16.mxu1 %vm319_vm0, %v2784_v19 }
  0x26   :  { %2652 = vmatmul.mubr.msk.bf16.gmra.mxu0 %vm319_vm0, %v2785_v20 }
  0x27   :  { %2718 = vmatmul.mubr.msk.bf16.gmra.mxu1 %vm319_vm0, %v2786_v21  ;;  %2655 = vmatprep.mubr.msk.bf16.mxu0 %vm319_vm0, %v2787_v22 }
  0x28   :  { %2721 = vmatprep.mubr.msk.bf16.mxu1 %vm319_vm0, %v2788_v23 }
  0x2e   :  { %2656 = vmatmul.mubr.msk.bf16.gmra.mxu0 %vm319_vm0, %v2789_v24 }
  0x2f   :  { %2722 = vmatmul.mubr.msk.bf16.gmra.mxu1 %vm319_vm0, %v2790_v25  ;;  %2659 = vmatprep.mubr.msk.bf16.mxu0 %vm319_vm0, %v2791_v26 }
  0x30   :  { %2725 = vmatprep.mubr.msk.bf16.mxu1 %vm319_vm0, %v2792_v27 }
  0x36   :  { %2660 = vmatmul.mubr.msk.bf16.gmra.mxu0 %vm319_vm0, %v2793_v28 }
  0x37   :  { %2726 = vmatmul.mubr.msk.bf16.gmra.mxu1 %vm319_vm0, %v2794_v29  ;;  %2663 = vmatprep.mubr.msk.bf16.mxu0 %vm319_vm0, %v2795_v30 }
  0x38   :  { %2729 = vmatprep.mubr.msk.bf16.mxu1 %vm319_vm0, %v2796_v31 }
  0x3e   :  { %2664 = vmatmul.mubr.msk.bf16.gmra.mxu0 %vm319_vm0, %v2797_v32 }
  0x3f   :  { %2730 = vmatmul.mubr.msk.bf16.gmra.mxu1 %vm319_vm0, %v2798_v33  ;;  %2667 = vmatprep.mubr.msk.bf16.mxu0 %vm319_vm0, %v2799_v34 }
  0x40   :  { %2733 = vmatprep.mubr.msk.bf16.mxu1 %vm319_vm0, %v2800_v35 }
  0x46   :  { %2668 = vmatmul.mubr.msk.bf16.gmra.mxu0 %vm319_vm0, %v2801_v36 }
  0x47   :  { %2734 = vmatmul.mubr.msk.bf16.gmra.mxu1 %vm319_vm0, %v2802_v37  ;;  %2671 = vmatprep.mubr.msk.bf16.mxu0 %vm319_vm0, %v2803_v38 }
  0x48   :  { %2737 = vmatprep.mubr.msk.bf16.mxu1 %vm319_vm0, %v2804_v39 }
  0x4e   :  { %2672 = vmatmul.mubr.msk.bf16.gmra.mxu0 %vm319_vm0, %v2805_v40 }
  0x4f   :  { %2738 = vmatmul.mubr.msk.bf16.gmra.mxu1 %vm319_vm0, %v2806_v41  ;;  %2675 = vmatprep.mubr.msk.bf16.mxu0 %vm319_vm0, %v2807_v42 }
  0x50   :  { %2741 = vmatprep.mubr.msk.bf16.mxu1 %vm319_vm0, %v2808_v43 }
  0x56   :  { %2676 = vmatmul.mubr.msk.bf16.gmra.mxu0 %vm319_vm0, %v2809_v44 }
  0x57   :  { %2742 = vmatmul.mubr.msk.bf16.gmra.mxu1 %vm319_vm0, %v2810_v45  ;;  %2679 = vmatprep.mubr.msk.bf16.mxu0 %vm319_vm0, %v2811_v46 }
  0x58   :  { %2745 = vmatprep.mubr.msk.bf16.mxu1 %vm319_vm0, %v2812_v47 }
  0x5e   :  { %2680 = vmatmul.mubr.msk.bf16.gmra.mxu0 %vm319_vm0, %v2813_v48 }
  0x5f   :  { %2746 = vmatmul.mubr.msk.bf16.gmra.mxu1 %vm319_vm0, %v2814_v49  ;;  %2683 = vmatprep.mubr.msk.bf16.mxu0 %vm319_vm0, %v2815_v50 }
  0x60   :  { %2749 = vmatprep.mubr.msk.bf16.mxu1 %vm319_vm0, %v2816_v51 }
  0x66   :  { %2684 = vmatmul.mubr.msk.bf16.gmra.mxu0 %vm319_vm0, %v2817_v52 }
  0x67   :  { %2750 = vmatmul.mubr.msk.bf16.gmra.mxu1 %vm319_vm0, %v2818_v53  ;;  %2687 = vmatprep.mubr.msk.bf16.mxu0 %vm319_vm0, %v2819_v54 }
  0x68   :  { %2753 = vmatprep.mubr.msk.bf16.mxu1 %vm319_vm0, %v2820_v55 }
  0x6e   :  { %2688 = vmatmul.mubr.msk.bf16.gmra.mxu0 %vm319_vm0, %v2821_v56 }
  0x6f   :  { %2754 = vmatmul.mubr.msk.bf16.gmra.mxu1 %vm319_vm0, %v2822_v57  ;;  %2691 = vmatprep.mubr.msk.bf16.mxu0 %vm319_vm0, %v2823_v58 }
  0x70   :  { %2757 = vmatprep.mubr.msk.bf16.mxu1 %vm319_vm0, %v2824_v59 }
  0x76   :  { %2692 = vmatmul.mubr.msk.bf16.gmra.mxu0 %vm319_vm0, %v2825_v60 }
  0x77   :  { %2758 = vmatmul.mubr.msk.bf16.gmra.mxu1 %vm319_vm0, %v2826_v61  ;;  %2695 = vmatprep.mubr.msk.bf16.mxu0 %vm319_vm0, %v2827_v62 }
  0x78   :  { %2761 = vmatprep.mubr.msk.bf16.mxu1 %vm319_vm0, %v2828_v63 }
  0x7e   :  { %2696 = vmatmul.mubr.msk.bf16.gmra.mxu0 %vm319_vm0, %v2829_v0 }
  0x7f   :  { %2762 = vmatmul.mubr.msk.bf16.gmra.mxu1 %vm319_vm0, %v2830_v1 }
  0xc6   :  { %v2637_v2 = vpop.f32.mrf.mxu0 }
  0xc7   :  { %v2703_v3 = vpop.f32.mrf.mxu1 }
  0xc8   :  { %v1010_v4 = vadd.f32 %v2703_v3, %v2637_v2  ;;  %v450_v5 = vpop.f32.mrf.mxu0 }
  0xc9   :  { %v1001_v6 = vpop.f32.mrf.mxu1 }
  0xca   :  { %v2505_v7 = vpack.c.bf16 %v1010_v4, %v1010_v4  ;;  %v1002_v8 = vadd.f32 %v1001_v6, %v450_v5  ;;  %v2638_v9 = vpop.f32.mrf.mxu0  ;;  %v2101_v18 = vmul.f32 %v1010_v4, %v1010_v4  ;;  %v1967_v27 = vsel %vm319_vm0, %v1010_v4, 0.0 }
  0xcb   :  { %v2704_v10 = vpop.f32.mrf.mxu1 }
  0xcc   :  { %1515 = vst.msk [vmem:[%s3522_s4 + $0x8] sm:$0xf] %vm1512_vm1, %v2505_v7  ;;  %v2503_v11 = vpack.c.bf16 %v1002_v8, %v1002_v8  ;;  %v453_v12 = vpop.f32.mrf.mxu0  ;;  %v1013_v13 = vadd.f32 %v2704_v10, %v2638_v9  ;;  %v2099_v15 = vmul.f32 %v1002_v8, %v1002_v8  ;;  %v1964_v19 = vsel %vm319_vm0, %v1002_v8, 0.0 }
  0xcd   :  { %v1004_v14 = vpop.f32.mrf.mxu1  ;;  %v2166_v39 = vsel %vm319_vm0, %v2101_v18, 0.0 }
  0xce   :  { %1513 = vst.msk [vmem:[%s3522_s4] sm:$0xf] %vm1512_vm1, %v2503_v11  ;;  %v1005_v16 = vadd.f32 %v1004_v14, %v453_v12  ;;  %v2641_v17 = vpop.f32.mrf.mxu0  ;;  %v2506_v20 = vpack.c.bf16 %v1013_v13, %v1013_v13  ;;  %v2163_v30 = vsel %vm319_vm0, %v2099_v15, 0.0  ;;  %v2102_v31 = vmul.f32 %v1013_v13, %v1013_v13 }
  0xcf   :  { %v2707_v21 = vpop.f32.mrf.mxu1  ;;  %v1969_v40 = vsel %vm319_vm0, %v1013_v13, 0.0 }
  0xd0   :  { %v2504_v22 = vpack.c.bf16 %v1005_v16, %v1005_v16  ;;  %v1965_v23 = vsel %vm319_vm0, %v1005_v16, 0.0  ;;  %v2100_v24 = vmul.f32 %v1005_v16, %v1005_v16  ;;  %v1026_v25 = vadd.f32 %v2707_v21, %v2641_v17  ;;  %v466_v26 = vpop.f32.mrf.mxu0  ;;  %1516 = vst.msk [vmem:[%s3522_s4 + $0xc] sm:$0xf] %vm1512_vm1, %v2506_v20 }
  0xd1   :  { %v1966_v28 = vadd.f32 %v1965_v23, %v1964_v19  ;;  %v1017_v29 = vpop.f32.mrf.mxu1  ;;  %v2168_v47 = vsel %vm319_vm0, %v2102_v31, 0.0 }
  0xd2   :  { %1514 = vst.msk [vmem:[%s3522_s4 + $0x4] sm:$0xf] %vm1512_vm1, %v2504_v22  ;;  %v2164_v32 = vsel %vm319_vm0, %v2100_v24, 0.0  ;;  %v2509_v33 = vpack.c.bf16 %v1026_v25, %v1026_v25  ;;  %v2642_v34 = vpop.f32.mrf.mxu0  ;;  %v1018_v37 = vadd.f32 %v1017_v29, %v466_v26  ;;  %v2105_v56 = vmul.f32 %v1026_v25, %v1026_v25 }
  0xd3   :  { %v1968_v35 = vadd.f32 %v1967_v27, %v1966_v28  ;;  %v2165_v36 = vadd.f32 %v2164_v32, %v2163_v30  ;;  %v2708_v38 = vpop.f32.mrf.mxu1  ;;  %v1975_v4 = vsel %vm319_vm0, %v1026_v25, 0.0 }
  0xd4   :  { %1519 = vst.msk [vmem:[%s3522_s4 + $0x18] sm:$0xf] %vm1512_vm1, %v2509_v33  ;;  %v1029_v41 = vadd.f32 %v2708_v38, %v2642_v34  ;;  %v469_v42 = vpop.f32.mrf.mxu0  ;;  %v2507_v44 = vpack.c.bf16 %v1018_v37, %v1018_v37  ;;  %v1971_v48 = vsel %vm319_vm0, %v1018_v37, 0.0  ;;  %v2103_v49 = vmul.f32 %v1018_v37, %v1018_v37 }
  0xd5   :  { %v2167_v43 = vadd.f32 %v2166_v39, %v2165_v36  ;;  %v1970_v45 = vadd.f32 %v1969_v40, %v1968_v35  ;;  %v1020_v46 = vpop.f32.mrf.mxu1  ;;  %v2174_v13 = vsel %vm319_vm0, %v2105_v56, 0.0 }
  0xd6   :  { %v2510_v50 = vpack.c.bf16 %v1029_v41, %v1029_v41  ;;  %v2645_v51 = vpop.f32.mrf.mxu0  ;;  %1517 = vst.msk [vmem:[%s3522_s4 + $0x10] sm:$0xf] %vm1512_vm1, %v2507_v44  ;;  %v1021_v54 = vadd.f32 %v1020_v46, %v469_v42  ;;  %v2170_v57 = vsel %vm319_vm0, %v2103_v49, 0.0  ;;  %v2106_v5 = vmul.f32 %v1029_v41, %v1029_v41 }
  0xd7   :  { %v1972_v52 = vadd.f32 %v1971_v48, %v1970_v45  ;;  %v2169_v53 = vadd.f32 %v2168_v47, %v2167_v43  ;;  %v2711_v55 = vpop.f32.mrf.mxu1  ;;  %v1977_v14 = vsel %vm319_vm0, %v1029_v41, 0.0 }
  0xd8   :  { %1520 = vst.msk [vmem:[%s3522_s4 + $0x1c] sm:$0xf] %vm1512_vm1, %v2510_v50  ;;  %v1042_v58 = vadd.f32 %v2711_v55, %v2645_v51  ;;  %v482_v59 = vpop.f32.mrf.mxu0  ;;  %v2508_v61 = vpack.c.bf16 %v1021_v54, %v1021_v54  ;;  %v1973_v62 = vsel %vm319_vm0, %v1021_v54, 0.0  ;;  %v2104_v63 = vmul.f32 %v1021_v54, %v1021_v54 }
  0xd9   :  { %v2171_v60 = vadd.f32 %v2170_v57, %v2169_v53  ;;  %v1033_v0 = vpop.f32.mrf.mxu1  ;;  %v1974_v1 = vadd.f32 %v1973_v62, %v1972_v52  ;;  %v2176_v22 = vsel %vm319_vm0, %v2106_v5, 0.0 }
  0xda   :  { %v2513_v2 = vpack.c.bf16 %v1042_v58, %v1042_v58  ;;  %v2646_v3 = vpop.f32.mrf.mxu0  ;;  %1518 = vst.msk [vmem:[%s3522_s4 + $0x14] sm:$0xf] %vm1512_vm1, %v2508_v61  ;;  %v2172_v6 = vsel %vm319_vm0, %v2104_v63, 0.0  ;;  %v1034_v7 = vadd.f32 %v1033_v0, %v482_v59  ;;  %v2109_v26 = vmul.f32 %v1042_v58, %v1042_v58 }
  0xdb   :  { %v2712_v8 = vpop.f32.mrf.mxu1  ;;  %v1976_v9 = vadd.f32 %v1975_v4, %v1974_v1  ;;  %v2173_v10 = vadd.f32 %v2172_v6, %v2171_v60  ;;  %v1983_v40 = vsel %vm319_vm0, %v1042_v58, 0.0 }
  0xdc   :  { %1523 = vst.msk [vmem:[%s3522_s4 + $0x28] sm:$0xf] %vm1512_vm1, %v2513_v2  ;;  %v1045_v11 = vadd.f32 %v2712_v8, %v2646_v3  ;;  %v485_v12 = vpop.f32.mrf.mxu0  ;;  %v2511_v15 = vpack.c.bf16 %v1034_v7, %v1034_v7  ;;  %v2107_v16 = vmul.f32 %v1034_v7, %v1034_v7  ;;  %v1979_v23 = vsel %vm319_vm0, %v1034_v7, 0.0 }
  0xdd   :  { %v1036_v17 = vpop.f32.mrf.mxu1  ;;  %v2175_v18 = vadd.f32 %v2174_v13, %v2173_v10  ;;  %v1978_v19 = vadd.f32 %v1977_v14, %v1976_v9  ;;  %v2182_v49 = vsel %vm319_vm0, %v2109_v26, 0.0 }
  0xde   :  { %v2514_v20 = vpack.c.bf16 %v1045_v11, %v1045_v11  ;;  %v2649_v21 = vpop.f32.mrf.mxu0  ;;  %1521 = vst.msk [vmem:[%s3522_s4 + $0x20] sm:$0xf] %vm1512_vm1, %v2511_v15  ;;  %v1037_v24 = vadd.f32 %v1036_v17, %v485_v12  ;;  %v2178_v31 = vsel %vm319_vm0, %v2107_v16, 0.0  ;;  %v2110_v41 = vmul.f32 %v1045_v11, %v1045_v11 }
  0xdf   :  { %v2715_v25 = vpop.f32.mrf.mxu1  ;;  %v1980_v27 = vadd.f32 %v1979_v23, %v1978_v19  ;;  %v2177_v28 = vadd.f32 %v2176_v22, %v2175_v18  ;;  %v1985_v50 = vsel %vm319_vm0, %v1045_v11, 0.0 }
  0xe0   :  { %1524 = vst.msk [vmem:[%s3522_s4 + $0x2c] sm:$0xf] %vm1512_vm1, %v2514_v20  ;;  %v1058_v29 = vadd.f32 %v2715_v25, %v2649_v21  ;;  %v498_v30 = vpop.f32.mrf.mxu0  ;;  %v2512_v32 = vpack.c.bf16 %v1037_v24, %v1037_v24  ;;  %v1981_v33 = vsel %vm319_vm0, %v1037_v24, 0.0  ;;  %v2108_v34 = vmul.f32 %v1037_v24, %v1037_v24 }
  0xe1   :  { %v1049_v35 = vpop.f32.mrf.mxu1  ;;  %v2179_v36 = vadd.f32 %v2178_v31, %v2177_v28  ;;  %v1982_v37 = vadd.f32 %v1981_v33, %v1980_v27  ;;  %v2184_v58 = vsel %vm319_vm0, %v2110_v41, 0.0 }
  0xe2   :  { %v2517_v38 = vpack.c.bf16 %v1058_v29, %v1058_v29  ;;  %v2650_v39 = vpop.f32.mrf.mxu0  ;;  %1522 = vst.msk [vmem:[%s3522_s4 + $0x24] sm:$0xf] %vm1512_vm1, %v2512_v32  ;;  %v2180_v42 = vsel %vm319_vm0, %v2108_v34, 0.0  ;;  %v1050_v43 = vadd.f32 %v1049_v35, %v498_v30  ;;  %v2113_v62 = vmul.f32 %v1058_v29, %v1058_v29 }
  0xe3   :  { %v2716_v44 = vpop.f32.mrf.mxu1  ;;  %v1984_v45 = vadd.f32 %v1983_v40, %v1982_v37  ;;  %v2181_v46 = vadd.f32 %v2180_v42, %v2179_v36  ;;  %v1991_v12 = vsel %vm319_vm0, %v1058_v29, 0.0 }
  0xe4   :  { %1527 = vst.msk [vmem:[%s3522_s4 + $0x38] sm:$0xf] %vm1512_vm1, %v2517_v38  ;;  %v1061_v47 = vadd.f32 %v2716_v44, %v2650_v39  ;;  %v501_v48 = vpop.f32.mrf.mxu0  ;;  %v2515_v51 = vpack.c.bf16 %v1050_v43, %v1050_v43  ;;  %v2111_v52 = vmul.f32 %v1050_v43, %v1050_v43  ;;  %v1987_v59 = vsel %vm319_vm0, %v1050_v43, 0.0 }
  0xe5   :  { %v1052_v53 = vpop.f32.mrf.mxu1  ;;  %v2183_v54 = vadd.f32 %v2182_v49, %v2181_v46  ;;  %v1986_v55 = vadd.f32 %v1985_v50, %v1984_v45  ;;  %v2190_v21 = vsel %vm319_vm0, %v2113_v62, 0.0 }
  0xe6   :  { %v2518_v56 = vpack.c.bf16 %v1061_v47, %v1061_v47  ;;  %v2653_v57 = vpop.f32.mrf.mxu0  ;;  %1525 = vst.msk [vmem:[%s3522_s4 + $0x30] sm:$0xf] %vm1512_vm1, %v2515_v51  ;;  %v1053_v60 = vadd.f32 %v1052_v53, %v501_v48  ;;  %v2186_v3 = vsel %vm319_vm0, %v2111_v52, 0.0  ;;  %v2114_v13 = vmul.f32 %v1061_v47, %v1061_v47 }
  0xe7   :  { %v2719_v61 = vpop.f32.mrf.mxu1  ;;  %v1988_v63 = vadd.f32 %v1987_v59, %v1986_v55  ;;  %v2185_v0 = vadd.f32 %v2184_v58, %v2183_v54  ;;  %v1993_v22 = vsel %vm319_vm0, %v1061_v47, 0.0 }
  0xe8   :  { %1528 = vst.msk [vmem:[%s3522_s4 + $0x3c] sm:$0xf] %vm1512_vm1, %v2518_v56  ;;  %v1074_v1 = vadd.f32 %v2719_v61, %v2653_v57  ;;  %v514_v2 = vpop.f32.mrf.mxu0  ;;  %v2516_v4 = vpack.c.bf16 %v1053_v60, %v1053_v60  ;;  %v1989_v5 = vsel %vm319_vm0, %v1053_v60, 0.0  ;;  %v2112_v6 = vmul.f32 %v1053_v60, %v1053_v60 }
  0xe9   :  { %v1065_v7 = vpop.f32.mrf.mxu1  ;;  %v2187_v8 = vadd.f32 %v2186_v3, %v2185_v0  ;;  %v1990_v9 = vadd.f32 %v1989_v5, %v1988_v63  ;;  %v2192_v30 = vsel %vm319_vm0, %v2114_v13, 0.0 }
  0xea   :  { %v2521_v10 = vpack.c.bf16 %v1074_v1, %v1074_v1  ;;  %v2654_v11 = vpop.f32.mrf.mxu0  ;;  %1526 = vst.msk [vmem:[%s3522_s4 + $0x34] sm:$0xf] %vm1512_vm1, %v2516_v4  ;;  %v2188_v14 = vsel %vm319_vm0, %v2112_v6, 0.0  ;;  %v1066_v15 = vadd.f32 %v1065_v7, %v514_v2  ;;  %v2117_v34 = vmul.f32 %v1074_v1, %v1074_v1 }
  0xeb   :  { %v2720_v16 = vpop.f32.mrf.mxu1  ;;  %v1992_v17 = vadd.f32 %v1991_v12, %v1990_v9  ;;  %v2189_v18 = vadd.f32 %v2188_v14, %v2187_v8  ;;  %v1999_v48 = vsel %vm319_vm0, %v1074_v1, 0.0 }
  0xec   :  { %1531 = vst.msk [vmem:[%s3522_s4 + $0x48] sm:$0xf] %vm1512_vm1, %v2521_v10  ;;  %v1077_v19 = vadd.f32 %v2720_v16, %v2654_v11  ;;  %v517_v20 = vpop.f32.mrf.mxu0  ;;  %v2519_v23 = vpack.c.bf16 %v1066_v15, %v1066_v15  ;;  %v2115_v24 = vmul.f32 %v1066_v15, %v1066_v15  ;;  %v1995_v31 = vsel %vm319_vm0, %v1066_v15, 0.0 }
  0xed   :  { %v1068_v25 = vpop.f32.mrf.mxu1  ;;  %v2191_v26 = vadd.f32 %v2190_v21, %v2189_v18  ;;  %v1994_v27 = vadd.f32 %v1993_v22, %v1992_v17  ;;  %v2198_v57 = vsel %vm319_vm0, %v2117_v34, 0.0 }
  0xee   :  { %v2522_v28 = vpack.c.bf16 %v1077_v19, %v1077_v19  ;;  %v2657_v29 = vpop.f32.mrf.mxu0  ;;  %1529 = vst.msk [vmem:[%s3522_s4 + $0x40] sm:$0xf] %vm1512_vm1, %v2519_v23  ;;  %v1069_v32 = vadd.f32 %v1068_v25, %v517_v20  ;;  %v2194_v39 = vsel %vm319_vm0, %v2115_v24, 0.0  ;;  %v2118_v49 = vmul.f32 %v1077_v19, %v1077_v19 }
  0xef   :  { %v2723_v33 = vpop.f32.mrf.mxu1  ;;  %v1996_v35 = vadd.f32 %v1995_v31, %v1994_v27  ;;  %v2193_v36 = vadd.f32 %v2192_v30, %v2191_v26  ;;  %v2001_v58 = vsel %vm319_vm0, %v1077_v19, 0.0 }
  0xf0   :  { %1532 = vst.msk [vmem:[%s3522_s4 + $0x4c] sm:$0xf] %vm1512_vm1, %v2522_v28  ;;  %v1090_v37 = vadd.f32 %v2723_v33, %v2657_v29  ;;  %v530_v38 = vpop.f32.mrf.mxu0  ;;  %v2520_v40 = vpack.c.bf16 %v1069_v32, %v1069_v32  ;;  %v1997_v41 = vsel %vm319_vm0, %v1069_v32, 0.0  ;;  %v2116_v42 = vmul.f32 %v1069_v32, %v1069_v32 }
  0xf1   :  { %v1081_v43 = vpop.f32.mrf.mxu1  ;;  %v2195_v44 = vadd.f32 %v2194_v39, %v2193_v36  ;;  %v1998_v45 = vadd.f32 %v1997_v41, %v1996_v35  ;;  %v2200_v2 = vsel %vm319_vm0, %v2118_v49, 0.0 }
  0xf2   :  { %v2525_v46 = vpack.c.bf16 %v1090_v37, %v1090_v37  ;;  %v2658_v47 = vpop.f32.mrf.mxu0  ;;  %1530 = vst.msk [vmem:[%s3522_s4 + $0x44] sm:$0xf] %vm1512_vm1, %v2520_v40  ;;  %v2196_v50 = vsel %vm319_vm0, %v2116_v42, 0.0  ;;  %v1082_v51 = vadd.f32 %v1081_v43, %v530_v38  ;;  %v2121_v6 = vmul.f32 %v1090_v37, %v1090_v37 }
  0xf3   :  { %v2724_v52 = vpop.f32.mrf.mxu1  ;;  %v2000_v53 = vadd.f32 %v1999_v48, %v1998_v45  ;;  %v2197_v54 = vadd.f32 %v2196_v50, %v2195_v44  ;;  %v2007_v20 = vsel %vm319_vm0, %v1090_v37, 0.0 }
  0xf4   :  { %1535 = vst.msk [vmem:[%s3522_s4 + $0x58] sm:$0xf] %vm1512_vm1, %v2525_v46  ;;  %v1093_v55 = vadd.f32 %v2724_v52, %v2658_v47  ;;  %v533_v56 = vpop.f32.mrf.mxu0  ;;  %v2523_v59 = vpack.c.bf16 %v1082_v51, %v1082_v51  ;;  %v2119_v60 = vmul.f32 %v1082_v51, %v1082_v51  ;;  %v2003_v3 = vsel %vm319_vm0, %v1082_v51, 0.0 }
  0xf5   :  { %v1084_v61 = vpop.f32.mrf.mxu1  ;;  %v2199_v62 = vadd.f32 %v2198_v57, %v2197_v54  ;;  %v2002_v63 = vadd.f32 %v2001_v58, %v2000_v53  ;;  %v2206_v29 = vsel %vm319_vm0, %v2121_v6, 0.0 }
  0xf6   :  { %v2526_v0 = vpack.c.bf16 %v1093_v55, %v1093_v55  ;;  %v2661_v1 = vpop.f32.mrf.mxu0  ;;  %1533 = vst.msk [vmem:[%s3522_s4 + $0x50] sm:$0xf] %vm1512_vm1, %v2523_v59  ;;  %v1085_v4 = vadd.f32 %v1084_v61, %v533_v56  ;;  %v2202_v11 = vsel %vm319_vm0, %v2119_v60, 0.0  ;;  %v2122_v21 = vmul.f32 %v1093_v55, %v1093_v55 }
  0xf7   :  { %v2727_v5 = vpop.f32.mrf.mxu1  ;;  %v2004_v7 = vadd.f32 %v2003_v3, %v2002_v63  ;;  %v2201_v8 = vadd.f32 %v2200_v2, %v2199_v62  ;;  %v2009_v30 = vsel %vm319_vm0, %v1093_v55, 0.0 }
  0xf8   :  { %1536 = vst.msk [vmem:[%s3522_s4 + $0x5c] sm:$0xf] %vm1512_vm1, %v2526_v0  ;;  %v1106_v9 = vadd.f32 %v2727_v5, %v2661_v1  ;;  %v546_v10 = vpop.f32.mrf.mxu0  ;;  %v2524_v12 = vpack.c.bf16 %v1085_v4, %v1085_v4  ;;  %v2005_v13 = vsel %vm319_vm0, %v1085_v4, 0.0  ;;  %v2120_v14 = vmul.f32 %v1085_v4, %v1085_v4 }
  0xf9   :  { %v1097_v15 = vpop.f32.mrf.mxu1  ;;  %v2203_v16 = vadd.f32 %v2202_v11, %v2201_v8  ;;  %v2006_v17 = vadd.f32 %v2005_v13, %v2004_v7  ;;  %v2208_v38 = vsel %vm319_vm0, %v2122_v21, 0.0 }
  0xfa   :  { %v2529_v18 = vpack.c.bf16 %v1106_v9, %v1106_v9  ;;  %v2662_v19 = vpop.f32.mrf.mxu0  ;;  %1534 = vst.msk [vmem:[%s3522_s4 + $0x54] sm:$0xf] %vm1512_vm1, %v2524_v12  ;;  %v2204_v22 = vsel %vm319_vm0, %v2120_v14, 0.0  ;;  %v1098_v23 = vadd.f32 %v1097_v15, %v546_v10  ;;  %v2125_v42 = vmul.f32 %v1106_v9, %v1106_v9 }
  0xfb   :  { %v2728_v24 = vpop.f32.mrf.mxu1  ;;  %v2008_v25 = vadd.f32 %v2007_v20, %v2006_v17  ;;  %v2205_v26 = vadd.f32 %v2204_v22, %v2203_v16  ;;  %v2015_v56 = vsel %vm319_vm0, %v1106_v9, 0.0 }
  0xfc   :  { %1539 = vst.msk [vmem:[%s3522_s4 + $0x68] sm:$0xf] %vm1512_vm1, %v2529_v18  ;;  %v1109_v27 = vadd.f32 %v2728_v24, %v2662_v19  ;;  %v549_v28 = vpop.f32.mrf.mxu0  ;;  %v2527_v31 = vpack.c.bf16 %v1098_v23, %v1098_v23  ;;  %v2123_v32 = vmul.f32 %v1098_v23, %v1098_v23  ;;  %v2011_v39 = vsel %vm319_vm0, %v1098_v23, 0.0 }
  0xfd   :  { %v1100_v33 = vpop.f32.mrf.mxu1  ;;  %v2207_v34 = vadd.f32 %v2206_v29, %v2205_v26  ;;  %v2010_v35 = vadd.f32 %v2009_v30, %v2008_v25  ;;  %v2214_v1 = vsel %vm319_vm0, %v2125_v42, 0.0 }
  0xfe   :  { %v2530_v36 = vpack.c.bf16 %v1109_v27, %v1109_v27  ;;  %v2665_v37 = vpop.f32.mrf.mxu0  ;;  %1537 = vst.msk [vmem:[%s3522_s4 + $0x60] sm:$0xf] %vm1512_vm1, %v2527_v31  ;;  %v1101_v40 = vadd.f32 %v1100_v33, %v549_v28  ;;  %v2210_v47 = vsel %vm319_vm0, %v2123_v32, 0.0  ;;  %v2126_v57 = vmul.f32 %v1109_v27, %v1109_v27 }
  0xff   :  { %v2731_v41 = vpop.f32.mrf.mxu1  ;;  %v2012_v43 = vadd.f32 %v2011_v39, %v2010_v35  ;;  %v2209_v44 = vadd.f32 %v2208_v38, %v2207_v34  ;;  %v2017_v2 = vsel %vm319_vm0, %v1109_v27, 0.0 }
 0x100   :  { %1540 = vst.msk [vmem:[%s3522_s4 + $0x6c] sm:$0xf] %vm1512_vm1, %v2530_v36  ;;  %v1122_v45 = vadd.f32 %v2731_v41, %v2665_v37  ;;  %v562_v46 = vpop.f32.mrf.mxu0  ;;  %v2528_v48 = vpack.c.bf16 %v1101_v40, %v1101_v40  ;;  %v2013_v49 = vsel %vm319_vm0, %v1101_v40, 0.0  ;;  %v2124_v50 = vmul.f32 %v1101_v40, %v1101_v40 }
 0x101   :  { %v1113_v51 = vpop.f32.mrf.mxu1  ;;  %v2211_v52 = vadd.f32 %v2210_v47, %v2209_v44  ;;  %v2014_v53 = vadd.f32 %v2013_v49, %v2012_v43  ;;  %v2216_v10 = vsel %vm319_vm0, %v2126_v57, 0.0 }
 0x102   :  { %v2533_v54 = vpack.c.bf16 %v1122_v45, %v1122_v45  ;;  %v2666_v55 = vpop.f32.mrf.mxu0  ;;  %1538 = vst.msk [vmem:[%s3522_s4 + $0x64] sm:$0xf] %vm1512_vm1, %v2528_v48  ;;  %v2212_v58 = vsel %vm319_vm0, %v2124_v50, 0.0  ;;  %v1114_v59 = vadd.f32 %v1113_v51, %v562_v46  ;;  %v2129_v14 = vmul.f32 %v1122_v45, %v1122_v45 }
 0x103   :  { %v2732_v60 = vpop.f32.mrf.mxu1  ;;  %v2016_v61 = vadd.f32 %v2015_v56, %v2014_v53  ;;  %v2213_v62 = vadd.f32 %v2212_v58, %v2211_v52  ;;  %v2023_v28 = vsel %vm319_vm0, %v1122_v45, 0.0 }
 0x104   :  { %1543 = vst.msk [vmem:[%s3522_s4 + $0x78] sm:$0xf] %vm1512_vm1, %v2533_v54  ;;  %v1125_v63 = vadd.f32 %v2732_v60, %v2666_v55  ;;  %v565_v0 = vpop.f32.mrf.mxu0  ;;  %v2531_v3 = vpack.c.bf16 %v1114_v59, %v1114_v59  ;;  %v2127_v4 = vmul.f32 %v1114_v59, %v1114_v59  ;;  %v2019_v11 = vsel %vm319_vm0, %v1114_v59, 0.0 }
 0x105   :  { %v1116_v5 = vpop.f32.mrf.mxu1  ;;  %v2215_v6 = vadd.f32 %v2214_v1, %v2213_v62  ;;  %v2018_v7 = vadd.f32 %v2017_v2, %v2016_v61  ;;  %v2222_v37 = vsel %vm319_vm0, %v2129_v14, 0.0 }
 0x106   :  { %v2534_v8 = vpack.c.bf16 %v1125_v63, %v1125_v63  ;;  %v2669_v9 = vpop.f32.mrf.mxu0  ;;  %1541 = vst.msk [vmem:[%s3522_s4 + $0x70] sm:$0xf] %vm1512_vm1, %v2531_v3  ;;  %v1117_v12 = vadd.f32 %v1116_v5, %v565_v0  ;;  %v2218_v19 = vsel %vm319_vm0, %v2127_v4, 0.0  ;;  %v2130_v29 = vmul.f32 %v1125_v63, %v1125_v63 }
 0x107   :  { %v2735_v13 = vpop.f32.mrf.mxu1  ;;  %v2020_v15 = vadd.f32 %v2019_v11, %v2018_v7  ;;  %v2217_v16 = vadd.f32 %v2216_v10, %v2215_v6  ;;  %v2025_v38 = vsel %vm319_vm0, %v1125_v63, 0.0 }
 0x108   :  { %1544 = vst.msk [vmem:[%s3522_s4 + $0x7c] sm:$0xf] %vm1512_vm1, %v2534_v8  ;;  %v1138_v17 = vadd.f32 %v2735_v13, %v2669_v9  ;;  %v578_v18 = vpop.f32.mrf.mxu0  ;;  %v2532_v20 = vpack.c.bf16 %v1117_v12, %v1117_v12  ;;  %v2021_v21 = vsel %vm319_vm0, %v1117_v12, 0.0  ;;  %v2128_v22 = vmul.f32 %v1117_v12, %v1117_v12 }
 0x109   :  { %v1129_v23 = vpop.f32.mrf.mxu1  ;;  %v2219_v24 = vadd.f32 %v2218_v19, %v2217_v16  ;;  %v2022_v25 = vadd.f32 %v2021_v21, %v2020_v15  ;;  %v2224_v46 = vsel %vm319_vm0, %v2130_v29, 0.0 }
 0x10a   :  { %v2537_v26 = vpack.c.bf16 %v1138_v17, %v1138_v17  ;;  %v2670_v27 = vpop.f32.mrf.mxu0  ;;  %1542 = vst.msk [vmem:[%s3522_s4 + $0x74] sm:$0xf] %vm1512_vm1, %v2532_v20  ;;  %v2220_v30 = vsel %vm319_vm0, %v2128_v22, 0.0  ;;  %v1130_v31 = vadd.f32 %v1129_v23, %v578_v18  ;;  %v2133_v50 = vmul.f32 %v1138_v17, %v1138_v17 }
 0x10b   :  { %v2736_v32 = vpop.f32.mrf.mxu1  ;;  %v2024_v33 = vadd.f32 %v2023_v28, %v2022_v25  ;;  %v2221_v34 = vadd.f32 %v2220_v30, %v2219_v24  ;;  %v2031_v0 = vsel %vm319_vm0, %v1138_v17, 0.0 }
 0x10c   :  { %1547 = vst.msk [vmem:[%s3522_s4 + $0x88] sm:$0xf] %vm1512_vm1, %v2537_v26  ;;  %v1141_v35 = vadd.f32 %v2736_v32, %v2670_v27  ;;  %v581_v36 = vpop.f32.mrf.mxu0  ;;  %v2535_v39 = vpack.c.bf16 %v1130_v31, %v1130_v31  ;;  %v2131_v40 = vmul.f32 %v1130_v31, %v1130_v31  ;;  %v2027_v47 = vsel %vm319_vm0, %v1130_v31, 0.0 }
 0x10d   :  { %v1132_v41 = vpop.f32.mrf.mxu1  ;;  %v2223_v42 = vadd.f32 %v2222_v37, %v2221_v34  ;;  %v2026_v43 = vadd.f32 %v2025_v38, %v2024_v33  ;;  %v2230_v9 = vsel %vm319_vm0, %v2133_v50, 0.0 }
 0x10e   :  { %v2538_v44 = vpack.c.bf16 %v1141_v35, %v1141_v35  ;;  %v2673_v45 = vpop.f32.mrf.mxu0  ;;  %1545 = vst.msk [vmem:[%s3522_s4 + $0x80] sm:$0xf] %vm1512_vm1, %v2535_v39  ;;  %v1133_v48 = vadd.f32 %v1132_v41, %v581_v36  ;;  %v2226_v55 = vsel %vm319_vm0, %v2131_v40, 0.0  ;;  %v2134_v1 = vmul.f32 %v1141_v35, %v1141_v35 }
 0x10f   :  { %v2739_v49 = vpop.f32.mrf.mxu1  ;;  %v2028_v51 = vadd.f32 %v2027_v47, %v2026_v43  ;;  %v2225_v52 = vadd.f32 %v2224_v46, %v2223_v42  ;;  %v2033_v10 = vsel %vm319_vm0, %v1141_v35, 0.0 }
 0x110   :  { %1548 = vst.msk [vmem:[%s3522_s4 + $0x8c] sm:$0xf] %vm1512_vm1, %v2538_v44  ;;  %v1154_v53 = vadd.f32 %v2739_v49, %v2673_v45  ;;  %v594_v54 = vpop.f32.mrf.mxu0  ;;  %v2536_v56 = vpack.c.bf16 %v1133_v48, %v1133_v48  ;;  %v2029_v57 = vsel %vm319_vm0, %v1133_v48, 0.0  ;;  %v2132_v58 = vmul.f32 %v1133_v48, %v1133_v48 }
 0x111   :  { %v1145_v59 = vpop.f32.mrf.mxu1  ;;  %v2227_v60 = vadd.f32 %v2226_v55, %v2225_v52  ;;  %v2030_v61 = vadd.f32 %v2029_v57, %v2028_v51  ;;  %v2232_v18 = vsel %vm319_vm0, %v2134_v1, 0.0 }
 0x112   :  { %v2541_v62 = vpack.c.bf16 %v1154_v53, %v1154_v53  ;;  %v2674_v63 = vpop.f32.mrf.mxu0  ;;  %1546 = vst.msk [vmem:[%s3522_s4 + $0x84] sm:$0xf] %vm1512_vm1, %v2536_v56  ;;  %v2228_v2 = vsel %vm319_vm0, %v2132_v58, 0.0  ;;  %v1146_v3 = vadd.f32 %v1145_v59, %v594_v54  ;;  %v2137_v22 = vmul.f32 %v1154_v53, %v1154_v53 }
 0x113   :  { %v2740_v4 = vpop.f32.mrf.mxu1  ;;  %v2032_v5 = vadd.f32 %v2031_v0, %v2030_v61  ;;  %v2229_v6 = vadd.f32 %v2228_v2, %v2227_v60  ;;  %v2039_v36 = vsel %vm319_vm0, %v1154_v53, 0.0 }
 0x114   :  { %1551 = vst.msk [vmem:[%s3522_s4 + $0x98] sm:$0xf] %vm1512_vm1, %v2541_v62  ;;  %v1157_v7 = vadd.f32 %v2740_v4, %v2674_v63  ;;  %v597_v8 = vpop.f32.mrf.mxu0  ;;  %v2539_v11 = vpack.c.bf16 %v1146_v3, %v1146_v3  ;;  %v2135_v12 = vmul.f32 %v1146_v3, %v1146_v3  ;;  %v2035_v19 = vsel %vm319_vm0, %v1146_v3, 0.0 }
 0x115   :  { %v1148_v13 = vpop.f32.mrf.mxu1  ;;  %v2231_v14 = vadd.f32 %v2230_v9, %v2229_v6  ;;  %v2034_v15 = vadd.f32 %v2033_v10, %v2032_v5  ;;  %v2238_v45 = vsel %vm319_vm0, %v2137_v22, 0.0 }
 0x116   :  { %v2542_v16 = vpack.c.bf16 %v1157_v7, %v1157_v7  ;;  %v2677_v17 = vpop.f32.mrf.mxu0  ;;  %1549 = vst.msk [vmem:[%s3522_s4 + $0x90] sm:$0xf] %vm1512_vm1, %v2539_v11  ;;  %v1149_v20 = vadd.f32 %v1148_v13, %v597_v8  ;;  %v2234_v27 = vsel %vm319_vm0, %v2135_v12, 0.0  ;;  %v2138_v37 = vmul.f32 %v1157_v7, %v1157_v7 }
 0x117   :  { %v2743_v21 = vpop.f32.mrf.mxu1  ;;  %v2036_v23 = vadd.f32 %v2035_v19, %v2034_v15  ;;  %v2233_v24 = vadd.f32 %v2232_v18, %v2231_v14  ;;  %v2041_v46 = vsel %vm319_vm0, %v1157_v7, 0.0 }
 0x118   :  { %1552 = vst.msk [vmem:[%s3522_s4 + $0x9c] sm:$0xf] %vm1512_vm1, %v2542_v16  ;;  %v1170_v25 = vadd.f32 %v2743_v21, %v2677_v17  ;;  %v610_v26 = vpop.f32.mrf.mxu0  ;;  %v2540_v28 = vpack.c.bf16 %v1149_v20, %v1149_v20  ;;  %v2037_v29 = vsel %vm319_vm0, %v1149_v20, 0.0  ;;  %v2136_v30 = vmul.f32 %v1149_v20, %v1149_v20 }
 0x119   :  { %v1161_v31 = vpop.f32.mrf.mxu1  ;;  %v2235_v32 = vadd.f32 %v2234_v27, %v2233_v24  ;;  %v2038_v33 = vadd.f32 %v2037_v29, %v2036_v23  ;;  %v2240_v54 = vsel %vm319_vm0, %v2138_v37, 0.0 }
 0x11a   :  { %v2545_v34 = vpack.c.bf16 %v1170_v25, %v1170_v25  ;;  %v2678_v35 = vpop.f32.mrf.mxu0  ;;  %1550 = vst.msk [vmem:[%s3522_s4 + $0x94] sm:$0xf] %vm1512_vm1, %v2540_v28  ;;  %v2236_v38 = vsel %vm319_vm0, %v2136_v30, 0.0  ;;  %v1162_v39 = vadd.f32 %v1161_v31, %v610_v26  ;;  %v2141_v58 = vmul.f32 %v1170_v25, %v1170_v25 }
 0x11b   :  { %v2744_v40 = vpop.f32.mrf.mxu1  ;;  %v2040_v41 = vadd.f32 %v2039_v36, %v2038_v33  ;;  %v2237_v42 = vadd.f32 %v2236_v38, %v2235_v32  ;;  %v2047_v8 = vsel %vm319_vm0, %v1170_v25, 0.0 }
 0x11c   :  { %1555 = vst.msk [vmem:[%s3522_s4 + $0xa8] sm:$0xf] %vm1512_vm1, %v2545_v34  ;;  %v1173_v43 = vadd.f32 %v2744_v40, %v2678_v35  ;;  %v613_v44 = vpop.f32.mrf.mxu0  ;;  %v2543_v47 = vpack.c.bf16 %v1162_v39, %v1162_v39  ;;  %v2139_v48 = vmul.f32 %v1162_v39, %v1162_v39  ;;  %v2043_v55 = vsel %vm319_vm0, %v1162_v39, 0.0 }
 0x11d   :  { %v1164_v49 = vpop.f32.mrf.mxu1  ;;  %v2239_v50 = vadd.f32 %v2238_v45, %v2237_v42  ;;  %v2042_v51 = vadd.f32 %v2041_v46, %v2040_v41  ;;  %v2246_v17 = vsel %vm319_vm0, %v2141_v58, 0.0 }
 0x11e   :  { %v2546_v52 = vpack.c.bf16 %v1173_v43, %v1173_v43  ;;  %v2681_v53 = vpop.f32.mrf.mxu0  ;;  %1553 = vst.msk [vmem:[%s3522_s4 + $0xa0] sm:$0xf] %vm1512_vm1, %v2543_v47  ;;  %v1165_v56 = vadd.f32 %v1164_v49, %v613_v44  ;;  %v2242_v63 = vsel %vm319_vm0, %v2139_v48, 0.0  ;;  %v2142_v9 = vmul.f32 %v1173_v43, %v1173_v43 }
 0x11f   :  { %v2747_v57 = vpop.f32.mrf.mxu1  ;;  %v2044_v59 = vadd.f32 %v2043_v55, %v2042_v51  ;;  %v2241_v60 = vadd.f32 %v2240_v54, %v2239_v50  ;;  %v2049_v18 = vsel %vm319_vm0, %v1173_v43, 0.0 }
 0x120   :  { %1556 = vst.msk [vmem:[%s3522_s4 + $0xac] sm:$0xf] %vm1512_vm1, %v2546_v52  ;;  %v1186_v61 = vadd.f32 %v2747_v57, %v2681_v53  ;;  %v626_v62 = vpop.f32.mrf.mxu0  ;;  %v2544_v0 = vpack.c.bf16 %v1165_v56, %v1165_v56  ;;  %v2045_v1 = vsel %vm319_vm0, %v1165_v56, 0.0  ;;  %v2140_v2 = vmul.f32 %v1165_v56, %v1165_v56 }
 0x121   :  { %v1177_v3 = vpop.f32.mrf.mxu1  ;;  %v2243_v4 = vadd.f32 %v2242_v63, %v2241_v60  ;;  %v2046_v5 = vadd.f32 %v2045_v1, %v2044_v59  ;;  %v2248_v26 = vsel %vm319_vm0, %v2142_v9, 0.0 }
 0x122   :  { %v2549_v6 = vpack.c.bf16 %v1186_v61, %v1186_v61  ;;  %v2682_v7 = vpop.f32.mrf.mxu0  ;;  %1554 = vst.msk [vmem:[%s3522_s4 + $0xa4] sm:$0xf] %vm1512_vm1, %v2544_v0  ;;  %v2244_v10 = vsel %vm319_vm0, %v2140_v2, 0.0  ;;  %v1178_v11 = vadd.f32 %v1177_v3, %v626_v62  ;;  %v2145_v30 = vmul.f32 %v1186_v61, %v1186_v61 }
 0x123   :  { %v2748_v12 = vpop.f32.mrf.mxu1  ;;  %v2048_v13 = vadd.f32 %v2047_v8, %v2046_v5  ;;  %v2245_v14 = vadd.f32 %v2244_v10, %v2243_v4  ;;  %v2055_v44 = vsel %vm319_vm0, %v1186_v61, 0.0 }
 0x124   :  { %1559 = vst.msk [vmem:[%s3522_s4 + $0xb8] sm:$0xf] %vm1512_vm1, %v2549_v6  ;;  %v1189_v15 = vadd.f32 %v2748_v12, %v2682_v7  ;;  %v629_v16 = vpop.f32.mrf.mxu0  ;;  %v2547_v19 = vpack.c.bf16 %v1178_v11, %v1178_v11  ;;  %v2143_v20 = vmul.f32 %v1178_v11, %v1178_v11  ;;  %v2051_v27 = vsel %vm319_vm0, %v1178_v11, 0.0 }
 0x125   :  { %v1180_v21 = vpop.f32.mrf.mxu1  ;;  %v2247_v22 = vadd.f32 %v2246_v17, %v2245_v14  ;;  %v2050_v23 = vadd.f32 %v2049_v18, %v2048_v13  ;;  %v2254_v53 = vsel %vm319_vm0, %v2145_v30, 0.0 }
 0x126   :  { %v2550_v24 = vpack.c.bf16 %v1189_v15, %v1189_v15  ;;  %v2685_v25 = vpop.f32.mrf.mxu0  ;;  %1557 = vst.msk [vmem:[%s3522_s4 + $0xb0] sm:$0xf] %vm1512_vm1, %v2547_v19  ;;  %v1181_v28 = vadd.f32 %v1180_v21, %v629_v16  ;;  %v2250_v35 = vsel %vm319_vm0, %v2143_v20, 0.0  ;;  %v2146_v45 = vmul.f32 %v1189_v15, %v1189_v15 }
 0x127   :  { %v2751_v29 = vpop.f32.mrf.mxu1  ;;  %v2052_v31 = vadd.f32 %v2051_v27, %v2050_v23  ;;  %v2249_v32 = vadd.f32 %v2248_v26, %v2247_v22  ;;  %v2057_v54 = vsel %vm319_vm0, %v1189_v15, 0.0 }
 0x128   :  { %1560 = vst.msk [vmem:[%s3522_s4 + $0xbc] sm:$0xf] %vm1512_vm1, %v2550_v24  ;;  %v1202_v33 = vadd.f32 %v2751_v29, %v2685_v25  ;;  %v642_v34 = vpop.f32.mrf.mxu0  ;;  %v2548_v36 = vpack.c.bf16 %v1181_v28, %v1181_v28  ;;  %v2053_v37 = vsel %vm319_vm0, %v1181_v28, 0.0  ;;  %v2144_v38 = vmul.f32 %v1181_v28, %v1181_v28 }
 0x129   :  { %v1193_v39 = vpop.f32.mrf.mxu1  ;;  %v2251_v40 = vadd.f32 %v2250_v35, %v2249_v32  ;;  %v2054_v41 = vadd.f32 %v2053_v37, %v2052_v31  ;;  %v2256_v62 = vsel %vm319_vm0, %v2146_v45, 0.0 }
 0x12a   :  { %v2553_v42 = vpack.c.bf16 %v1202_v33, %v1202_v33  ;;  %v2686_v43 = vpop.f32.mrf.mxu0  ;;  %1558 = vst.msk [vmem:[%s3522_s4 + $0xb4] sm:$0xf] %vm1512_vm1, %v2548_v36  ;;  %v2252_v46 = vsel %vm319_vm0, %v2144_v38, 0.0  ;;  %v1194_v47 = vadd.f32 %v1193_v39, %v642_v34  ;;  %v2149_v2 = vmul.f32 %v1202_v33, %v1202_v33 }
 0x12b   :  { %v2752_v48 = vpop.f32.mrf.mxu1  ;;  %v2056_v49 = vadd.f32 %v2055_v44, %v2054_v41  ;;  %v2253_v50 = vadd.f32 %v2252_v46, %v2251_v40  ;;  %v2063_v16 = vsel %vm319_vm0, %v1202_v33, 0.0 }
 0x12c   :  { %1563 = vst.msk [vmem:[%s3522_s4 + $0xc8] sm:$0xf] %vm1512_vm1, %v2553_v42  ;;  %v1205_v51 = vadd.f32 %v2752_v48, %v2686_v43  ;;  %v645_v52 = vpop.f32.mrf.mxu0  ;;  %v2551_v55 = vpack.c.bf16 %v1194_v47, %v1194_v47  ;;  %v2147_v56 = vmul.f32 %v1194_v47, %v1194_v47  ;;  %v2059_v63 = vsel %vm319_vm0, %v1194_v47, 0.0 }
 0x12d   :  { %v1196_v57 = vpop.f32.mrf.mxu1  ;;  %v2255_v58 = vadd.f32 %v2254_v53, %v2253_v50  ;;  %v2058_v59 = vadd.f32 %v2057_v54, %v2056_v49  ;;  %v2262_v25 = vsel %vm319_vm0, %v2149_v2, 0.0 }
 0x12e   :  { %v2554_v60 = vpack.c.bf16 %v1205_v51, %v1205_v51  ;;  %v2689_v61 = vpop.f32.mrf.mxu0  ;;  %1561 = vst.msk [vmem:[%s3522_s4 + $0xc0] sm:$0xf] %vm1512_vm1, %v2551_v55  ;;  %v1197_v0 = vadd.f32 %v1196_v57, %v645_v52  ;;  %v2258_v7 = vsel %vm319_vm0, %v2147_v56, 0.0  ;;  %v2150_v17 = vmul.f32 %v1205_v51, %v1205_v51 }
 0x12f   :  { %v2755_v1 = vpop.f32.mrf.mxu1  ;;  %v2060_v3 = vadd.f32 %v2059_v63, %v2058_v59  ;;  %v2257_v4 = vadd.f32 %v2256_v62, %v2255_v58  ;;  %v2065_v26 = vsel %vm319_vm0, %v1205_v51, 0.0 }
 0x130   :  { %1564 = vst.msk [vmem:[%s3522_s4 + $0xcc] sm:$0xf] %vm1512_vm1, %v2554_v60  ;;  %v1218_v5 = vadd.f32 %v2755_v1, %v2689_v61  ;;  %v658_v6 = vpop.f32.mrf.mxu0  ;;  %v2552_v8 = vpack.c.bf16 %v1197_v0, %v1197_v0  ;;  %v2061_v9 = vsel %vm319_vm0, %v1197_v0, 0.0  ;;  %v2148_v10 = vmul.f32 %v1197_v0, %v1197_v0 }
 0x131   :  { %v1209_v11 = vpop.f32.mrf.mxu1  ;;  %v2259_v12 = vadd.f32 %v2258_v7, %v2257_v4  ;;  %v2062_v13 = vadd.f32 %v2061_v9, %v2060_v3  ;;  %v2264_v34 = vsel %vm319_vm0, %v2150_v17, 0.0 }
 0x132   :  { %v2557_v14 = vpack.c.bf16 %v1218_v5, %v1218_v5  ;;  %v2690_v15 = vpop.f32.mrf.mxu0  ;;  %1562 = vst.msk [vmem:[%s3522_s4 + $0xc4] sm:$0xf] %vm1512_vm1, %v2552_v8  ;;  %v2260_v18 = vsel %vm319_vm0, %v2148_v10, 0.0  ;;  %v1210_v19 = vadd.f32 %v1209_v11, %v658_v6  ;;  %v2153_v38 = vmul.f32 %v1218_v5, %v1218_v5 }
 0x133   :  { %v2756_v20 = vpop.f32.mrf.mxu1  ;;  %v2064_v21 = vadd.f32 %v2063_v16, %v2062_v13  ;;  %v2261_v22 = vadd.f32 %v2260_v18, %v2259_v12  ;;  %v2071_v52 = vsel %vm319_vm0, %v1218_v5, 0.0 }
 0x134   :  { %1567 = vst.msk [vmem:[%s3522_s4 + $0xd8] sm:$0xf] %vm1512_vm1, %v2557_v14  ;;  %v1221_v23 = vadd.f32 %v2756_v20, %v2690_v15  ;;  %v661_v24 = vpop.f32.mrf.mxu0  ;;  %v2555_v27 = vpack.c.bf16 %v1210_v19, %v1210_v19  ;;  %v2151_v28 = vmul.f32 %v1210_v19, %v1210_v19  ;;  %v2067_v35 = vsel %vm319_vm0, %v1210_v19, 0.0 }
 0x135   :  { %v1212_v29 = vpop.f32.mrf.mxu1  ;;  %v2263_v30 = vadd.f32 %v2262_v25, %v2261_v22  ;;  %v2066_v31 = vadd.f32 %v2065_v26, %v2064_v21  ;;  %v2270_v61 = vsel %vm319_vm0, %v2153_v38, 0.0 }
 0x136   :  { %v2558_v32 = vpack.c.bf16 %v1221_v23, %v1221_v23  ;;  %v2693_v33 = vpop.f32.mrf.mxu0  ;;  %1565 = vst.msk [vmem:[%s3522_s4 + $0xd0] sm:$0xf] %vm1512_vm1, %v2555_v27  ;;  %v1213_v36 = vadd.f32 %v1212_v29, %v661_v24  ;;  %v2266_v43 = vsel %vm319_vm0, %v2151_v28, 0.0  ;;  %v2154_v53 = vmul.f32 %v1221_v23, %v1221_v23 }
 0x137   :  { %v2759_v37 = vpop.f32.mrf.mxu1  ;;  %v2068_v39 = vadd.f32 %v2067_v35, %v2066_v31  ;;  %v2265_v40 = vadd.f32 %v2264_v34, %v2263_v30  ;;  %v2073_v62 = vsel %vm319_vm0, %v1221_v23, 0.0 }
 0x138   :  { %1568 = vst.msk [vmem:[%s3522_s4 + $0xdc] sm:$0xf] %vm1512_vm1, %v2558_v32  ;;  %v1234_v41 = vadd.f32 %v2759_v37, %v2693_v33  ;;  %v674_v42 = vpop.f32.mrf.mxu0  ;;  %v2556_v44 = vpack.c.bf16 %v1213_v36, %v1213_v36  ;;  %v2069_v45 = vsel %vm319_vm0, %v1213_v36, 0.0  ;;  %v2152_v46 = vmul.f32 %v1213_v36, %v1213_v36 }
 0x139   :  { %v1225_v47 = vpop.f32.mrf.mxu1  ;;  %v2267_v48 = vadd.f32 %v2266_v43, %v2265_v40  ;;  %v2070_v49 = vadd.f32 %v2069_v45, %v2068_v39  ;;  %v2272_v6 = vsel %vm319_vm0, %v2154_v53, 0.0 }
 0x13a   :  { %v2561_v50 = vpack.c.bf16 %v1234_v41, %v1234_v41  ;;  %v2694_v51 = vpop.f32.mrf.mxu0  ;;  %1566 = vst.msk [vmem:[%s3522_s4 + $0xd4] sm:$0xf] %vm1512_vm1, %v2556_v44  ;;  %v2268_v54 = vsel %vm319_vm0, %v2152_v46, 0.0  ;;  %v1226_v55 = vadd.f32 %v1225_v47, %v674_v42  ;;  %v2157_v10 = vmul.f32 %v1234_v41, %v1234_v41 }
 0x13b   :  { %v2760_v56 = vpop.f32.mrf.mxu1  ;;  %v2072_v57 = vadd.f32 %v2071_v52, %v2070_v49  ;;  %v2269_v58 = vadd.f32 %v2268_v54, %v2267_v48  ;;  %v2079_v24 = vsel %vm319_vm0, %v1234_v41, 0.0 }
 0x13c   :  { %1571 = vst.msk [vmem:[%s3522_s4 + $0xe8] sm:$0xf] %vm1512_vm1, %v2561_v50  ;;  %v1237_v59 = vadd.f32 %v2760_v56, %v2694_v51  ;;  %v677_v60 = vpop.f32.mrf.mxu0  ;;  %v2559_v63 = vpack.c.bf16 %v1226_v55, %v1226_v55  ;;  %v2155_v0 = vmul.f32 %v1226_v55, %v1226_v55  ;;  %v2075_v7 = vsel %vm319_vm0, %v1226_v55, 0.0 }
 0x13d   :  { %v1228_v1 = vpop.f32.mrf.mxu1  ;;  %v2271_v2 = vadd.f32 %v2270_v61, %v2269_v58  ;;  %v2074_v3 = vadd.f32 %v2073_v62, %v2072_v57  ;;  %v2278_v33 = vsel %vm319_vm0, %v2157_v10, 0.0 }
 0x13e   :  { %v2562_v4 = vpack.c.bf16 %v1237_v59, %v1237_v59  ;;  %v2697_v5 = vpop.f32.mrf.mxu0  ;;  %1569 = vst.msk [vmem:[%s3522_s4 + $0xe0] sm:$0xf] %vm1512_vm1, %v2559_v63  ;;  %v1229_v8 = vadd.f32 %v1228_v1, %v677_v60  ;;  %v2274_v15 = vsel %vm319_vm0, %v2155_v0, 0.0  ;;  %v2158_v25 = vmul.f32 %v1237_v59, %v1237_v59 }
 0x13f   :  { %v2763_v9 = vpop.f32.mrf.mxu1  ;;  %v2076_v11 = vadd.f32 %v2075_v7, %v2074_v3  ;;  %v2273_v12 = vadd.f32 %v2272_v6, %v2271_v2  ;;  %v2081_v34 = vsel %vm319_vm0, %v1237_v59, 0.0 }
 0x140   :  { %1572 = vst.msk [vmem:[%s3522_s4 + $0xec] sm:$0xf] %vm1512_vm1, %v2562_v4  ;;  %v1250_v13 = vadd.f32 %v2763_v9, %v2697_v5  ;;  %v690_v14 = vpop.f32.mrf.mxu0  ;;  %v2560_v16 = vpack.c.bf16 %v1229_v8, %v1229_v8  ;;  %v2077_v17 = vsel %vm319_vm0, %v1229_v8, 0.0  ;;  %v2156_v18 = vmul.f32 %v1229_v8, %v1229_v8 }
 0x141   :  { %v1241_v19 = vpop.f32.mrf.mxu1  ;;  %v2275_v20 = vadd.f32 %v2274_v15, %v2273_v12  ;;  %v2078_v21 = vadd.f32 %v2077_v17, %v2076_v11  ;;  %v2280_v41 = vsel %vm319_vm0, %v2158_v25, 0.0 }
 0x142   :  { %v2565_v22 = vpack.c.bf16 %v1250_v13, %v1250_v13  ;;  %v2698_v23 = vpop.f32.mrf.mxu0  ;;  %1570 = vst.msk [vmem:[%s3522_s4 + $0xe4] sm:$0xf] %vm1512_vm1, %v2560_v16  ;;  %v2276_v26 = vsel %vm319_vm0, %v2156_v18, 0.0  ;;  %v1242_v27 = vadd.f32 %v1241_v19, %v690_v14  ;;  %v2161_v44 = vmul.f32 %v1250_v13, %v1250_v13 }
 0x143   :  { %v2764_v28 = vpop.f32.mrf.mxu1  ;;  %v2080_v29 = vadd.f32 %v2079_v24, %v2078_v21  ;;  %v2277_v30 = vadd.f32 %v2276_v26, %v2275_v20  ;;  %v2087_v53 = vsel %vm319_vm0, %v1250_v13, 0.0 }
 0x144   :  { %1575 = vst.msk [vmem:[%s3522_s4 + $0xf8] sm:$0xf] %vm1512_vm1, %v2565_v22  ;;  %v1253_v31 = vadd.f32 %v2764_v28, %v2698_v23  ;;  %v693_v32 = vpop.f32.mrf.mxu0  ;;  %v2563_v35 = vpack.c.bf16 %v1242_v27, %v1242_v27  ;;  %v2159_v36 = vmul.f32 %v1242_v27, %v1242_v27  ;;  %v2083_v42 = vsel %vm319_vm0, %v1242_v27, 0.0 }
 0x145   :  { %v1244_v37 = vpop.f32.mrf.mxu1  ;;  %v2279_v38 = vadd.f32 %v2278_v33, %v2277_v30  ;;  %v2082_v39 = vadd.f32 %v2081_v34, %v2080_v29  ;;  %v2286_v58 = vsel %vm319_vm0, %v2161_v44, 0.0 }
 0x146   :  { %v2566_v40 = vpack.c.bf16 %v1253_v31, %v1253_v31  ;;  %1573 = vst.msk [vmem:[%s3522_s4 + $0xf0] sm:$0xf] %vm1512_vm1, %v2563_v35  ;;  %v1245_v43 = vadd.f32 %v1244_v37, %v693_v32  ;;  %v2282_v47 = vsel %vm319_vm0, %v2159_v36, 0.0  ;;  %v2162_v54 = vmul.f32 %v1253_v31, %v1253_v31 }
 0x147   :  { %v2084_v45 = vadd.f32 %v2083_v42, %v2082_v39  ;;  %v2281_v46 = vadd.f32 %v2280_v41, %v2279_v38  ;;  %v2089_v59 = vsel %vm319_vm0, %v1253_v31, 0.0 }
 0x148   :  { %1576 = vst.msk [vmem:[%s3522_s4 + $0xfc] sm:$0xf] %vm1512_vm1, %v2566_v40  ;;  %v2564_v48 = vpack.c.bf16 %v1245_v43, %v1245_v43  ;;  %v2085_v49 = vsel %vm319_vm0, %v1245_v43, 0.0  ;;  %v2160_v50 = vmul.f32 %v1245_v43, %v1245_v43  ;;  %v2288_v62 = vsel %vm319_vm0, %v2162_v54, 0.0 }
 0x149   :  { %v2283_v51 = vadd.f32 %v2282_v47, %v2281_v46  ;;  %v2086_v52 = vadd.f32 %v2085_v49, %v2084_v45 }
 0x14a   :  { %1574 = vst.msk [vmem:[%s3522_s4 + $0xf4] sm:$0xf] %vm1512_vm1, %v2564_v48  ;;  %v2284_v55 = vsel %vm319_vm0, %v2160_v50, 0.0 }
 0x14b   :  { %v2088_v56 = vadd.f32 %v2087_v53, %v2086_v52  ;;  %v2285_v57 = vadd.f32 %v2284_v55, %v2283_v51 }
 0x14d   :  { %v2090_v60 = vadd.f32 %v2089_v59, %v2088_v56  ;;  %v2287_v61 = vadd.f32 %v2286_v58, %v2285_v57 }
 0x14f   :  { %v2091_v63 = vrot.slane %v2090_v60, 4  ;;  %v2289_v0 = vadd.f32 %v2288_v62, %v2287_v61 }
 0x151   :  { %v2092_v1 = vadd.f32 %v2091_v63, %v2090_v60  ;;  %v2290_v2 = vrot.slane %v2289_v0, 4 }
 0x153   :  { %v2093_v3 = vrot.slane %v2092_v1, 2  ;;  %v2291_v4 = vadd.f32 %v2290_v2, %v2289_v0 }
 0x155   :  { %v2094_v5 = vadd.f32 %v2093_v3, %v2092_v1  ;;  %v2292_v6 = vrot.slane %v2291_v4, 2 }
 0x157   :  { %v2095_v7 = vrot.slane %v2094_v5, 1  ;;  %v2293_v8 = vadd.f32 %v2292_v6, %v2291_v4 }
 0x159   :  { %v2096_v9 = vadd.f32 %v2095_v7, %v2094_v5  ;;  %v2294_v10 = vrot.slane %v2293_v8, 1 }
 0x15b   :  { %2098 = vst.msk [vmem:[%s3523_s5] sm:$0x1] %vm2097_vm2, %v2096_v9  ;;  %v2295_v11 = vadd.f32 %v2294_v10, %v2293_v8 }
 0x15d   :  { %2296 = vst.msk [vmem:[%s3524_s6] sm:$0x1] %vm2097_vm2, %v2295_v11 }

</bundles_post_ra>
